<compile_context>
chip_gen: v7x
topology: tpu7x:2x2x1
jax: 0.10.0
libtpu: 0.0.40
codegen_flags: <defaults>
</compile_context>

<pallas_src>
import jax
import jax.numpy as jnp
from jax import lax
from jax.experimental import pallas as pl
from jax.experimental.pallas import tpu as pltpu


# ----------------------------------------------------------------------------
# Shape constants implied by the module (3x28x28 input, 5x5 convs, 2x2 pools)
# ----------------------------------------------------------------------------
H0, W0, C0 = 28, 28, 3
K = 5
H1, W1c, C1 = 24, 24, 16        # conv1 output
H1P, W1P = 12, 12               # pool1 output
H2, W2c, C2 = 8, 8, 32          # conv2 output
H2P, W2P = 4, 4                 # pool2 output
FIN = H2P * W2P * C2            # 512
FHID = 512
NCLS = 10
LANE = 128

XW = W0 * C0                    # 84 real input lanes
XWP = LANE                      # padded to 128
CW1 = W1c * C1                  # 384  conv1 row width (lane-dense)
PW1 = W1P * C1                  # 192  pool1 row width (real lanes)
P1WPAD = 2 * LANE               # 256  pool1 row width padded -> clean lane concat
CW2 = W2c * C2                  # 256  conv2 row width
PW2 = W2P * C2                  # 128  pool2 row width
NPAD = LANE                     # fc2 logits padded to one full vreg lane width
NEG = -1e9                      # bias for padded logit columns (exp -> 0)

B_TILE = 8                      # images per grid step (multiple of 8 keeps every
                                # sublane slice tile-aligned for f32 values)


# ----------------------------------------------------------------------------
# Fused Pallas kernel: B_TILE images per grid step
# ----------------------------------------------------------------------------
def _badnet_fused_kernel(x_ref, w1_ref, b1_ref, pc1_ref, pr1_ref,
                         w2_ref, b2_ref, pc2_ref, pr2_ref,
                         wf1_ref, bf1_ref, wf2_ref, bf2_ref, o_ref):
    f32, bf16 = jnp.float32, jnp.bfloat16
    bt = x_ref.shape[0]                                    # images per grid step

    # C1: Conv2d(3,16,5)+ReLU as ONE long-K GEMM.  The 5 kernel-row windows of x
    # (each 128 zero-padded lanes) are loaded straight from the ref and
    # concatenated along lanes, so the MXU accumulates over K=640 internally.
    wins1 = [x_ref[:, pl.ds(i, H1), :] for i in range(K)]  # 5 x (bt, 24, 128) f32
    lhs1 = jnp.concatenate(wins1, axis=-1).reshape(bt * H1, K * XWP)
    y1 = jnp.dot(lhs1.astype(bf16), w1_ref[...],
                 preferred_element_type=f32)               # (bt*24, 384)
    y1 = jnp.maximum(y1 + b1_ref[...], 0.0)

    # S2: AvgPool2d(2,2): lane pooling as a GEMM (padded to 256 lanes), then
    # sublane pooling as a block matrix whose output rows are pool-row-major
    # (row = pool_row*bt + image) so conv2 windows are aligned sublane slices.
    t1 = jnp.dot(y1.astype(bf16), pc1_ref[...], preferred_element_type=f32)  # (bt*24, 256)
    p1 = jnp.dot(pr1_ref[...], t1.astype(bf16), preferred_element_type=f32)  # (12*bt, 256)

    # C3: Conv2d(16,32,5)+ReLU as one long-K GEMM over 5 aligned row windows.
    wins2 = [p1[i * bt:(i + H2) * bt, :] for i in range(K)]
    lhs2 = jnp.concatenate(wins2, axis=-1)                 # (8*bt, 1280) f32
    y2 = jnp.dot(lhs2.astype(bf16), w2_ref[...],
                 preferred_element_type=f32)               # (8*bt, 256)
    y2 = jnp.maximum(y2 + b2_ref[...], 0.0)

    # S4: AvgPool2d(2,2), same two-GEMM scheme (output rows = pool_row*bt + image).
    t2 = jnp.dot(y2.astype(bf16), pc2_ref[...], preferred_element_type=f32)  # (8*bt, 128)
    p2 = jnp.dot(pr2_ref[...], t2.astype(bf16), preferred_element_type=f32)  # (4*bt, 128)

    # F6: Linear(512,512)+ReLU as ONE (bt,512)x(512,512) GEMM.  The PyTorch NCHW
    # flatten is folded into wf1's host-side row permutation, so flattening here
    # is just a lane concat of the 4 aligned pool-row groups.
    rows = [p2[r * bt:(r + 1) * bt, :] for r in range(H2P)]
    flat = jnp.concatenate(rows, axis=-1)                  # (bt, 512) f32
    h = jnp.dot(flat.astype(bf16), wf1_ref[...], preferred_element_type=f32)
    h = jnp.maximum(h + bf1_ref[...], 0.0)

    # F7: Linear(512,10)+LogSoftmax, lane-padded to 128 (padded bias = -1e9).
    logits = jnp.dot(h.astype(bf16), wf2_ref[...],
                     preferred_element_type=f32) + bf2_ref[...]
    m = jnp.max(logits, axis=-1, keepdims=True)
    s = logits - m
    lse = jnp.log(jnp.sum(jnp.exp(s), axis=-1, keepdims=True))
    o_ref[...] = (s - lse).astype(o_ref.dtype)


# ----------------------------------------------------------------------------
# Host-side weight preparation (one-time layout plumbing, hoisted out of the
# per-call forward path)
# ----------------------------------------------------------------------------
def _banded_conv_weights(w_oihw, in_w, out_w):
    """W[i, wj*cin+c, ow*cout+co] = w[co, c, i, wj-ow] for 0 <= wj-ow < K else 0."""
    cout, cin, kh, kw = w_oihw.shape
    w_t = jnp.transpose(w_oihw, (2, 3, 1, 0))              # (kh, kw, cin, cout)
    j = jnp.arange(kw)[:, None, None]
    wj = jnp.arange(in_w)[None, :, None]
    ow = jnp.arange(out_w)[None, None, :]
    sel = (wj == ow + j).astype(w_oihw.dtype)              # (kw, in_w, out_w)
    wb = jnp.einsum("jwo,ijcf->iwcof", sel, w_t)           # (kh, in_w, cin, out_w, cout)
    return wb.reshape(kh, in_w * cin, out_w * cout)


def _pool_row_mat(in_h, out_h, dtype=jnp.float32):
    eq = (jnp.arange(in_h)[None, :] // 2) == jnp.arange(out_h)[:, None]
    return 0.5 * eq.astype(dtype)                          # (out_h, in_h)


def _pool_col_mat(in_w, out_w, c, dtype=jnp.float32):
    return jnp.kron(_pool_row_mat(in_w, out_w, dtype).T, jnp.eye(c, dtype=dtype))


def _pool_rows_grouped(in_h, out_h, b_tile, *, in_img_major, dtype=jnp.float32):
    """Row pool (avg adjacent row pairs, weight 0.5) over a B_TILE image slab.

    Output rows are pool-row-major (row = r*b_tile + b).  Input rows are either
    image-major (b*in_h + h) or row-major (h*b_tile + b).
    """
    m, kd = out_h * b_tile, in_h * b_tile
    rr = jnp.arange(m) // b_tile
    bb = jnp.arange(m) % b_tile
    kk = jnp.arange(kd)
    if in_img_major:
        kb, kh = kk // in_h, kk % in_h
    else:
        kh, kb = kk // b_tile, kk % b_tile
    hit = (kb[None, :] == bb[:, None]) & ((kh[None, :] // 2) == rr[:, None])
    return 0.5 * hit.astype(dtype)


def prepare_params(params, b_tile=B_TILE):
    """One-time weight prep: banded conv weights, pool matrices, fc permutation."""
    w1, b1, w2, b2, wf1, bf1, wf2, bf2 = params
    f32, bf16 = jnp.float32, jnp.bfloat16

    # conv1: banded weights, contraction padded 84 -> 128 per kernel row, then
    # concatenated over the 5 kernel rows into one long-K (640, 384) weight.
    w1b = _banded_conv_weights(w1.astype(f32), W0, W1c)             # (5, 84, 384)
    w1b = jnp.pad(w1b, ((0, 0), (0, XWP - XW), (0, 0)))             # (5, 128, 384)
    w1cat = w1b.reshape(K * XWP, CW1).astype(bf16)                  # (640, 384)
    b1row = jnp.tile(b1.astype(f32), W1c).reshape(1, CW1)

    # pool1: lane pool padded to 256 output lanes (clean 128-boundary concat for
    # conv2), sublane pool as grouped block matrix (output = pool-row-major).
    pc1 = _pool_col_mat(W1c, W1P, C1)                               # (384, 192)
    pc1p = jnp.pad(pc1, ((0, 0), (0, P1WPAD - PW1))).astype(bf16)   # (384, 256)
    pr1g = _pool_rows_grouped(H1, H1P, b_tile, in_img_major=True).astype(bf16)

    # conv2: banded weights, contraction padded 192 -> 256 per kernel row
    # (matching the zero-padded pool1 lanes), concatenated to (1280, 256).
    w2b = _banded_conv_weights(w2.astype(f32), W1P, W2c)            # (5, 192, 256)
    w2b = jnp.pad(w2b, ((0, 0), (0, P1WPAD - PW1), (0, 0)))         # (5, 256, 256)
    w2cat = w2b.reshape(K * P1WPAD, CW2).astype(bf16)               # (1280, 256)
    b2row = jnp.tile(b2.astype(f32), W2c).reshape(1, CW2)

    pc2 = _pool_col_mat(W2c, W2P, C2).astype(bf16)                  # (256, 128)
    pr2g = _pool_rows_grouped(H2, H2P, b_tile, in_img_major=False).astype(bf16)

    # fc1: fold PyTorch's NCHW flatten (c*16 + h*4 + w) into a row permutation so
    # the kernel's (h'*128 + w'*32 + c) lane-concat flatten is consumed directly.
    hh = jnp.arange(H2P)[:, None, None]
    ww = jnp.arange(W2P)[None, :, None]
    cc = jnp.arange(C2)[None, None, :]
    src = (cc * (H2P * W2P) + hh * W2P + ww).reshape(FIN)
    wf1r = wf1.astype(f32)[src, :].astype(bf16)                     # (512, 512)
    bf1row = bf1.astype(f32).reshape(1, FHID)

    wf2p = jnp.pad(wf2.astype(f32), ((0, 0), (0, NPAD - NCLS))).astype(bf16)
    bf2row = jnp.concatenate(
        [bf2.astype(f32), jnp.full((NPAD - NCLS,), NEG, f32)]).reshape(1, NPAD)

    return (w1cat, b1row, pc1p, pr1g, w2cat, b2row, pc2, pr2g,
            wf1r, bf1row, wf2p, bf2row)


# ----------------------------------------------------------------------------
# Forward wrapper
# ----------------------------------------------------------------------------
def _forward(x_nchw, prep, b_tile):
    B = x_nchw.shape[0]
    bp = -(-B // b_tile) * b_tile                          # pad batch to B_TILE multiple

    # NCHW -> [B, 28, 28*3] (lanes packed as w*3 + c), zero-padded to 128 lanes.
    x = jnp.transpose(x_nchw, (0, 2, 3, 1)).reshape(B, H0, XW).astype(jnp.float32)
    x = jnp.pad(x, ((0, bp - B), (0, 0), (0, XWP - XW)))

    full2 = lambda g: (0, 0)
    out = pl.pallas_call(
        _badnet_fused_kernel,
        out_shape=jax.ShapeDtypeStruct((bp, NPAD), jnp.float32),
        grid=(bp // b_tile,),
        in_specs=[
            pl.BlockSpec((b_tile, H0, XWP), lambda g: (g, 0, 0)),   # image slab
            pl.BlockSpec((K * XWP, CW1), full2),                    # conv1 long-K weights
            pl.BlockSpec((1, CW1), full2),                          # conv1 bias row
            pl.BlockSpec((CW1, P1WPAD), full2),                     # pool1 col matrix
            pl.BlockSpec((H1P * b_tile, H1 * b_tile), full2),       # pool1 row matrix (grouped)
            pl.BlockSpec((K * P1WPAD, CW2), full2),                 # conv2 long-K weights
            pl.BlockSpec((1, CW2), full2),                          # conv2 bias row
            pl.BlockSpec((CW2, PW2), full2),                        # pool2 col matrix
            pl.BlockSpec((H2P * b_tile, H2 * b_tile), full2),       # pool2 row matrix (grouped)
            pl.BlockSpec((FIN, FHID), full2),                       # fc1 weights (permuted)
            pl.BlockSpec((1, FHID), full2),                         # fc1 bias
            pl.BlockSpec((FIN, NPAD), full2),                       # fc2 weights (N-padded)
            pl.BlockSpec((1, NPAD), full2),                         # fc2 bias (pad = -1e9)
        ],
        out_specs=pl.BlockSpec((b_tile, NPAD), lambda g: (g, 0)),
        compiler_params=pltpu.CompilerParams(
            dimension_semantics=("parallel",)),
    )(x, *prep)
    return out[:B, :NCLS]


badnet_forward = jax.jit(_forward, static_argnames=("b_tile",))


# ----------------------------------------------------------------------------
# Deterministic parameter init (PyTorch-default-like uniform bounds)
# ----------------------------------------------------------------------------
def init_params(key):
    ks = jax.random.split(key, 8)

    def u(k, shape, fan_in):
        bound = 1.0 / jnp.sqrt(jnp.float32(fan_in))
        return jax.random.uniform(k, shape, jnp.float32, -bound, bound)

    w1 = u(ks[0], (16, 3, 5, 5), 3 * 25)     # conv1 weight (OIHW)
    b1 = u(ks[1], (16,), 3 * 25)
    w2 = u(ks[2], (32, 16, 5, 5), 16 * 25)   # conv2 weight (OIHW)
    b2 = u(ks[3], (32,), 16 * 25)
    wf1 = u(ks[4], (512, 512), 512)          # fc1 weight, [in, out] layout
    bf1 = u(ks[5], (512,), 512)
    wf2 = u(ks[6], (512, 10), 512)           # fc2 weight, [in, out] layout
    bf2 = u(ks[7], (10,), 512)
    return (w1, b1, w2, b2, wf1, bf1, wf2, bf2)


# ----------------------------------------------------------------------------
# Pure-JAX reference (for correctness check)
# ----------------------------------------------------------------------------
def reference_forward(x_nchw, params):
    w1, b1, w2, b2, wf1, bf1, wf2, bf2 = params
    B = x_nchw.shape[0]
    hp = jax.lax.Precision.HIGHEST

    def conv(x, w, b):
        y = lax.conv_general_dilated(
            x, w, (1, 1), "VALID",
            dimension_numbers=("NCHW", "OIHW", "NCHW"), precision=hp)
        return jnp.maximum(y + b[None, :, None, None], 0.0)

    def pool(x):
        Bx, C, Hh, Ww = x.shape
        return x.reshape(Bx, C, Hh // 2, 2, Ww // 2, 2).mean(axis=(3, 5))

    y = pool(conv(x_nchw, w1, b1))
    y = pool(conv(y, w2, b2))
    flat = y.reshape(B, -1)
    h = jnp.maximum(jnp.dot(flat, wf1, precision=hp) + bf1, 0.0)
    logits = jnp.dot(h, wf2, precision=hp) + bf2
    return jax.nn.log_softmax(logits, axis=-1)


if __name__ == "__main__":
    key = jax.random.PRNGKey(0)
    k_x, k_p = jax.random.split(key)
    # Module implies 3-channel 28x28 input (Conv2d(3,16,5) and 32*4*4=512 flatten).
    B = 16                       # 2 grid steps of B_TILE=8 -> both v7x TCs busy
    x = jax.random.normal(k_x, (B, 3, 28, 28), dtype=jnp.float32)
    params = init_params(k_p)

    prep = prepare_params(params, b_tile=B_TILE)   # one-time layout plumbing
    out = badnet_forward(x, prep, b_tile=B_TILE)
    out = jax.block_until_ready(out)

    assert out.shape == (B, 10), out.shape
    # log-softmax rows must exponentiate to ~1
    assert jnp.allclose(jnp.sum(jnp.exp(out), axis=-1), 1.0, atol=1e-4)
    # compare against pure-JAX f32 reference (bf16 matmul operands -> looser tol)
    ref = reference_forward(x, params)
    assert jnp.allclose(out, ref, rtol=3e-2, atol=3e-2), (
        "max abs diff " + str(float(jnp.max(jnp.abs(out - ref)))))

    print("KERNEL_OK")
</pallas_src>

<mosaic_0001>
module attributes {stable_mosaic.version = 11 : i64} {
  func.func @_badnet_fused_kernel(%arg0: i32, %arg1: memref<8x28x128xf32, #tpu.memory_space<vmem>>, %arg2: memref<640x384xbf16, #tpu.memory_space<vmem>>, %arg3: memref<1x384xf32, #tpu.memory_space<vmem>>, %arg4: memref<384x256xbf16, #tpu.memory_space<vmem>>, %arg5: memref<96x192xbf16, #tpu.memory_space<vmem>>, %arg6: memref<1280x256xbf16, #tpu.memory_space<vmem>>, %arg7: memref<1x256xf32, #tpu.memory_space<vmem>>, %arg8: memref<256x128xbf16, #tpu.memory_space<vmem>>, %arg9: memref<32x64xbf16, #tpu.memory_space<vmem>>, %arg10: memref<512x512xbf16, #tpu.memory_space<vmem>>, %arg11: memref<1x512xf32, #tpu.memory_space<vmem>>, %arg12: memref<512x128xbf16, #tpu.memory_space<vmem>>, %arg13: memref<1x128xf32, #tpu.memory_space<vmem>>, %arg14: memref<8x128xf32, #tpu.memory_space<vmem>>) attributes {dimension_semantics = [#tpu.dimension_semantics<parallel>], iteration_bounds = array<i64: 2>, scalar_prefetch = 0 : i64, scratch_operands = 0 : i64, tpu.core_type = #tpu.core_type<tc>, window_params = [{transform_indices = @transform_0, window_bounds = array<i64: 8, 28, 128>}, {pipeline_mode = #tpu.pipeline_mode<synchronous>, transform_indices = @transform_1, window_bounds = array<i64: 640, 384>}, {pipeline_mode = #tpu.pipeline_mode<synchronous>, transform_indices = @transform_2, window_bounds = array<i64: 1, 384>}, {pipeline_mode = #tpu.pipeline_mode<synchronous>, transform_indices = @transform_3, window_bounds = array<i64: 384, 256>}, {pipeline_mode = #tpu.pipeline_mode<synchronous>, transform_indices = @transform_4, window_bounds = array<i64: 96, 192>}, {pipeline_mode = #tpu.pipeline_mode<synchronous>, transform_indices = @transform_5, window_bounds = array<i64: 1280, 256>}, {pipeline_mode = #tpu.pipeline_mode<synchronous>, transform_indices = @transform_6, window_bounds = array<i64: 1, 256>}, {pipeline_mode = #tpu.pipeline_mode<synchronous>, transform_indices = @transform_7, window_bounds = array<i64: 256, 128>}, {pipeline_mode = #tpu.pipeline_mode<synchronous>, transform_indices = @transform_8, window_bounds = array<i64: 32, 64>}, {pipeline_mode = #tpu.pipeline_mode<synchronous>, transform_indices = @transform_9, window_bounds = array<i64: 512, 512>}, {pipeline_mode = #tpu.pipeline_mode<synchronous>, transform_indices = @transform_10, window_bounds = array<i64: 1, 512>}, {pipeline_mode = #tpu.pipeline_mode<synchronous>, transform_indices = @transform_11, window_bounds = array<i64: 512, 128>}, {pipeline_mode = #tpu.pipeline_mode<synchronous>, transform_indices = @transform_12, window_bounds = array<i64: 1, 128>}, {transform_indices = @transform_13, window_bounds = array<i64: 8, 128>}]} {
    %c0 = arith.constant 0 : index
    %c0_0 = arith.constant 0 : index
    %c0_1 = arith.constant 0 : index
    %0 = vector.load %arg1[%c0, %c0_0, %c0_1] : memref<8x28x128xf32, #tpu.memory_space<vmem>>, vector<8x24x128xf32>
    %c0_2 = arith.constant 0 : index
    %c1 = arith.constant 1 : index
    %c0_3 = arith.constant 0 : index
    %1 = vector.load %arg1[%c0_2, %c1, %c0_3] : memref<8x28x128xf32, #tpu.memory_space<vmem>>, vector<8x24x128xf32>
    %c0_4 = arith.constant 0 : index
    %c2 = arith.constant 2 : index
    %c0_5 = arith.constant 0 : index
    %2 = vector.load %arg1[%c0_4, %c2, %c0_5] : memref<8x28x128xf32, #tpu.memory_space<vmem>>, vector<8x24x128xf32>
    %c0_6 = arith.constant 0 : index
    %c3 = arith.constant 3 : index
    %c0_7 = arith.constant 0 : index
    %3 = vector.load %arg1[%c0_6, %c3, %c0_7] : memref<8x28x128xf32, #tpu.memory_space<vmem>>, vector<8x24x128xf32>
    %c0_8 = arith.constant 0 : index
    %c4 = arith.constant 4 : index
    %c0_9 = arith.constant 0 : index
    %4 = vector.load %arg1[%c0_8, %c4, %c0_9] : memref<8x28x128xf32, #tpu.memory_space<vmem>>, vector<8x24x128xf32>
    %5 = tpu.concatenate %0, %1, %2, %3, %4 in 2 : vector<8x24x128xf32>, vector<8x24x128xf32>, vector<8x24x128xf32>, vector<8x24x128xf32>, vector<8x24x128xf32> -> vector<8x24x640xf32>
    %6 = vector.shape_cast %5 : vector<8x24x640xf32> to vector<192x640xf32>
    %7 = arith.truncf %6 : vector<192x640xf32> to vector<192x640xbf16>
    %c0_10 = arith.constant 0 : index
    %c0_11 = arith.constant 0 : index
    %8 = vector.load %arg2[%c0_10, %c0_11] : memref<640x384xbf16, #tpu.memory_space<vmem>>, vector<640x384xbf16>
    %cst = arith.constant dense<0.000000e+00> : vector<192x384xf32>
    %9 = tpu.matmul %7, %8, %cst {dimension_numbers = #tpu.dot_dimension_numbers<[1], [0], [0], [1], [0, 0, 1, 1], [], []>} : vector<192x640xbf16>, vector<640x384xbf16>, vector<192x384xf32> -> vector<192x384xf32>
    %c0_12 = arith.constant 0 : index
    %c0_13 = arith.constant 0 : index
    %10 = vector.load %arg3[%c0_12, %c0_13] : memref<1x384xf32, #tpu.memory_space<vmem>>, vector<1x384xf32>
    %11 = vector.broadcast %10 : vector<1x384xf32> to vector<192x384xf32>
    %12 = arith.addf %9, %11 : vector<192x384xf32>
    %cst_14 = arith.constant 0.000000e+00 : f32
    %13 = vector.broadcast %cst_14 : f32 to vector<192x384xf32>
    %14 = arith.maximumf %12, %13 : vector<192x384xf32>
    %15 = arith.truncf %14 : vector<192x384xf32> to vector<192x384xbf16>
    %c0_15 = arith.constant 0 : index
    %c0_16 = arith.constant 0 : index
    %16 = vector.load %arg4[%c0_15, %c0_16] : memref<384x256xbf16, #tpu.memory_space<vmem>>, vector<384x256xbf16>
    %cst_17 = arith.constant dense<0.000000e+00> : vector<192x256xf32>
    %17 = tpu.matmul %15, %16, %cst_17 {dimension_numbers = #tpu.dot_dimension_numbers<[1], [0], [0], [1], [0, 0, 1, 1], [], []>} : vector<192x384xbf16>, vector<384x256xbf16>, vector<192x256xf32> -> vector<192x256xf32>
    %c0_18 = arith.constant 0 : index
    %c0_19 = arith.constant 0 : index
    %18 = vector.load %arg5[%c0_18, %c0_19] : memref<96x192xbf16, #tpu.memory_space<vmem>>, vector<96x192xbf16>
    %19 = arith.truncf %17 : vector<192x256xf32> to vector<192x256xbf16>
    %cst_20 = arith.constant dense<0.000000e+00> : vector<96x256xf32>
    %20 = tpu.matmul %18, %19, %cst_20 {dimension_numbers = #tpu.dot_dimension_numbers<[1], [0], [0], [1], [0, 0, 1, 1], [], []>} : vector<96x192xbf16>, vector<192x256xbf16>, vector<96x256xf32> -> vector<96x256xf32>
    %21 = vector.extract_strided_slice %20 {offsets = [0, 0], sizes = [64, 256], strides = [1, 1]} : vector<96x256xf32> to vector<64x256xf32>
    %22 = vector.extract_strided_slice %20 {offsets = [8, 0], sizes = [64, 256], strides = [1, 1]} : vector<96x256xf32> to vector<64x256xf32>
    %23 = vector.extract_strided_slice %20 {offsets = [16, 0], sizes = [64, 256], strides = [1, 1]} : vector<96x256xf32> to vector<64x256xf32>
    %24 = vector.extract_strided_slice %20 {offsets = [24, 0], sizes = [64, 256], strides = [1, 1]} : vector<96x256xf32> to vector<64x256xf32>
    %25 = vector.extract_strided_slice %20 {offsets = [32, 0], sizes = [64, 256], strides = [1, 1]} : vector<96x256xf32> to vector<64x256xf32>
    %26 = tpu.concatenate %21, %22, %23, %24, %25 in 1 : vector<64x256xf32>, vector<64x256xf32>, vector<64x256xf32>, vector<64x256xf32>, vector<64x256xf32> -> vector<64x1280xf32>
    %27 = arith.truncf %26 : vector<64x1280xf32> to vector<64x1280xbf16>
    %c0_21 = arith.constant 0 : index
    %c0_22 = arith.constant 0 : index
    %28 = vector.load %arg6[%c0_21, %c0_22] : memref<1280x256xbf16, #tpu.memory_space<vmem>>, vector<1280x256xbf16>
    %cst_23 = arith.constant dense<0.000000e+00> : vector<64x256xf32>
    %29 = tpu.matmul %27, %28, %cst_23 {dimension_numbers = #tpu.dot_dimension_numbers<[1], [0], [0], [1], [0, 0, 1, 1], [], []>} : vector<64x1280xbf16>, vector<1280x256xbf16>, vector<64x256xf32> -> vector<64x256xf32>
    %c0_24 = arith.constant 0 : index
    %c0_25 = arith.constant 0 : index
    %30 = vector.load %arg7[%c0_24, %c0_25] : memref<1x256xf32, #tpu.memory_space<vmem>>, vector<1x256xf32>
    %31 = vector.broadcast %30 : vector<1x256xf32> to vector<64x256xf32>
    %32 = arith.addf %29, %31 : vector<64x256xf32>
    %cst_26 = arith.constant 0.000000e+00 : f32
    %33 = vector.broadcast %cst_26 : f32 to vector<64x256xf32>
    %34 = arith.maximumf %32, %33 : vector<64x256xf32>
    %35 = arith.truncf %34 : vector<64x256xf32> to vector<64x256xbf16>
    %c0_27 = arith.constant 0 : index
    %c0_28 = arith.constant 0 : index
    %36 = vector.load %arg8[%c0_27, %c0_28] : memref<256x128xbf16, #tpu.memory_space<vmem>>, vector<256x128xbf16>
    %cst_29 = arith.constant dense<0.000000e+00> : vector<64x128xf32>
    %37 = tpu.matmul %35, %36, %cst_29 {dimension_numbers = #tpu.dot_dimension_numbers<[1], [0], [0], [1], [0, 0, 1, 1], [], []>} : vector<64x256xbf16>, vector<256x128xbf16>, vector<64x128xf32> -> vector<64x128xf32>
    %c0_30 = arith.constant 0 : index
    %c0_31 = arith.constant 0 : index
    %38 = vector.load %arg9[%c0_30, %c0_31] : memref<32x64xbf16, #tpu.memory_space<vmem>>, vector<32x64xbf16>
    %39 = arith.truncf %37 : vector<64x128xf32> to vector<64x128xbf16>
    %cst_32 = arith.constant dense<0.000000e+00> : vector<32x128xf32>
    %40 = tpu.matmul %38, %39, %cst_32 {dimension_numbers = #tpu.dot_dimension_numbers<[1], [0], [0], [1], [0, 0, 1, 1], [], []>} : vector<32x64xbf16>, vector<64x128xbf16>, vector<32x128xf32> -> vector<32x128xf32>
    %41 = vector.extract_strided_slice %40 {offsets = [0, 0], sizes = [8, 128], strides = [1, 1]} : vector<32x128xf32> to vector<8x128xf32>
    %42 = vector.extract_strided_slice %40 {offsets = [8, 0], sizes = [8, 128], strides = [1, 1]} : vector<32x128xf32> to vector<8x128xf32>
    %43 = vector.extract_strided_slice %40 {offsets = [16, 0], sizes = [8, 128], strides = [1, 1]} : vector<32x128xf32> to vector<8x128xf32>
    %44 = vector.extract_strided_slice %40 {offsets = [24, 0], sizes = [8, 128], strides = [1, 1]} : vector<32x128xf32> to vector<8x128xf32>
    %45 = tpu.concatenate %41, %42, %43, %44 in 1 : vector<8x128xf32>, vector<8x128xf32>, vector<8x128xf32>, vector<8x128xf32> -> vector<8x512xf32>
    %46 = arith.truncf %45 : vector<8x512xf32> to vector<8x512xbf16>
    %c0_33 = arith.constant 0 : index
    %c0_34 = arith.constant 0 : index
    %47 = vector.load %arg10[%c0_33, %c0_34] : memref<512x512xbf16, #tpu.memory_space<vmem>>, vector<512x512xbf16>
    %cst_35 = arith.constant dense<0.000000e+00> : vector<8x512xf32>
    %48 = tpu.matmul %46, %47, %cst_35 {dimension_numbers = #tpu.dot_dimension_numbers<[1], [0], [0], [1], [0, 0, 1, 1], [], []>} : vector<8x512xbf16>, vector<512x512xbf16>, vector<8x512xf32> -> vector<8x512xf32>
    %c0_36 = arith.constant 0 : index
    %c0_37 = arith.constant 0 : index
    %49 = vector.load %arg11[%c0_36, %c0_37] : memref<1x512xf32, #tpu.memory_space<vmem>>, vector<1x512xf32>
    %50 = vector.broadcast %49 : vector<1x512xf32> to vector<8x512xf32>
    %51 = arith.addf %48, %50 : vector<8x512xf32>
    %cst_38 = arith.constant 0.000000e+00 : f32
    %52 = vector.broadcast %cst_38 : f32 to vector<8x512xf32>
    %53 = arith.maximumf %51, %52 : vector<8x512xf32>
    %54 = arith.truncf %53 : vector<8x512xf32> to vector<8x512xbf16>
    %c0_39 = arith.constant 0 : index
    %c0_40 = arith.constant 0 : index
    %55 = vector.load %arg12[%c0_39, %c0_40] : memref<512x128xbf16, #tpu.memory_space<vmem>>, vector<512x128xbf16>
    %cst_41 = arith.constant dense<0.000000e+00> : vector<8x128xf32>
    %56 = tpu.matmul %54, %55, %cst_41 {dimension_numbers = #tpu.dot_dimension_numbers<[1], [0], [0], [1], [0, 0, 1, 1], [], []>} : vector<8x512xbf16>, vector<512x128xbf16>, vector<8x128xf32> -> vector<8x128xf32>
    %c0_42 = arith.constant 0 : index
    %c0_43 = arith.constant 0 : index
    %57 = vector.load %arg13[%c0_42, %c0_43] : memref<1x128xf32, #tpu.memory_space<vmem>>, vector<1x128xf32>
    %58 = vector.broadcast %57 : vector<1x128xf32> to vector<8x128xf32>
    %59 = arith.addf %56, %58 : vector<8x128xf32>
    %cst_44 = arith.constant dense<0xFF800000> : vector<8xf32>
    %60 = vector.multi_reduction <maximumf>, %59, %cst_44 [1] : vector<8x128xf32> to vector<8xf32>
    %61 = vector.shape_cast %60 : vector<8xf32> to vector<8x1xf32>
    %62 = vector.broadcast %61 : vector<8x1xf32> to vector<8x128xf32>
    %63 = arith.subf %59, %62 : vector<8x128xf32>
    %64 = math.exp %63 : vector<8x128xf32>
    %cst_45 = arith.constant dense<0.000000e+00> : vector<8xf32>
    %65 = vector.multi_reduction <add>, %64, %cst_45 [1] : vector<8x128xf32> to vector<8xf32>
    %66 = vector.shape_cast %65 : vector<8xf32> to vector<8x1xf32>
    %67 = math.log %66 : vector<8x1xf32>
    %68 = vector.broadcast %67 : vector<8x1xf32> to vector<8x128xf32>
    %69 = arith.subf %63, %68 : vector<8x128xf32>
    %c0_46 = arith.constant 0 : index
    %c0_47 = arith.constant 0 : index
    %70 = vector.load %arg14[%c0_46, %c0_47] : memref<8x128xf32, #tpu.memory_space<vmem>>, vector<8x128xf32>
    tpu.vector_store %arg14[%c0_46, %c0_47], %69 {strides = array<i32>} : memref<8x128xf32, #tpu.memory_space<vmem>>, vector<8x128xf32>,
    return
  }
  func.func @transform_0(%arg0: i32) -> (i32, i32, i32) {
    %c0_i32 = arith.constant 0 : i32
    %c0_i32_0 = arith.constant 0 : i32
    %c0_i32_1 = arith.constant 0 : i32
    return %arg0, %c0_i32, %c0_i32_0 : i32, i32, i32
  }
  func.func @transform_1(%arg0: i32) -> (i32, i32) {
    %c0_i32 = arith.constant 0 : i32
    %c0_i32_0 = arith.constant 0 : i32
    %c0_i32_1 = arith.constant 0 : i32
    return %c0_i32, %c0_i32_0 : i32, i32
  }
  func.func @transform_2(%arg0: i32) -> (i32, i32) {
    %c0_i32 = arith.constant 0 : i32
    %c0_i32_0 = arith.constant 0 : i32
    %c0_i32_1 = arith.constant 0 : i32
    return %c0_i32, %c0_i32_0 : i32, i32
  }
  func.func @transform_3(%arg0: i32) -> (i32, i32) {
    %c0_i32 = arith.constant 0 : i32
    %c0_i32_0 = arith.constant 0 : i32
    %c0_i32_1 = arith.constant 0 : i32
    return %c0_i32, %c0_i32_0 : i32, i32
  }
  func.func @transform_4(%arg0: i32) -> (i32, i32) {
    %c0_i32 = arith.constant 0 : i32
    %c0_i32_0 = arith.constant 0 : i32
    %c0_i32_1 = arith.constant 0 : i32
    return %c0_i32, %c0_i32_0 : i32, i32
  }
  func.func @transform_5(%arg0: i32) -> (i32, i32) {
    %c0_i32 = arith.constant 0 : i32
    %c0_i32_0 = arith.constant 0 : i32
    %c0_i32_1 = arith.constant 0 : i32
    return %c0_i32, %c0_i32_0 : i32, i32
  }
  func.func @transform_6(%arg0: i32) -> (i32, i32) {
    %c0_i32 = arith.constant 0 : i32
    %c0_i32_0 = arith.constant 0 : i32
    %c0_i32_1 = arith.constant 0 : i32
    return %c0_i32, %c0_i32_0 : i32, i32
  }
  func.func @transform_7(%arg0: i32) -> (i32, i32) {
    %c0_i32 = arith.constant 0 : i32
    %c0_i32_0 = arith.constant 0 : i32
    %c0_i32_1 = arith.constant 0 : i32
    return %c0_i32, %c0_i32_0 : i32, i32
  }
  func.func @transform_8(%arg0: i32) -> (i32, i32) {
    %c0_i32 = arith.constant 0 : i32
    %c0_i32_0 = arith.constant 0 : i32
    %c0_i32_1 = arith.constant 0 : i32
    return %c0_i32, %c0_i32_0 : i32, i32
  }
  func.func @transform_9(%arg0: i32) -> (i32, i32) {
    %c0_i32 = arith.constant 0 : i32
    %c0_i32_0 = arith.constant 0 : i32
    %c0_i32_1 = arith.constant 0 : i32
    return %c0_i32, %c0_i32_0 : i32, i32
  }
  func.func @transform_10(%arg0: i32) -> (i32, i32) {
    %c0_i32 = arith.constant 0 : i32
    %c0_i32_0 = arith.constant 0 : i32
    %c0_i32_1 = arith.constant 0 : i32
    return %c0_i32, %c0_i32_0 : i32, i32
  }
  func.func @transform_11(%arg0: i32) -> (i32, i32) {
    %c0_i32 = arith.constant 0 : i32
    %c0_i32_0 = arith.constant 0 : i32
    %c0_i32_1 = arith.constant 0 : i32
    return %c0_i32, %c0_i32_0 : i32, i32
  }
  func.func @transform_12(%arg0: i32) -> (i32, i32) {
    %c0_i32 = arith.constant 0 : i32
    %c0_i32_0 = arith.constant 0 : i32
    %c0_i32_1 = arith.constant 0 : i32
    return %c0_i32, %c0_i32_0 : i32, i32
  }
  func.func @transform_13(%arg0: i32) -> (i32, i32) {
    %c0_i32 = arith.constant 0 : i32
    %c0_i32_0 = arith.constant 0 : i32
    return %arg0, %c0_i32 : i32, i32
  }
}

</mosaic_0001>

<bundles_post_ra>
// kernel: _forward.1
= control target key start
LH: loop header
LB: loop body
LE: loop exit
PB: predicated region body
PF: predicated region fallthrough
CT: control target
= control target key end

     0   :  { %18 = vsyncpa [#allocation3], 0  ;;  %s10723_s0 = inlined_call_operand.vmem [shape: f32[16,28,128], index: 0, kind: input, shape index: {}]   ;;  %s10724_s1 = inlined_call_operand.vmem [shape: bf16[640,384], index: 1, kind: input, shape index: {}]   ;;  %s10725_s2 = inlined_call_operand.vmem [shape: f32[1,384], index: 2, kind: input, shape index: {}]   ;;  %s10726_s3 = inlined_call_operand.vmem [shape: bf16[384,256], index: 3, kind: input, shape index: {}]   ;;  %s10727_s4 = inlined_call_operand.vmem [shape: bf16[96,192], index: 4, kind: input, shape index: {}]   ;;  %s10728_s5 = inlined_call_operand.vmem [shape: bf16[1280,256], index: 5, kind: input, shape index: {}]   ;;  %s10729_s6 = inlined_call_operand.vmem [shape: f32[1,256], index: 6, kind: input, shape index: {}]   ;;  %s10730_s7 = inlined_call_operand.vmem [shape: bf16[256,128], index: 7, kind: input, shape index: {}]   ;;  %s10731_s8 = inlined_call_operand.vmem [shape: bf16[32,64], index: 8, kind: input, shape index: {}]   ;;  %s10732_s9 = inlined_call_operand.vmem [shape: bf16[512,512], index: 9, kind: input, shape index: {}]   ;;  %s10733_s10 = inlined_call_operand.vmem [shape: f32[1,512], index: 10, kind: input, shape index: {}]   ;;  %s10734_s11 = inlined_call_operand.vmem [shape: bf16[512,128], index: 11, kind: input, shape index: {}]   ;;  %s10735_s12 = inlined_call_operand.vmem [shape: f32[1,128], index: 12, kind: input, shape index: {}]   ;;  %s10736_s13 = inlined_call_operand.hbm [shape: f32[16,128], index: 13, kind: output, shape index: {}]  }
   0x1   :  { %20 = vsyncpa [#allocation3 + $0x1], 0  ;;  %s8308_s25 = smov 0   ;;  %s8310_s26 = smov 0  }
   0x2   :  { %s8312_s27 = smov 0   ;;  %s8314_s28 = smov 0  }
   0x3 LB: > { %10741 = sst [smem:[#allocation5_spill]] %s8230_s27  ;;  %s8329_s29 = sadd.s32 4294967295, %s8234_s28   ;;  %s8234_s28 = sphi %s8314_s28, %s10748_s28   ;;  %s8230_s27 = sphi %s8312_s27, %s10750_s27   ;;  %s8226_s26 = sphi %s8310_s26, %s10752_s26   ;;  %s8222_s25 = sphi %s8308_s25, %s10751_s25  }
   0x4   : > { %s6234_s30 = sadd.s32 4294967294, %s8234_s28   ;;  %s8333_s14 = sadd.s32 1, %s8234_s28  }
   0x5   : > { %10742 = sst [smem:[#allocation6_spill]] %s8333_s14  ;;  %s311_s15 = sadd.s32 1, %s8230_s27 }
   0x6   : > { %s308_s16 = ssub.s32 %s8234_s28, %s8333_s14  ;;  %p321_p0 = scmp.ne.s32.totalorder %s8230_s27, %s8226_s26 }
   0x7   : > { %p309_p1 = scmp.eq.s32.totalorder %s308_s16, 0  ;;  %p322_p2 = scmp.eq.s32.totalorder %s8329_s29, 1 }
   0x8   : > { %p327_p3 = scmp.ne.s32.totalorder %s8226_s26, %s8222_s25  ;;  %p328_p4 = scmp.eq.s32.totalorder %s6234_s30, 1 }
   0x9   : > { %s8344_s17 = scalar_select %p309_p1, %s8230_s27, %s311_s15  }
   0xa   : > { %p8346_p5 = por %p322_p2, %p321_p0  ;;  %p8350_p6 = por %p328_p4, %p327_p3 }
   0xb   : > { %10743 = sst [smem:[#allocation7_spill]] %s8344_s17  ;;  %p6237_p7 = scmp.ge.s32.totalorder %s8234_s28, 1 }
   0xc   : > { %s10745_s19 = scalar_select %p8350_p6, 1, 0 }
   0xd   : > { %p392_p8 = scmp.lt.s32.totalorder %s8234_s28, 3 }
   0xe   : > { %10746 = sst [smem:[#allocation8_spill]] %s10745_s19 }
   0xf   : > { %p393_p9 = pnand %p6237_p7, %p392_p8 }
  0x10   : > { %v7436_v0 = vld [vmem:[%s10724_s1 + $0x4] ss:$12 sps:$4 sm:$0xff] (!%p393_p9)   ;;  %v7438_v1 = vld [vmem:[%s10724_s1 + $0xc8] ss:$12 sps:$4 sm:$0xff] (!%p393_p9)   ;;  %v7439_v2 = vld [vmem:[%s10724_s1] ss:$12 sps:$4 sm:$0xff] (!%p393_p9)  }
  0x11   : > { %396 = sbr.rel (%p393_p9) target bundleno = 3018 (0xbca), region = 72  ;;  %1442 = vmatprep.subr.bf16.mxu0 (!%p393_p9), %v7436_v0  ;;  %6774 = vmatprep.subr.bf16.mxu1 (!%p393_p9), %v7438_v1  ;;  %v7440_v3 = vld [vmem:[%s10724_s1 + $0x8] ss:$12 sps:$4 sm:$0xff] (!%p393_p9)   ;;  %v7443_v5 = vld [vmem:[%s10724_s1 + $0xe0] ss:$12 sps:$4 sm:$0xff] (!%p393_p9)   ;;  %s6239_s27 = sshll.u32 (!%p393_p9), %s8329_s29, 3 }
  0x12   : > { %1443 = vmatpush1.bf16.msra.mxu0 (!%p393_p9), %v7439_v2  ;;  %v7441_v4 = vld [vmem:[%s10724_s1 + $0x1c] ss:$12 sps:$4 sm:$0xff] (!%p393_p9)   ;;  %6775 = vmatpush3.bf16.msra.mxu1 (!%p393_p9), %v7440_v3  ;;  %v7444_v6 = vld [vmem:[%s10724_s1 + $0x18] ss:$12 sps:$4 sm:$0xff] (!%p393_p9)   ;;  %v7445_v7 = vld [vmem:[%s10724_s1 + $0x20] ss:$12 sps:$4 sm:$0xff] (!%p393_p9)  }
  0x13   : > { %1444 = vmatprep.subr.bf16.mxu0 (!%p393_p9), %v7441_v4  ;;  %6776 = vmatprep.subr.bf16.mxu1 (!%p393_p9), %v7443_v5  ;;  %v7446_v8 = vld [vmem:[%s10724_s1 + $0x34] ss:$12 sps:$4 sm:$0xff] (!%p393_p9)   ;;  %v7448_v9 = vld [vmem:[%s10724_s1 + $0xf8] ss:$12 sps:$4 sm:$0xff] (!%p393_p9)   ;;  %v7449_v10 = vld [vmem:[%s10724_s1 + $0x30] ss:$12 sps:$4 sm:$0xff] (!%p393_p9)  }
  0x14   : > { %v7450_v11 = vld [vmem:[%s10724_s1 + $0x38] ss:$12 sps:$4 sm:$0xff] (!%p393_p9)   ;;  %p438_p10 = scmp.lt.s32.totalorder (!%p393_p9), %s6239_s27, 15  ;;  %v7453_v13 = vld [vmem:[%s10724_s1 + $0x110] ss:$12 sps:$4 sm:$0xff] (!%p393_p9)   ;;  %vm3080_vm0 = vcmask (!%p393_p9), 523264  }
  0x15   : > { %v7451_v12 = vld [vmem:[%s10724_s1 + $0x4c] ss:$12 sps:$4 sm:$0xff] (!%p393_p9)   ;;  %v7454_v14 = vld [vmem:[%s10724_s1 + $0x48] ss:$12 sps:$4 sm:$0xff] (!%p393_p9)   ;;  %v7455_v15 = vld [vmem:[%s10724_s1 + $0x50] ss:$12 sps:$4 sm:$0xff] (!%p393_p9)  }
  0x16   : > { %1445 = vmatpush1.bf16.msra.mxu0 (!%p393_p9), %v7444_v6  ;;  %6777 = vmatpush3.bf16.msra.mxu1 (!%p393_p9), %v7445_v7  ;;  %v7456_v16 = vld [vmem:[%s10724_s1 + $0x64] ss:$12 sps:$4 sm:$0xff] (!%p393_p9)   ;;  %v7458_v17 = vld [vmem:[%s10724_s1 + $0x128] ss:$12 sps:$4 sm:$0xff] (!%p393_p9)   ;;  %v7459_v18 = vld [vmem:[%s10724_s1 + $0x60] ss:$12 sps:$4 sm:$0xff] (!%p393_p9)  }
  0x17   : > { %1446 = vmatprep.subr.bf16.mxu0 (!%p393_p9), %v7446_v8  ;;  %6778 = vmatprep.subr.bf16.mxu1 (!%p393_p9), %v7448_v9  ;;  %v7460_v19 = vld [vmem:[%s10724_s1 + $0x68] ss:$12 sps:$4 sm:$0xff] (!%p393_p9)   ;;  %v7463_v21 = vld [vmem:[%s10724_s1 + $0x140] ss:$12 sps:$4 sm:$0xff] (!%p393_p9)   ;;  %v7464_v22 = vld [vmem:[%s10724_s1 + $0x78] ss:$12 sps:$4 sm:$0xff] (!%p393_p9)  }
  0x18   : > { %s10754_s27 = smov (!%p438_p10, %s6239_s27), 15  ;;  %v7461_v20 = vld [vmem:[%s10724_s1 + $0x7c] ss:$12 sps:$4 sm:$0xff]   ;;  %v7465_v23 = vld [vmem:[%s10724_s1 + $0x80] ss:$12 sps:$4 sm:$0xff]  }
  0x19   : > { %s6773_s14 = sshll.u32 %s10754_s27, 5  ;;  %v7466_v24 = vld [vmem:[%s10724_s1 + $0x94] ss:$12 sps:$4 sm:$0xff]   ;;  %v7468_v25 = vld [vmem:[%s10724_s1 + $0x158] ss:$12 sps:$4 sm:$0xff]   ;;  %s6770_s27 = sshll.u32 %s8329_s29, 7 }
  0x1a   : > { %1447 = vmatpush1.bf16.msra.mxu0 %v7449_v10  ;;  %6779 = vmatpush3.bf16.msra.mxu1 %v7450_v11  ;;  %v7469_v26 = vld [vmem:[%s10724_s1 + $0x90] ss:$12 sps:$4 sm:$0xff]   ;;  %s8441_s15 = scalar_lea.vmem %s10723_s0, %s6773_s14  ;;  %v7470_v27 = vld [vmem:[%s10724_s1 + $0x98] ss:$12 sps:$4 sm:$0xff]   ;;  %v7474_v30 = vld [vmem:[%s10724_s1 + $0xa8] ss:$12 sps:$4 sm:$0xff]   ;;  %s10681_s22 = scalar_lea.hbm %s10736_s13, %s6770_s27 }
  0x1b   : > { %1448 = vmatprep.subr.bf16.mxu0 %v7451_v12  ;;  %6780 = vmatprep.subr.bf16.mxu1 %v7453_v13  ;;  %v7471_v28 = vld [vmem:[%s10724_s1 + $0xac] ss:$12 sps:$4 sm:$0xff]   ;;  %v7473_v29 = vld [vmem:[%s10724_s1 + $0x170] ss:$12 sps:$4 sm:$0xff]   ;;  %v469_v31 = vld [vmem:[%s8441_s15 + $0x1] sm:$0xff]  ;;  %s8237_s29 = smov [#allocation2]  }
  0x1c   : > { %v470_v32 = vld [vmem:[%s8441_s15 + $0x9] sm:$0xff]  ;;  %v445_v36 = vld [vmem:[%s8441_s15] sm:$0xff]  ;;  %v471_v38 = vld [vmem:[%s8441_s15 + $0x11] sm:$0xff]  ;;  %s8176_s23 = sshll.u32 %s8237_s29, 4  ;;  %s8177_s23 = int_to_ptr.vmem [resolvable:$false] %s8176_s23 }
  0x1d   : > { %v7475_v33 = vld [vmem:[%s10724_s1 + $0xb0] ss:$12 sps:$4 sm:$0xff]   ;;  %v566_v34 = vpack.c.bf16 %v470_v32, %v469_v31  ;;  %v446_v37 = vld [vmem:[%s8441_s15 + $0x8] sm:$0xff]  ;;  %v7481_v44 = vld [vmem:[%s10724_s1 + $0xd8] ss:$12 sps:$4 sm:$0xff]   ;;  %s8178_s24 = scalar_lea.vmem %s8177_s23, 256 }
  0x1e   : > { %1449 = vmatpush1.bf16.msra.mxu0 %v7454_v14  ;;  %6781 = vmatpush3.bf16.msra.mxu1 %v7455_v15  ;;  %v7476_v35 = vld [vmem:[%s10724_s1 + $0xc4] ss:$12 sps:$4 sm:$0xff]   ;;  %v8467_v40 = vpack.c.bf16 %v446_v37, %v445_v36  ;;  %v7478_v41 = vld [vmem:[%s10724_s1 + $0xc0] ss:$12 sps:$4 sm:$0xff]   ;;  %v7479_v42 = vld [vmem:[%s10724_s1 + $0xdc] ss:$12 sps:$4 sm:$0xff]  }
  0x1f   : > { %1450 = vmatprep.subr.bf16.mxu0 %v7456_v16  ;;  %6782 = vmatprep.subr.bf16.mxu1 %v7458_v17  ;;  %v472_v39 = vld [vmem:[%s8441_s15 + $0x21] sm:$0xff]  ;;  %v447_v46 = vld [vmem:[%s8441_s15 + $0x10] sm:$0xff]  ;;  %v7485_v52 = vld [vmem:[%s10724_s1 + $0x10c] ss:$12 sps:$4 sm:$0xff]  }
  0x20   : > { %1933 = vmatprep.mubr.bf16.mxu1 %v566_v34  ;;  %1474 = vmatprep.mubr.bf16.mxu0 %v566_v34  ;;  %v8475_v43 = vpack.c.bf16 %v472_v39, %v471_v38  ;;  %v7482_v45 = vld [vmem:[%s10724_s1 + $0xf4] ss:$12 sps:$4 sm:$0xff]   ;;  %v473_v48 = vld [vmem:[%s8441_s15 + $0x29] sm:$0xff]  ;;  %v7493_v0 = vld [vmem:[%s10724_s1 + $0x138] ss:$12 sps:$4 sm:$0xff]  }
  0x21   : > { %v448_v47 = vld [vmem:[%s8441_s15 + $0x20] sm:$0xff]  ;;  %v474_v49 = vld [vmem:[%s8441_s15 + $0x31] sm:$0xff]  ;;  %v449_v56 = vld [vmem:[%s8441_s15 + $0x28] sm:$0xff] }
  0x22   : > { %1451 = vmatpush1.bf16.msra.mxu0 %v7459_v18  ;;  %6783 = vmatpush3.bf16.msra.mxu1 %v7460_v19  ;;  %v8489_v50 = vpack.c.bf16 %v448_v47, %v447_v46  ;;  %v7484_v51 = vld [vmem:[%s10724_s1 + $0xf0] ss:$12 sps:$4 sm:$0xff]   ;;  %v8497_v53 = vpack.c.bf16 %v474_v49, %v473_v48  ;;  %v7487_v54 = vld [vmem:[%s10724_s1 + $0x108] ss:$12 sps:$4 sm:$0xff]   ;;  %v7490_v61 = vld [vmem:[%s10724_s1 + $0x120] ss:$12 sps:$4 sm:$0xff]  }
  0x23   : > { %1452 = vmatprep.subr.bf16.mxu0 %v7461_v20  ;;  %6784 = vmatprep.subr.bf16.mxu1 %v7463_v21  ;;  %v7488_v55 = vld [vmem:[%s10724_s1 + $0x124] ss:$12 sps:$4 sm:$0xff]   ;;  %v7491_v62 = vld [vmem:[%s10724_s1 + $0x13c] ss:$12 sps:$4 sm:$0xff]   ;;  %v7494_v1 = vld [vmem:[%s10724_s1 + $0x154] ss:$12 sps:$4 sm:$0xff]  }
  0x24   : > { %v450_v57 = vld [vmem:[%s8441_s15 + $0x30] sm:$0xff]  ;;  %v475_v58 = vld [vmem:[%s8441_s15 + $0x41] sm:$0xff]  ;;  %v7497_v7 = vld [vmem:[%s10724_s1 + $0x16c] ss:$12 sps:$4 sm:$0xff]  }
  0x25   : > { %v476_v59 = vld [vmem:[%s8441_s15 + $0x49] sm:$0xff]  ;;  %v8511_v60 = vpack.c.bf16 %v450_v57, %v449_v56  ;;  %v451_v2 = vld [vmem:[%s8441_s15 + $0x40] sm:$0xff]  ;;  %v477_v4 = vld [vmem:[%s8441_s15 + $0x51] sm:$0xff] }
  0x26   : > { %1453 = vmatpush1.bf16.msra.mxu0 %v7464_v22  ;;  %6785 = vmatpush3.bf16.msra.mxu1 %v7465_v23  ;;  %v8519_v63 = vpack.c.bf16 %v476_v59, %v475_v58  ;;  %v452_v3 = vld [vmem:[%s8441_s15 + $0x48] sm:$0xff]  ;;  %v7496_v6 = vld [vmem:[%s10724_s1 + $0x150] ss:$12 sps:$4 sm:$0xff]   ;;  %v454_v14 = vld [vmem:[%s8441_s15 + $0x60] sm:$0xff] }
  0x27   : > { %1454 = vmatprep.subr.bf16.mxu0 %v7466_v24  ;;  %6786 = vmatprep.subr.bf16.mxu1 %v7468_v25  ;;  %v478_v5 = vld [vmem:[%s8441_s15 + $0x61] sm:$0xff]  ;;  %v8539_v8 = vpack.c.bf16 %v452_v3, %v451_v2  ;;  %v453_v13 = vld [vmem:[%s8441_s15 + $0x50] sm:$0xff]  ;;  %v7511_v39 = vld [vmem:[%s10724_s1 + $0x1cc] ss:$12 sps:$4 sm:$0xff]  }
  0x28   : > { %v7515_v9 = vld [vmem:[%s10724_s1 + $0x248] ss:$12 sps:$4 sm:$0xff]   ;;  %v8544_v10 = vpack.c.bf16 %v478_v5, %v477_v4  ;;  %v7520_v15 = vld [vmem:[%s10724_s1 + $0x260] ss:$12 sps:$4 sm:$0xff]   ;;  %v7502_v16 = vld [vmem:[%s10724_s1 + $0x184] ss:$12 sps:$4 sm:$0xff]   ;;  %v8570_v21 = vpack.c.bf16 %v454_v14, %v453_v13 }
  0x29   : > { %v7516_v11 = vld [vmem:[%s10724_s1 + $0x188] ss:$12 sps:$4 sm:$0xff]   ;;  %v7521_v18 = vld [vmem:[%s10724_s1 + $0x1a0] ss:$12 sps:$4 sm:$0xff]   ;;  %v7525_v23 = vld [vmem:[%s10724_s1 + $0x278] ss:$12 sps:$4 sm:$0xff]  }
  0x2a   : > { %1455 = vmatpush1.bf16.msra.mxu0 %v7469_v26  ;;  %6787 = vmatpush3.bf16.msra.mxu1 %v7470_v27  ;;  %v7499_v12 = vld [vmem:[%s10724_s1 + $0x168] ss:$12 sps:$4 sm:$0xff]   ;;  %v7500_v20 = vld [vmem:[%s10724_s1 + $0x180] ss:$12 sps:$4 sm:$0xff]   ;;  %v7526_v25 = vld [vmem:[%s10724_s1 + $0x1b8] ss:$12 sps:$4 sm:$0xff]  }
  0x2b   : > { %1456 = vmatprep.subr.bf16.mxu0 %v7471_v28  ;;  %6788 = vmatprep.subr.bf16.mxu1 %v7473_v29  ;;  %v479_v17 = vld [vmem:[%s8441_s15 + $0x69] sm:$0xff]  ;;  %v480_v19 = vld [vmem:[%s8441_s15 + $0x71] sm:$0xff]  ;;  %v481_v32 = vld [vmem:[%s8441_s15 + $0x81] sm:$0xff] }
  0x2c   : > { %v7505_v22 = vld [vmem:[%s10724_s1 + $0x19c] ss:$12 sps:$4 sm:$0xff]   ;;  %v8578_v24 = vpack.c.bf16 %v480_v19, %v479_v17  ;;  %v7503_v28 = vld [vmem:[%s10724_s1 + $0x198] ss:$12 sps:$4 sm:$0xff]   ;;  %v7508_v31 = vld [vmem:[%s10724_s1 + $0x1b4] ss:$12 sps:$4 sm:$0xff]  }
  0x2d   : > { %v7527_v26 = vld [vmem:[%s10724_s1 + $0x290] ss:$12 sps:$4 sm:$0xff]   ;;  %v455_v29 = vld [vmem:[%s8441_s15 + $0x68] sm:$0xff]  ;;  %v7539_v48 = vld [vmem:[%s10724_s1 + $0x2d8] ss:$12 sps:$4 sm:$0xff]  }
  0x2e   : > { %1457 = vmatpush1.bf16.msra.mxu0 %v7474_v30  ;;  %6789 = vmatpush3.bf16.msra.mxu1 %v7475_v33  ;;  %v7528_v27 = vld [vmem:[%s10724_s1 + $0x1d0] ss:$12 sps:$4 sm:$0xff]   ;;  %v7532_v34 = vld [vmem:[%s10724_s1 + $0x2a8] ss:$12 sps:$4 sm:$0xff]   ;;  %v7540_v49 = vld [vmem:[%s10724_s1 + $0x218] ss:$12 sps:$4 sm:$0xff]  }
  0x2f   : > { %1458 = vmatprep.subr.bf16.mxu0 %v7476_v35  ;;  %6862 = vmatprep.subr.bf16.mxu1 %v7515_v9  ;;  %v456_v30 = vld [vmem:[%s8441_s15 + $0x70] sm:$0xff]  ;;  %v484_v46 = vld [vmem:[%s8441_s15 + $0xa1] sm:$0xff] }
  0x30   : > { %v482_v33 = vld [vmem:[%s8441_s15 + $0x89] sm:$0xff]  ;;  %v8606_v35 = vpack.c.bf16 %v456_v30, %v455_v29  ;;  %v460_v57 = vld [vmem:[%s8441_s15 + $0xa0] sm:$0xff] }
  0x31   : > { %1934 = vmatmul.mubr.bf16.vlgmr.msra.gmra.mrb[0].mxu1 %v8467_v40  ;;  %v7533_v36 = vld [vmem:[%s10724_s1 + $0x1e8] ss:$12 sps:$4 sm:$0xff]   ;;  %v8611_v37 = vpack.c.bf16 %v482_v33, %v481_v32  ;;  %v7506_v38 = vld [vmem:[%s10724_s1 + $0x1b0] ss:$12 sps:$4 sm:$0xff]   ;;  %v7517_v58 = vld [vmem:[%s10724_s1 + $0x1f8] ss:$12 sps:$4 sm:$0xff]  }
  0x32   : > { %1459 = vmatpush1.bf16.msra.mxu0 %v7478_v41  ;;  %1941 = vmatprep.mubr.bf16.mxu1 %v8475_v43  ;;  %v457_v41 = vld [vmem:[%s8441_s15 + $0x80] sm:$0xff]  ;;  %v459_v56 = vld [vmem:[%s8441_s15 + $0x90] sm:$0xff]  ;;  %v461_v2 = vld [vmem:[%s8441_s15 + $0xa8] sm:$0xff] }
  0x33   : > { %1460 = vmatprep.subr.bf16.mxu0 %v7479_v42  ;;  %6863 = vmatpush3.bf16.msra.mxu1 %v7516_v11  ;;  %v458_v42 = vld [vmem:[%s8441_s15 + $0x88] sm:$0xff]  ;;  %v7514_v47 = vld [vmem:[%s10724_s1 + $0x1e4] ss:$12 sps:$4 sm:$0xff]   ;;  %v7548_v17 = vld [vmem:[%s10724_s1 + $0x274] ss:$12 sps:$4 sm:$0xff]  }
  0x34   : > { %6864 = vmatprep.subr.bf16.mxu1 %v7520_v15  ;;  %v485_v59 = vld [vmem:[%s8441_s15 + $0xa9] sm:$0xff]  ;;  %v487_v4 = vld [vmem:[%s8441_s15 + $0xc1] sm:$0xff]  ;;  %v489_v15 = vld [vmem:[%s8441_s15 + $0xd1] sm:$0xff] }
  0x35   : > { %v462_v3 = vld [vmem:[%s8441_s15 + $0xb0] sm:$0xff]  ;;  %v7543_v11 = vld [vmem:[%s10724_s1 + $0x25c] ss:$12 sps:$4 sm:$0xff]   ;;  %v7541_v14 = vld [vmem:[%s10724_s1 + $0x258] ss:$12 sps:$4 sm:$0xff]  }
  0x36   : > { %1461 = vmatpush1.bf16.msra.mxu0 %v7481_v44  ;;  %v7509_v44 = vld [vmem:[%s10724_s1 + $0x1c8] ss:$12 sps:$4 sm:$0xff]  }
  0x37   : > { %1462 = vmatprep.subr.bf16.mxu0 %v7482_v45  ;;  %6865 = vmatpush3.bf16.msra.mxu1 %v7521_v18  ;;  %v483_v45 = vld [vmem:[%s8441_s15 + $0x91] sm:$0xff]  ;;  %v464_v13 = vld [vmem:[%s8441_s15 + $0xc8] sm:$0xff] }
  0x38   : > { %6866 = vmatprep.subr.bf16.mxu1 %v7525_v23  ;;  %v7529_v5 = vld [vmem:[%s10724_s1 + $0x228] ss:$12 sps:$4 sm:$0xff]  }
  0x39   : > { %1942 = vmatmul.mubr.bf16.gmra.mrb[4].mxu1 %v8489_v50  ;;  %v465_v23 = vld [vmem:[%s8441_s15 + $0xd0] sm:$0xff]  ;;  %v7557_v32 = vld [vmem:[%s10724_s1 + $0x2bc] ss:$12 sps:$4 sm:$0xff]  }
  0x3a   : > { %1463 = vmatpush1.bf16.msra.mxu0 %v7484_v51  ;;  %1949 = vmatprep.mubr.bf16.mxu1 %v8497_v53  ;;  %v8647_v51 = vpack.c.bf16 %v484_v46, %v483_v45  ;;  %v467_v33 = vld [vmem:[%s8441_s15 + $0xe8] sm:$0xff]  ;;  %v519_v46 = vld [vmem:[%s8441_s15 + $0x13] sm:$0xff] }
  0x3b   : > { %1464 = vmatprep.subr.bf16.mxu0 %v7485_v52  ;;  %6867 = vmatpush3.bf16.msra.mxu1 %v7526_v25  ;;  %v7512_v52 = vld [vmem:[%s10724_s1 + $0x1e0] ss:$12 sps:$4 sm:$0xff]   ;;  %v7549_v25 = vld [vmem:[%s10724_s1 + $0x288] ss:$12 sps:$4 sm:$0xff]  }
  0x3c   : > { %6868 = vmatprep.subr.bf16.mxu1 %v7527_v26  ;;  %v491_v26 = vld [vmem:[%s8441_s15 + $0xe9] sm:$0xff] }
  0x3d   : > { %v7561_v45 = vld [vmem:[%s10724_s1 + $0x2e8] ss:$12 sps:$4 sm:$0xff]  }
  0x3e   : > { %1465 = vmatpush1.bf16.msra.mxu0 %v7487_v54  ;;  %v7544_v54 = vld [vmem:[%s10724_s1 + $0x2f0] ss:$12 sps:$4 sm:$0xff]  }
  0x3f   : > { %1466 = vmatprep.subr.bf16.mxu0 %v7488_v55  ;;  %6869 = vmatpush3.bf16.msra.mxu1 %v7528_v27  ;;  %v7545_v55 = vld [vmem:[%s10724_s1 + $0x230] ss:$12 sps:$4 sm:$0xff]  }
  0x40   : > { %6870 = vmatprep.subr.bf16.mxu1 %v7532_v34  ;;  %v492_v27 = vld [vmem:[%s8441_s15 + $0xf1] sm:$0xff] }
  0x41   : > { %1950 = vmatmul.mubr.bf16.gmra.mrb[8].mxu1 %v8511_v60  ;;  %v8752_v30 = vpack.c.bf16 %v492_v27, %v491_v26  ;;  %v468_v34 = vld [vmem:[%s8441_s15 + $0xf0] sm:$0xff] }
  0x42   : > { %1467 = vmatpush1.bf16.msra.mxu0 %v7490_v61  ;;  %1957 = vmatprep.mubr.bf16.mxu1 %v8519_v63  ;;  %v7524_v61 = vld [vmem:[%s10724_s1 + $0x214] ss:$12 sps:$4 sm:$0xff]   ;;  %v7570_v26 = vld [vmem:[%s10724_s1 + $0x330] ss:$12 sps:$4 sm:$0xff]  }
  0x43   : > { %1468 = vmatprep.subr.bf16.mxu0 %v7491_v62  ;;  %6871 = vmatpush3.bf16.msra.mxu1 %v7533_v36  ;;  %v8675_v62 = vpack.c.bf16 %v460_v57, %v459_v56  ;;  %v517_v36 = vld [vmem:[%s8441_s15 + $0x3] sm:$0xff] }
  0x44   : > { %v7578_v56 = vld [vmem:[%s10724_s1 + $0x338] ss:$12 sps:$4 sm:$0xff]  }
  0x46   : > { %1469 = vmatpush1.bf16.msra.mxu0 %v7493_v0  ;;  %v7522_v0 = vld [vmem:[%s10724_s1 + $0x210] ss:$12 sps:$4 sm:$0xff]  }
  0x47   : > { %1470 = vmatprep.subr.bf16.mxu0 %v7494_v1  ;;  %v7531_v1 = vld [vmem:[%s10724_s1 + $0x22c] ss:$12 sps:$4 sm:$0xff]  }
  0x49   : > { %1958 = vmatmul.mubr.bf16.gmra.mrb[12].mxu1 %v8539_v8 }
  0x4a   : > { %1471 = vmatpush1.bf16.msra.mxu0 %v7496_v6  ;;  %1965 = vmatprep.mubr.bf16.mxu1 %v8544_v10  ;;  %v488_v6 = vld [vmem:[%s8441_s15 + $0xc9] sm:$0xff] }
  0x4b   : > { %1472 = vmatprep.subr.bf16.mxu0 %v7497_v7  ;;  %v7536_v7 = vld [vmem:[%s10724_s1 + $0x244] ss:$12 sps:$4 sm:$0xff]   ;;  %v8701_v9 = vpack.c.bf16 %v488_v6, %v487_v4 }
  0x4c   : > { %v499_v4 = vld [vmem:[%s8441_s15 + $0x42] sm:$0xff]  ;;  %v525_v6 = vld [vmem:[%s8441_s15 + $0x53] sm:$0xff] }
  0x4e   : > { %1473 = vmatpush1.bf16.msra.mxu0 %v7499_v12  ;;  %v463_v12 = vld [vmem:[%s8441_s15 + $0xc0] sm:$0xff] }
  0x4f   : > { %1595 = vmatprep.subr.bf16.mxu0 %v7502_v16  ;;  %v490_v16 = vld [vmem:[%s8441_s15 + $0xe1] sm:$0xff]  ;;  %v8723_v18 = vpack.c.bf16 %v464_v13, %v463_v12  ;;  %v501_v12 = vld [vmem:[%s8441_s15 + $0x52] sm:$0xff] }
  0x50   : > { %v8725_v19 = vpack.c.bf16 %v490_v16, %v489_v15  ;;  %v502_v13 = vld [vmem:[%s8441_s15 + $0x62] sm:$0xff]  ;;  %v528_v15 = vld [vmem:[%s8441_s15 + $0x73] sm:$0xff] }
  0x51   : > { %1475 = vmatmul.mubr.bf16.vlgmr.msra.gmra.mrb[0].mxu0 %v8467_v40  ;;  %1966 = vmatmul.mubr.bf16.gmra.mrb[16].mxu1 %v8570_v21  ;;  %v7537_v40 = vld [vmem:[%s10724_s1 + $0x2c0] ss:$12 sps:$4 sm:$0xff]  }
  0x52   : > { %1596 = vmatpush1.bf16.msra.mxu0 %v7500_v20  ;;  %1484 = vmatprep.mubr.bf16.mxu0 %v8475_v43  ;;  %v7538_v43 = vld [vmem:[%s10724_s1 + $0x200] ss:$12 sps:$4 sm:$0xff]   ;;  %v7546_v20 = vld [vmem:[%s10724_s1 + $0x270] ss:$12 sps:$4 sm:$0xff]  }
  0x53   : > { %1973 = vmatprep.mubr.bf16.mxu1 %v8578_v24  ;;  %1597 = vmatprep.subr.bf16.mxu0 %v7505_v22  ;;  %v7573_v22 = vld [vmem:[%s10724_s1 + $0x308] ss:$12 sps:$4 sm:$0xff]   ;;  %v7564_v16 = vld [vmem:[%s10724_s1 + $0x300] ss:$12 sps:$4 sm:$0xff]  }
  0x54   : > { %6872 = vmatprep.subr.bf16.mxu1 %v7537_v40 }
  0x55   : > { %6873 = vmatpush3.bf16.msra.mxu1 %v7538_v43  ;;  %v493_v43 = vld [vmem:[%s8441_s15 + $0x2] sm:$0xff] }
  0x56   : > { %1598 = vmatpush1.bf16.msra.mxu0 %v7503_v28  ;;  %6874 = vmatprep.subr.bf16.mxu1 %v7539_v48  ;;  %v7554_v28 = vld [vmem:[%s10724_s1 + $0x2a4] ss:$12 sps:$4 sm:$0xff]  }
  0x57   : > { %1599 = vmatprep.subr.bf16.mxu0 %v7508_v31  ;;  %v7552_v31 = vld [vmem:[%s10724_s1 + $0x2a0] ss:$12 sps:$4 sm:$0xff]   ;;  %v7566_v48 = vld [vmem:[%s10724_s1 + $0x304] ss:$12 sps:$4 sm:$0xff]  }
  0x59   : > { %1485 = vmatmul.mubr.bf16.gmra.mrb[4].mxu0 %v8489_v50  ;;  %1974 = vmatmul.mubr.bf16.gmra.mrb[20].mxu1 %v8606_v35  ;;  %v8645_v50 = vpack.c.bf16 %v458_v42, %v457_v41  ;;  %v7558_v41 = vld [vmem:[%s10724_s1 + $0x2d0] ss:$12 sps:$4 sm:$0xff]   ;;  %v7563_v42 = vld [vmem:[%s10724_s1 + $0x2ec] ss:$12 sps:$4 sm:$0xff]  }
  0x5a   : > { %1494 = vmatprep.mubr.bf16.mxu0 %v8497_v53  ;;  %1981 = vmatprep.mubr.bf16.mxu1 %v8611_v37  ;;  %v7519_v53 = vld [vmem:[%s10724_s1 + $0x1fc] ss:$12 sps:$4 sm:$0xff]  }
  0x5b   : > { %1600 = vmatpush1.bf16.msra.mxu0 %v7506_v38  ;;  %6875 = vmatpush3.bf16.msra.mxu1 %v7540_v49  ;;  %v7560_v38 = vld [vmem:[%s10724_s1 + $0x2d4] ss:$12 sps:$4 sm:$0xff]  }
  0x5c   : > { %1601 = vmatprep.subr.bf16.mxu0 %v7511_v39  ;;  %6876 = vmatprep.subr.bf16.mxu1 %v7544_v54  ;;  %v8774_v39 = vpack.c.bf16 %v468_v34, %v467_v33  ;;  %v521_v54 = vld [vmem:[%s8441_s15 + $0x2b] sm:$0xff]  ;;  %v531_v33 = vld [vmem:[%s8441_s15 + $0x93] sm:$0xff]  ;;  %v532_v34 = vld [vmem:[%s8441_s15 + $0xa3] sm:$0xff] }
  0x5f   : > { %1602 = vmatpush1.bf16.msra.mxu0 %v7509_v44  ;;  %6877 = vmatpush3.bf16.msra.mxu1 %v7545_v55  ;;  %v494_v44 = vld [vmem:[%s8441_s15 + $0xa] sm:$0xff]  ;;  %v522_v55 = vld [vmem:[%s8441_s15 + $0x33] sm:$0xff] }
  0x60   : > { %1603 = vmatprep.subr.bf16.mxu0 %v7514_v47  ;;  %7060 = vmatprep.subr.bf16.mxu1 %v7573_v22  ;;  %v520_v47 = vld [vmem:[%s8441_s15 + $0x23] sm:$0xff]  ;;  %v8798_v49 = vpack.c.bf16 %v494_v44, %v493_v43  ;;  %v533_v43 = vld [vmem:[%s8441_s15 + $0xab] sm:$0xff]  ;;  %v534_v44 = vld [vmem:[%s8441_s15 + $0xb3] sm:$0xff] }
  0x61   : > { %1495 = vmatmul.mubr.bf16.gmra.mrb[8].mxu0 %v8511_v60  ;;  %1982 = vmatmul.mubr.bf16.gmra.mrb[24].mxu1 %v8645_v50  ;;  %v486_v60 = vld [vmem:[%s8441_s15 + $0xb1] sm:$0xff] }
  0x62   : > { %1504 = vmatprep.mubr.bf16.mxu0 %v8519_v63  ;;  %1989 = vmatprep.mubr.bf16.mxu1 %v8647_v51  ;;  %v8677_v63 = vpack.c.bf16 %v486_v60, %v485_v59  ;;  %v7579_v59 = vld [vmem:[%s10724_s1 + $0x350] ss:$12 sps:$4 sm:$0xff]  }
  0x63   : > { %1604 = vmatpush1.bf16.msra.mxu0 %v7512_v52  ;;  %v495_v52 = vld [vmem:[%s8441_s15 + $0x12] sm:$0xff]  ;;  %v497_v60 = vld [vmem:[%s8441_s15 + $0x2a] sm:$0xff] }
  0x64   : > { %1605 = vmatprep.subr.bf16.mxu0 %v7519_v53  ;;  %v496_v53 = vld [vmem:[%s8441_s15 + $0x22] sm:$0xff] }
  0x65   : > { %v8816_v57 = vpack.c.bf16 %v496_v53, %v495_v52  ;;  %v7593_v52 = vld [vmem:[%s10724_s1 + $0x3a8] ss:$12 sps:$4 sm:$0xff]  }
  0x66   : > { %v535_v53 = vld [vmem:[%s8441_s15 + $0xc3] sm:$0xff] }
  0x67   : > { %1606 = vmatpush1.bf16.msra.mxu0 %v7517_v58  ;;  %v8818_v58 = vpack.c.bf16 %v522_v55, %v521_v54  ;;  %v536_v54 = vld [vmem:[%s8441_s15 + $0xcb] sm:$0xff] }
  0x68   : > { %1607 = vmatprep.subr.bf16.mxu0 %v7524_v61  ;;  %v498_v61 = vld [vmem:[%s8441_s15 + $0x32] sm:$0xff] }
  0x69   : > { %1505 = vmatmul.mubr.bf16.gmra.mrb[12].mxu0 %v8539_v8  ;;  %1990 = vmatmul.mubr.bf16.gmra.mrb[28].mxu1 %v8675_v62  ;;  %v8699_v8 = vpack.c.bf16 %v462_v3, %v461_v2  ;;  %v7584_v2 = vld [vmem:[%s10724_s1 + $0x380] ss:$12 sps:$4 sm:$0xff]  }
  0x6a   : > { %1514 = vmatprep.mubr.bf16.mxu0 %v8544_v10  ;;  %1997 = vmatprep.mubr.bf16.mxu1 %v8677_v63  ;;  %v7534_v10 = vld [vmem:[%s10724_s1 + $0x240] ss:$12 sps:$4 sm:$0xff]  }
  0x6b   : > { %1608 = vmatpush1.bf16.msra.mxu0 %v7522_v0  ;;  %v7580_v0 = vld [vmem:[%s10724_s1 + $0x368] ss:$12 sps:$4 sm:$0xff]  }
  0x6c   : > { %1609 = vmatprep.subr.bf16.mxu0 %v7531_v1  ;;  %v8834_v1 = vpack.c.bf16 %v498_v61, %v497_v60  ;;  %v538_v60 = vld [vmem:[%s8441_s15 + $0xe3] sm:$0xff] }
  0x6f   : > { %1610 = vmatpush1.bf16.msra.mxu0 %v7529_v5  ;;  %v500_v5 = vld [vmem:[%s8441_s15 + $0x4a] sm:$0xff] }
  0x70   : > { %1611 = vmatprep.subr.bf16.mxu0 %v7536_v7  ;;  %v526_v7 = vld [vmem:[%s8441_s15 + $0x63] sm:$0xff] }
  0x71   : > { %1515 = vmatmul.mubr.bf16.gmra.mrb[16].mxu0 %v8570_v21  ;;  %1998 = vmatmul.mubr.bf16.gmra.mrb[32].mxu1 %v8699_v8  ;;  %v7551_v21 = vld [vmem:[%s10724_s1 + $0x28c] ss:$12 sps:$4 sm:$0xff]  }
  0x72   : > { %1524 = vmatprep.mubr.bf16.mxu0 %v8578_v24  ;;  %2005 = vmatprep.mubr.bf16.mxu1 %v8701_v9  ;;  %v466_v24 = vld [vmem:[%s8441_s15 + $0xe0] sm:$0xff] }
  0x73   : > { %1612 = vmatpush1.bf16.msra.mxu0 %v7534_v10  ;;  %v8750_v29 = vpack.c.bf16 %v466_v24, %v465_v23  ;;  %v7586_v10 = vld [vmem:[%s10724_s1 + $0x3b0] ss:$12 sps:$4 sm:$0xff]   ;;  %v7572_v23 = vld [vmem:[%s10724_s1 + $0x334] ss:$12 sps:$4 sm:$0xff]  }
  0x74   : > { %1613 = vmatprep.subr.bf16.mxu0 %v7543_v11  ;;  %v8857_v11 = vpack.c.bf16 %v526_v7, %v525_v6  ;;  %v529_v24 = vld [vmem:[%s8441_s15 + $0x83] sm:$0xff]  ;;  %v516_v6 = vld [vmem:[%s8441_s15 + $0xf2] sm:$0xff] }
  0x75   : > { %v541_v7 = vld [vmem:[%s8441_s15 + $0x4] sm:$0xff] }
  0x77   : > { %1614 = vmatpush1.bf16.msra.mxu0 %v7541_v14  ;;  %v527_v14 = vld [vmem:[%s8441_s15 + $0x6b] sm:$0xff] }
  0x78   : > { %1615 = vmatprep.subr.bf16.mxu0 %v7548_v17  ;;  %v8870_v17 = vpack.c.bf16 %v502_v13, %v501_v12  ;;  %v544_v12 = vld [vmem:[%s8441_s15 + $0x24] sm:$0xff]  ;;  %v545_v13 = vld [vmem:[%s8441_s15 + $0x2c] sm:$0xff] }
  0x79   : > { %1525 = vmatmul.mubr.bf16.gmra.mrb[20].mxu0 %v8606_v35  ;;  %2006 = vmatmul.mubr.bf16.gmra.mrb[36].mxu1 %v8723_v18  ;;  %v7555_v35 = vld [vmem:[%s10724_s1 + $0x2b8] ss:$12 sps:$4 sm:$0xff]  }
  0x7a   : > { %1534 = vmatprep.mubr.bf16.mxu0 %v8611_v37  ;;  %2013 = vmatprep.mubr.bf16.mxu1 %v8725_v19  ;;  %v518_v37 = vld [vmem:[%s8441_s15 + $0xb] sm:$0xff] }
  0x7b   : > { %1616 = vmatpush1.bf16.msra.mxu0 %v7546_v20  ;;  %v8776_v40 = vpack.c.bf16 %v518_v37, %v517_v36  ;;  %v7567_v20 = vld [vmem:[%s10724_s1 + $0x318] ss:$12 sps:$4 sm:$0xff]   ;;  %v7581_v36 = vld [vmem:[%s10724_s1 + $0x360] ss:$12 sps:$4 sm:$0xff]  }
  0x7c   : > { %1617 = vmatprep.subr.bf16.mxu0 %v7551_v21  ;;  %v503_v21 = vld [vmem:[%s8441_s15 + $0x6a] sm:$0xff] }
  0x7f   : > { %1618 = vmatpush1.bf16.msra.mxu0 %v7549_v25  ;;  %v530_v25 = vld [vmem:[%s8441_s15 + $0x8b] sm:$0xff] }
  0x80   : > { %1619 = vmatprep.subr.bf16.mxu0 %v7554_v28  ;;  %v7577_v28 = vld [vmem:[%s10724_s1 + $0x34c] ss:$12 sps:$4 sm:$0xff]  }
  0x81   : > { %1535 = vmatmul.mubr.bf16.gmra.mrb[24].mxu0 %v8645_v50  ;;  %2014 = vmatmul.mubr.bf16.gmra.mrb[40].mxu1 %v8750_v29  ;;  %v8800_v50 = vpack.c.bf16 %v520_v47, %v519_v46  ;;  %v7590_v46 = vld [vmem:[%s10724_s1 + $0x390] ss:$12 sps:$4 sm:$0xff]  }
  0x82   : > { %1544 = vmatprep.mubr.bf16.mxu0 %v8647_v51  ;;  %2021 = vmatprep.mubr.bf16.mxu1 %v8752_v30  ;;  %v7574_v51 = vld [vmem:[%s10724_s1 + $0x320] ss:$12 sps:$4 sm:$0xff]  }
  0x83   : > { %1620 = vmatpush1.bf16.msra.mxu0 %v7552_v31  ;;  %v506_v31 = vld [vmem:[%s8441_s15 + $0x8a] sm:$0xff] }
  0x84   : > { %1621 = vmatprep.subr.bf16.mxu0 %v7557_v32  ;;  %v7575_v32 = vld [vmem:[%s10724_s1 + $0x348] ss:$12 sps:$4 sm:$0xff]  }
  0x87   : > { %1622 = vmatpush1.bf16.msra.mxu0 %v7555_v35  ;;  %v7583_v35 = vld [vmem:[%s10724_s1 + $0x364] ss:$12 sps:$4 sm:$0xff]  }
  0x88   : > { %1623 = vmatprep.subr.bf16.mxu0 %v7560_v38  ;;  %v7589_v38 = vld [vmem:[%s10724_s1 + $0x37c] ss:$12 sps:$4 sm:$0xff]  }
  0x89   : > { %1545 = vmatmul.mubr.bf16.gmra.mrb[28].mxu0 %v8675_v62  ;;  %2022 = vmatmul.mubr.bf16.gmra.mrb[44].mxu1 %v8774_v39  ;;  %v523_v62 = vld [vmem:[%s8441_s15 + $0x43] sm:$0xff] }
  0x8a   : > { %1554 = vmatprep.mubr.bf16.mxu0 %v8677_v63  ;;  %2062 = vmatprep.mubr.bf16.mxu1 %v8776_v40  ;;  %v524_v63 = vld [vmem:[%s8441_s15 + $0x4b] sm:$0xff] }
  0x8b   : > { %1624 = vmatpush1.bf16.msra.mxu0 %v7558_v41  ;;  %v8839_v3 = vpack.c.bf16 %v524_v63, %v523_v62  ;;  %v508_v41 = vld [vmem:[%s8441_s15 + $0xa2] sm:$0xff]  ;;  %v513_v63 = vld [vmem:[%s8441_s15 + $0xd2] sm:$0xff] }
  0x8c   : > { %1625 = vmatprep.subr.bf16.mxu0 %v7563_v42  ;;  %v7587_v42 = vld [vmem:[%s10724_s1 + $0x378] ss:$12 sps:$4 sm:$0xff]  }
  0x8f   : > { %1626 = vmatpush1.bf16.msra.mxu0 %v7561_v45  ;;  %v7592_v45 = vld [vmem:[%s10724_s1 + $0x394] ss:$12 sps:$4 sm:$0xff]  }
  0x90   : > { %1748 = vmatprep.subr.bf16.mxu0 %v7566_v48  ;;  %v7595_v48 = vld [vmem:[%s10724_s1 + $0x3ac] ss:$12 sps:$4 sm:$0xff]  }
  0x91   : > { %1555 = vmatmul.mubr.bf16.gmra.mrb[32].mxu0 %v8699_v8  ;;  %2063 = vmatmul.mubr.bf16.vlgmr.msra.gmra.mrb[48].mxu1 %v8798_v49  ;;  %v7585_v8 = vld [vmem:[%s10724_s1 + $0x398] ss:$12 sps:$4 sm:$0xff]  }
  0x92   : > { %1564 = vmatprep.mubr.bf16.mxu0 %v8701_v9  ;;  %2070 = vmatprep.mubr.bf16.mxu1 %v8800_v50  ;;  %v8852_v9 = vpack.c.bf16 %v500_v5, %v499_v4  ;;  %v515_v5 = vld [vmem:[%s8441_s15 + $0xea] sm:$0xff] }
  0x93   : > { %7061 = vmatpush3.bf16.msra.mxu1 %v7573_v22  ;;  %v504_v22 = vld [vmem:[%s8441_s15 + $0x72] sm:$0xff] }
  0x94   : > { %7062 = vmatprep.subr.bf16.mxu1 %v7574_v51  ;;  %v8894_v27 = vpack.c.bf16 %v504_v22, %v503_v21 }
  0x97   : > { %7063 = vmatpush3.bf16.msra.mxu1 %v7574_v51  ;;  %v510_v51 = vld [vmem:[%s8441_s15 + $0xb2] sm:$0xff] }
  0x98   : > { %7064 = vmatprep.subr.bf16.mxu1 %v7578_v56 }
  0x99   : > { %1565 = vmatmul.mubr.bf16.gmra.mrb[36].mxu0 %v8723_v18  ;;  %2071 = vmatmul.mubr.bf16.gmra.mrb[52].mxu1 %v8816_v57  ;;  %v7569_v18 = vld [vmem:[%s10724_s1 + $0x31c] ss:$12 sps:$4 sm:$0xff]  }
  0x9a   : > { %1574 = vmatprep.mubr.bf16.mxu0 %v8725_v19  ;;  %2078 = vmatprep.mubr.bf16.mxu1 %v8818_v58  ;;  %v8875_v19 = vpack.c.bf16 %v528_v15, %v527_v14  ;;  %v546_v14 = vld [vmem:[%s8441_s15 + $0x34] sm:$0xff] }
  0x9b   : > { %7065 = vmatpush3.bf16.msra.mxu1 %v7578_v56  ;;  %v613_v56 = vpack.c.bf16 %v536_v54, %v535_v53  ;;  %v563_v53 = vld [vmem:[%s8441_s15 + $0xec] sm:$0xff]  ;;  %v564_v54 = vld [vmem:[%s8441_s15 + $0xf4] sm:$0xff] }
  0x9c   : > { %7066 = vmatprep.subr.bf16.mxu1 %v7579_v59 }
  0x9f   : > { %7067 = vmatpush3.bf16.msra.mxu1 %v7579_v59  ;;  %v537_v59 = vld [vmem:[%s8441_s15 + $0xd3] sm:$0xff] }
  0xa0   : > { %7068 = vmatprep.subr.bf16.mxu1 %v7580_v0  ;;  %v618_v62 = vpack.c.bf16 %v538_v60, %v537_v59 }
  0xa1   : > { %1575 = vmatmul.mubr.bf16.gmra.mrb[40].mxu0 %v8750_v29  ;;  %2079 = vmatmul.mubr.bf16.gmra.mrb[56].mxu1 %v8834_v1  ;;  %v8899_v29 = vpack.c.bf16 %v530_v25, %v529_v24  ;;  %v552_v24 = vld [vmem:[%s8441_s15 + $0x74] sm:$0xff]  ;;  %v553_v25 = vld [vmem:[%s8441_s15 + $0x84] sm:$0xff] }
  0xa2   : > { %1584 = vmatprep.mubr.bf16.mxu0 %v8752_v30  ;;  %2086 = vmatprep.mubr.bf16.mxu1 %v8839_v3  ;;  %v505_v30 = vld [vmem:[%s8441_s15 + $0x82] sm:$0xff] }
  0xa3   : > { %7069 = vmatpush3.bf16.msra.mxu1 %v7580_v0  ;;  %v597_v37 = vpack.c.bf16 %v506_v31, %v505_v30  ;;  %v514_v0 = vld [vmem:[%s8441_s15 + $0xe2] sm:$0xff]  ;;  %v557_v31 = vld [vmem:[%s8441_s15 + $0xac] sm:$0xff] }
  0xa4   : > { %7070 = vmatprep.subr.bf16.mxu1 %v7584_v2  ;;  %v556_v30 = vld [vmem:[%s8441_s15 + $0xa4] sm:$0xff] }
  0xa7   : > { %7071 = vmatpush3.bf16.msra.mxu1 %v7584_v2  ;;  %v540_v2 = vld [vmem:[%s8441_s15 + $0xf3] sm:$0xff] }
  0xa8   : > { %7072 = vmatprep.subr.bf16.mxu1 %v7585_v8 }
  0xa9   : > { %1585 = vmatmul.mubr.bf16.gmra.mrb[44].mxu0 %v8774_v39  ;;  %2087 = vmatmul.mubr.bf16.gmra.mrb[60].mxu1 %v8852_v9  ;;  %v603_v39 = vpack.c.bf16 %v532_v34, %v531_v33 }
  0xaa   : > { %1627 = vmatprep.mubr.bf16.mxu0 %v8776_v40  ;;  %2094 = vmatprep.mubr.bf16.mxu1 %v8857_v11  ;;  %v507_v40 = vld [vmem:[%s8441_s15 + $0x92] sm:$0xff] }
  0xab   : > { %7073 = vmatpush3.bf16.msra.mxu1 %v7585_v8  ;;  %v602_v47 = vpack.c.bf16 %v508_v41, %v507_v40  ;;  %v542_v8 = vld [vmem:[%s8441_s15 + $0xc] sm:$0xff]  ;;  %v559_v40 = vld [vmem:[%s8441_s15 + $0xc4] sm:$0xff] }
  0xac   : > { %7074 = vmatprep.subr.bf16.mxu1 %v7586_v10  ;;  %v560_v41 = vld [vmem:[%s8441_s15 + $0xcc] sm:$0xff] }
  0xaf   : > { %7075 = vmatpush3.bf16.msra.mxu1 %v7586_v10  ;;  %v569_v10 = vpack.c.bf16 %v542_v8, %v541_v7  ;;  %v7599_v7 = vld [vmem:[%s10726_s3 + $0x10] ss:$8 sps:$4 sm:$0xff]   ;;  %v7601_v8 = vld [vmem:[%s10726_s3 + $0x14] ss:$8 sps:$4 sm:$0xff]  }
  0xb1   : > { %1628 = vmatmul.mubr.bf16.vlgmr.msra.gmra.mrb[0].mxu0 %v8798_v49  ;;  %2095 = vmatmul.mubr.bf16.gmra.mrb[64].mxu1 %v8870_v17  ;;  %v608_v49 = vpack.c.bf16 %v534_v44, %v533_v43  ;;  %v8236_v43 = vmov 0   ;;  %v561_v44 = vld [vmem:[%s8441_s15 + $0xd4] sm:$0xff] }
  0xb2   : > { %1749 = vmatpush1.bf16.msra.mxu0 %v7564_v16  ;;  %1637 = vmatprep.mubr.bf16.mxu0 %v8800_v50  ;;  %v509_v50 = vld [vmem:[%s8441_s15 + $0xaa] sm:$0xff]  ;;  %v8970_v16 = vpack.c.bf16 %v546_v14, %v545_v13 }
  0xb3   : > { %2102 = vmatprep.mubr.bf16.mxu1 %v8875_v19  ;;  %1750 = vmatprep.subr.bf16.mxu0 %v7569_v18  ;;  %v607_v55 = vpack.c.bf16 %v510_v51, %v509_v50  ;;  %v548_v18 = vld [vmem:[%s8441_s15 + $0x4c] sm:$0xff] }
  0xb6   : > { %1751 = vmatpush1.bf16.msra.mxu0 %v7567_v20  ;;  %v550_v20 = vld [vmem:[%s8441_s15 + $0x64] sm:$0xff] }
  0xb7   : > { %1752 = vmatprep.subr.bf16.mxu0 %v7572_v23  ;;  %v551_v23 = vld [vmem:[%s8441_s15 + $0x6c] sm:$0xff] }
  0xb9   : > { %1638 = vmatmul.mubr.bf16.gmra.mrb[4].mxu0 %v8816_v57  ;;  %2103 = vmatmul.mubr.bf16.gmra.mrb[68].mxu1 %v8894_v27  ;;  %v511_v57 = vld [vmem:[%s8441_s15 + $0xc2] sm:$0xff] }
  0xba   : > { %1647 = vmatprep.mubr.bf16.mxu0 %v8818_v58  ;;  %2110 = vmatprep.mubr.bf16.mxu1 %v8899_v29  ;;  %v512_v58 = vld [vmem:[%s8441_s15 + $0xca] sm:$0xff] }
  0xbb   : > { %1753 = vmatpush1.bf16.msra.mxu0 %v7570_v26  ;;  %v612_v61 = vpack.c.bf16 %v512_v58, %v511_v57  ;;  %v554_v26 = vld [vmem:[%s8441_s15 + $0x8c] sm:$0xff]  ;;  %v9026_v57 = vpack.c.bf16 %v564_v54, %v563_v53  ;;  %v7614_v54 = vld [vmem:[%s10726_s3 + $0x60] ss:$8 sps:$4 sm:$0xff]  }
  0xbc   : > { %1754 = vmatprep.subr.bf16.mxu0 %v7577_v28  ;;  %v8990_v28 = vpack.c.bf16 %v554_v26, %v553_v25  ;;  %v7607_v25 = vld [vmem:[%s10726_s3 + $0x34] ss:$8 sps:$4 sm:$0xff]  }
  0xbf   : > { %1755 = vmatpush1.bf16.msra.mxu0 %v7575_v32  ;;  %v558_v32 = vld [vmem:[%s8441_s15 + $0xb4] sm:$0xff] }
  0xc0   : > { %1756 = vmatprep.subr.bf16.mxu0 %v7583_v35 }
  0xc1   : > { %1648 = vmatmul.mubr.bf16.gmra.mrb[8].mxu0 %v8834_v1  ;;  %2111 = vmatmul.mubr.bf16.gmra.mrb[72].mxu1 %v597_v37  ;;  %v539_v1 = vld [vmem:[%s8441_s15 + $0xeb] sm:$0xff] }
  0xc2   : > { %1657 = vmatprep.mubr.bf16.mxu0 %v8839_v3  ;;  %2118 = vmatprep.mubr.bf16.mxu1 %v603_v39  ;;  %v617_v3 = vpack.c.bf16 %v514_v0, %v513_v63  ;;  %v623_v4 = vpack.c.bf16 %v540_v2, %v539_v1  ;;  %v7596_v63 = vld [vmem:[%s10726_s3] ss:$8 sps:$4 sm:$0xff]   ;;  %v7598_v0 = vld [vmem:[%s10726_s3 + $0x4] ss:$8 sps:$4 sm:$0xff]  }
  0xc3   : > { %1757 = vmatpush1.bf16.msra.mxu0 %v7581_v36  ;;  %v9000_v36 = vpack.c.bf16 %v558_v32, %v557_v31  ;;  %2684 = vmatprep.subr.bf16.mxu1 %v7598_v0 }
  0xc4   : > { %1758 = vmatprep.subr.bf16.mxu0 %v7589_v38 }
  0xc7   : > { %1759 = vmatpush1.bf16.msra.mxu0 %v7587_v42 }
  0xc8   : > { %1760 = vmatprep.subr.bf16.mxu0 %v7592_v45  ;;  %v562_v45 = vld [vmem:[%s8441_s15 + $0xe4] sm:$0xff] }
  0xc9   : > { %1658 = vmatmul.mubr.bf16.gmra.mrb[12].mxu0 %v8852_v9  ;;  %2119 = vmatmul.mubr.bf16.gmra.mrb[76].mxu1 %v602_v47  ;;  %v622_v9 = vpack.c.bf16 %v516_v6, %v515_v5 }
  0xca   : > { %1667 = vmatprep.mubr.bf16.mxu0 %v8857_v11  ;;  %2126 = vmatprep.mubr.bf16.mxu1 %v608_v49  ;;  %v543_v11 = vld [vmem:[%s8441_s15 + $0x14] sm:$0xff] }
  0xcb   : > { %1761 = vmatpush1.bf16.msra.mxu0 %v7590_v46  ;;  %v8968_v15 = vpack.c.bf16 %v544_v12, %v543_v11 }
  0xcc   : > { %1762 = vmatprep.subr.bf16.mxu0 %v7595_v48 }
  0xcf   : > { %1763 = vmatpush1.bf16.msra.mxu0 %v7593_v52 }
  0xd1   : > { %1668 = vmatmul.mubr.bf16.gmra.mrb[16].mxu0 %v8870_v17  ;;  %2127 = vmatmul.mubr.bf16.gmra.mrb[80].mxu1 %v607_v55  ;;  %v547_v17 = vld [vmem:[%s8441_s15 + $0x44] sm:$0xff] }
  0xd2   : > { %1677 = vmatprep.mubr.bf16.mxu0 %v8875_v19  ;;  %2134 = vmatprep.mubr.bf16.mxu1 %v613_v56  ;;  %v549_v19 = vld [vmem:[%s8441_s15 + $0x54] sm:$0xff]  ;;  %v8978_v21 = vpack.c.bf16 %v548_v18, %v547_v17 }
  0xd3   : > { %v8980_v22 = vpack.c.bf16 %v550_v20, %v549_v19 }
  0xd9   : > { %1678 = vmatmul.mubr.bf16.gmra.mrb[20].mxu0 %v8894_v27  ;;  %2135 = vmatmul.mubr.bf16.gmra.mrb[84].mxu1 %v612_v61  ;;  %v8988_v27 = vpack.c.bf16 %v552_v24, %v551_v23  ;;  %v7605_v24 = vld [vmem:[%s10726_s3 + $0x30] ss:$8 sps:$4 sm:$0xff]  }
  0xda   : > { %1687 = vmatprep.mubr.bf16.mxu0 %v8899_v29  ;;  %2142 = vmatprep.mubr.bf16.mxu1 %v618_v62  ;;  %v555_v29 = vld [vmem:[%s8441_s15 + $0x94] sm:$0xff]  ;;  %s434_s15 = sand.u32 1, %s8226_s26  }
  0xdb   : > { %v8998_v34 = vpack.c.bf16 %v556_v30, %v555_v29  ;;  %s6238_s30 = sshll.u32 %s434_s15, 3  ;;  %s6162_s19 = scalar_lea.sflag [#allocation3], %s434_s15 }
  0xdc   : > { %s436_s16 = scalar_lea.vmem [#allocation2], %s6238_s30 }
  0xdd   : > { %s6175_s17 = sshll.u32 %s436_s16, 4  ;;  %s10683_s17 = int_to_ptr.vmem [resolvable:$true] %s6175_s17 }
  0xde   : > { %s8172_s14 = scalar_lea.vmem %s10683_s17, 128  ;;  %p8179_p0 = scmp.lt.s32.totalorder %s10683_s17, %s8177_s23 }
  0xdf   : > { %p8173_p11 = scmp.ne.s32.totalorder %s10683_s17, %s8172_s14  ;;  %p8180_p1 = scmp.lt.s32.totalorder %s8178_s24, %s8172_s14 }
  0xe1   : > { %1688 = vmatmul.mubr.bf16.gmra.mrb[24].mxu0 %v597_v37  ;;  %2143 = vmatmul.mubr.bf16.gmra.mrb[88].mxu1 %v617_v3  ;;  %p8174_p12 = pnand %p8173_p11, %p8346_p5  ;;  %p8181_p2 = por %p8180_p1, %p8179_p0 }
  0xe2   : > { %1697 = vmatprep.mubr.bf16.mxu0 %v603_v39  ;;  %2150 = vmatprep.mubr.bf16.mxu1 %v623_v4 }
  0xe3   : > { %p8175_p13 = pneg %p8174_p12 }
  0xe5   : > { %p8182_p3 = pnand %p8181_p2, %p8175_p13 }
  0xe9   : > { %1698 = vmatmul.mubr.bf16.gmra.mrb[28].mxu0 %v602_v47  ;;  %2151 = vmatmul.mubr.bf16.gmra.mrb[92].mxu1 %v622_v9  ;;  %v9013_v47 = vpack.c.bf16 %v560_v41, %v559_v40 }
  0xea   : > { %1707 = vmatprep.mubr.bf16.mxu0 %v608_v49  ;;  %7076 = vmatprep.mubr.bf16.mxu1 %v569_v10  ;;  %v9015_v49 = vpack.c.bf16 %v562_v45, %v561_v44  ;;  %v7611_v45 = vld [vmem:[%s10726_s3 + $0x50] ss:$8 sps:$4 sm:$0xff]  }
  0xf1   : > { %1708 = vmatmul.mubr.bf16.gmra.mrb[32].mxu0 %v607_v55  ;;  %7077 = vmatmul.mubr.bf16.vlgmr.msra.gmra.mrb[96].mxu1 %v8968_v15 }
  0xf2   : > { %1717 = vmatprep.mubr.bf16.mxu0 %v613_v56  ;;  %7080 = vmatprep.mubr.bf16.mxu1 %v8970_v16 }
  0xf3   : > { %2685 = vmatpush1.bf16.msra.mxu1 %v7596_v63 }
  0xf4   : > { %2686 = vmatprep.subr.bf16.mxu1 %v7601_v8  ;;  %v7625_v8 = vld [vmem:[%s10726_s3 + $0x94] ss:$8 sps:$4 sm:$0xff]  }
  0xf7   : > { %2687 = vmatpush1.bf16.msra.mxu1 %v7599_v7 }
  0xf9   : > { %1718 = vmatmul.mubr.bf16.gmra.mrb[36].mxu0 %v612_v61  ;;  %7081 = vmatmul.mubr.bf16.gmra.mrb[100].mxu1 %v8978_v21 }
  0xfa   : > { %1727 = vmatprep.mubr.bf16.mxu0 %v618_v62  ;;  %7084 = vmatprep.mubr.bf16.mxu1 %v8980_v22 }
 0x101   : > { %1728 = vmatmul.mubr.bf16.gmra.mrb[40].mxu0 %v617_v3  ;;  %7085 = vmatmul.mubr.bf16.gmra.mrb[104].mxu1 %v8988_v27 }
 0x102   : > { %1737 = vmatprep.mubr.bf16.mxu0 %v623_v4  ;;  %7088 = vmatprep.mubr.bf16.mxu1 %v8990_v28 }
 0x104   : > { %v6790_v33 = vpop.f32.mrb[0].mxu1 }
 0x105   : > { %v6791_v35 = vpop.f32.mrb[1].mxu1 }
 0x106   : > { %v9002_v37 = vadd.f32 %v6791_v35, %v6790_v33  ;;  %v6793_v38 = vpop.f32.mrb[2].mxu1  ;;  %v7608_v33 = vld [vmem:[%s10726_s3 + $0x40] ss:$8 sps:$4 sm:$0xff]   ;;  %v7610_v35 = vld [vmem:[%s10726_s3 + $0x44] ss:$8 sps:$4 sm:$0xff]  }
 0x107   : > { %v6794_v39 = vpop.f32.mrb[3].mxu1 }
 0x108   : > { %v9006_v42 = vadd.f32 %v6794_v39, %v6793_v38 }
 0x109   : > { %1738 = vmatmul.mubr.bf16.gmra.mrb[44].mxu0 %v622_v9  ;;  %7089 = vmatmul.mubr.bf16.gmra.mrb[108].mxu1 %v8998_v34 }
 0x10a   : > { %1780 = vmatprep.mubr.bf16.mxu0 %v8236_v43  ;;  %7092 = vmatprep.mubr.bf16.mxu1 %v9000_v36 }
 0x10c   : > { %v6796_v46 = vpop.f32.mrb[4].mxu1 }
 0x10d   : > { %v6797_v48 = vpop.f32.mrb[5].mxu1 }
 0x10e   : > { %v9017_v50 = vadd.f32 %v6797_v48, %v6796_v46  ;;  %v6799_v51 = vpop.f32.mrb[6].mxu1  ;;  %v7613_v46 = vld [vmem:[%s10726_s3 + $0x54] ss:$8 sps:$4 sm:$0xff]  }
 0x10f   : > { %v6800_v52 = vpop.f32.mrb[7].mxu1 }
 0x110   : > { %v9021_v55 = vadd.f32 %v6800_v52, %v6799_v51 }
 0x111   : > { %1781 = vmatmul.mubr.bf16.vlgmr.msra.gmra.mrb[0].mxu0 %v569_v10  ;;  %7093 = vmatmul.mubr.bf16.gmra.mrb[112].mxu1 %v9013_v47 }
 0x112   : > { %1790 = vmatprep.mubr.bf16.mxu0 %v8236_v43  ;;  %7096 = vmatprep.mubr.bf16.mxu1 %v9015_v49 }
 0x114   : > { %v6802_v56 = vpop.f32.mrb[8].mxu1 }
 0x115   : > { %v6803_v58 = vpop.f32.mrb[9].mxu1 }
 0x116   : > { %v9028_v59 = vadd.f32 %v6803_v58, %v6802_v56  ;;  %v6805_v60 = vpop.f32.mrb[10].mxu1 }
 0x117   : > { %v6806_v61 = vpop.f32.mrb[11].mxu1 }
 0x118   : > { %v9031_v62 = vadd.f32 %v6806_v61, %v6805_v60  ;;  %v7619_v60 = vld [vmem:[%s10726_s3 + $0x74] ss:$8 sps:$4 sm:$0xff]   ;;  %v7617_v61 = vld [vmem:[%s10726_s3 + $0x70] ss:$8 sps:$4 sm:$0xff]  }
 0x119   : > { %1791 = vmatmul.mubr.bf16.gmra.mrb[4].mxu0 %v8968_v15  ;;  %7097 = vmatmul.mubr.bf16.gmra.mrb[116].mxu1 %v9026_v57  ;;  %v7602_v15 = vld [vmem:[%s10726_s3 + $0x20] ss:$8 sps:$4 sm:$0xff]  }
 0x11a   : > { %1800 = vmatprep.mubr.bf16.mxu0 %v8236_v43 }
 0x11c   : > { %v6808_v1 = vpop.f32.mrb[12].mxu1 }
 0x11d   : > { %v6809_v2 = vpop.f32.mrb[13].mxu1 }
 0x11e   : > { %v9041_v3 = vadd.f32 %v6809_v2, %v6808_v1  ;;  %v6811_v4 = vpop.f32.mrb[14].mxu1 }
 0x11f   : > { %v6812_v5 = vpop.f32.mrb[15].mxu1 }
 0x120   : > { %v9044_v6 = vadd.f32 %v6812_v5, %v6811_v4  ;;  %v7620_v4 = vld [vmem:[%s10726_s3 + $0x80] ss:$8 sps:$4 sm:$0xff]  }
 0x121   : > { %1801 = vmatmul.mubr.bf16.gmra.mrb[8].mxu0 %v8970_v16  ;;  %v7604_v16 = vld [vmem:[%s10726_s3 + $0x24] ss:$8 sps:$4 sm:$0xff]  }
 0x122   : > { %1810 = vmatprep.mubr.bf16.mxu0 %v8236_v43  ;;  %2688 = vmatprep.subr.bf16.mxu1 %v7604_v16 }
 0x123   : > { %2689 = vmatpush1.bf16.msra.mxu1 %v7602_v15 }
 0x124   : > { %v6814_v9 = vpop.f32.mrb[16].mxu1  ;;  %2690 = vmatprep.subr.bf16.mxu1 %v7607_v25  ;;  %v7629_v25 = vld [vmem:[%s10726_s3 + $0xb0] ss:$8 sps:$4 sm:$0xff]  }
 0x125   : > { %v6815_v10 = vpop.f32.mrb[17].mxu1 }
 0x126   : > { %v9053_v11 = vadd.f32 %v6815_v10, %v6814_v9  ;;  %v6817_v12 = vpop.f32.mrb[18].mxu1  ;;  %v7623_v9 = vld [vmem:[%s10726_s3 + $0x90] ss:$8 sps:$4 sm:$0xff]   ;;  %v787_v10 = vlaneseq }
 0x127   : > { %v6818_v13 = vpop.f32.mrb[19].mxu1  ;;  %2691 = vmatpush1.bf16.msra.mxu1 %v7605_v24  ;;  %v7631_v24 = vld [vmem:[%s10726_s3 + $0xb4] ss:$8 sps:$4 sm:$0xff]  }
 0x128   : > { %v9056_v14 = vadd.f32 %v6818_v13, %v6817_v12  ;;  %2692 = vmatprep.subr.bf16.mxu1 %v7610_v35 }
 0x129   : > { %1811 = vmatmul.mubr.bf16.gmra.mrb[12].mxu0 %v8978_v21 }
 0x12a   : > { %1820 = vmatprep.mubr.bf16.mxu0 %v8236_v43 }
 0x12b   : > { %2693 = vmatpush1.bf16.msra.mxu1 %v7608_v33 }
 0x12c   : > { %v6820_v17 = vpop.f32.mrb[20].mxu1  ;;  %2694 = vmatprep.subr.bf16.mxu1 %v7613_v46  ;;  %v7635_v46 = vld [vmem:[%s10726_s3 + $0xd0] ss:$8 sps:$4 sm:$0xff]  }
 0x12d   : > { %v6821_v18 = vpop.f32.mrb[21].mxu1 }
 0x12e   : > { %v9065_v19 = vadd.f32 %v6821_v18, %v6820_v17  ;;  %v6823_v20 = vpop.f32.mrb[22].mxu1  ;;  %v7626_v17 = vld [vmem:[%s10726_s3 + $0xa0] ss:$8 sps:$4 sm:$0xff]  }
 0x12f   : > { %v6824_v21 = vpop.f32.mrb[23].mxu1  ;;  %2695 = vmatpush1.bf16.msra.mxu1 %v7611_v45  ;;  %v7637_v45 = vld [vmem:[%s10726_s3 + $0xd4] ss:$8 sps:$4 sm:$0xff]  }
 0x130   : > { %v9068_v23 = vadd.f32 %v6824_v21, %v6823_v20  ;;  %v9145_v20 = vshrl.u32 %v787_v10, 7 }
 0x131   : > { %1821 = vmatmul.mubr.bf16.gmra.mrb[16].mxu0 %v8980_v22 }
 0x132   : > { %1830 = vmatprep.mubr.bf16.mxu0 %v8236_v43 }
 0x134   : > { %v6826_v26 = vpop.f32.mrb[24].mxu1 }
 0x135   : > { %v6827_v29 = vpop.f32.mrb[25].mxu1 }
 0x136   : > { %v9077_v30 = vadd.f32 %v6827_v29, %v6826_v26  ;;  %v6829_v31 = vpop.f32.mrb[26].mxu1  ;;  %v797_v26 = vsub.s32 2, %v9145_v20 }
 0x137   : > { %v6830_v22 = vpop.f32.mrb[27].mxu1 }
 0x138   : > { %v9080_v32 = vadd.f32 %v6830_v22, %v6829_v31  ;;  %v7634_v22 = vld [vmem:[%s10726_s3 + $0xc4] ss:$8 sps:$4 sm:$0xff]  }
 0x139   : > { %1831 = vmatmul.mubr.bf16.gmra.mrb[20].mxu0 %v8988_v27 }
 0x13a   : > { %1840 = vmatprep.mubr.bf16.mxu0 %v8236_v43 }
 0x13c   : > { %v6832_v38 = vpop.f32.mrb[28].mxu1 }
 0x13d   : > { %v6833_v39 = vpop.f32.mrb[29].mxu1 }
 0x13e   : > { %v9089_v40 = vadd.f32 %v6833_v39, %v6832_v38  ;;  %v6835_v41 = vpop.f32.mrb[30].mxu1  ;;  %v7632_v38 = vld [vmem:[%s10726_s3 + $0xc0] ss:$8 sps:$4 sm:$0xff]  }
 0x13f   : > { %v6836_v27 = vpop.f32.mrb[31].mxu1 }
 0x140   : > { %v9092_v44 = vadd.f32 %v6836_v27, %v6835_v41 }
 0x141   : > { %1841 = vmatmul.mubr.bf16.gmra.mrb[24].mxu0 %v8990_v28  ;;  %v7616_v28 = vld [vmem:[%s10726_s3 + $0x64] ss:$8 sps:$4 sm:$0xff]  }
 0x142   : > { %1850 = vmatprep.mubr.bf16.mxu0 %v8236_v43  ;;  %2696 = vmatprep.subr.bf16.mxu1 %v7616_v28  ;;  %v7640_v28 = vld [vmem:[%s10726_s3 + $0xe4] ss:$8 sps:$4 sm:$0xff]  }
 0x143   : > { %2697 = vmatpush1.bf16.msra.mxu1 %v7614_v54 }
 0x144   : > { %v6838_v48 = vpop.f32.mrb[32].mxu1  ;;  %2698 = vmatprep.subr.bf16.mxu1 %v7619_v60  ;;  %v7638_v60 = vld [vmem:[%s10726_s3 + $0xe0] ss:$8 sps:$4 sm:$0xff]  }
 0x145   : > { %v6839_v51 = vpop.f32.mrb[33].mxu1 }
 0x146   : > { %v9104_v52 = vadd.f32 %v6839_v51, %v6838_v48  ;;  %v6841_v53 = vpop.f32.mrb[34].mxu1 }
 0x147   : > { %v6842_v56 = vpop.f32.mrb[35].mxu1  ;;  %2699 = vmatpush1.bf16.msra.mxu1 %v7617_v61 }
 0x148   : > { %v9110_v58 = vadd.f32 %v6842_v56, %v6841_v53 }
 0x149   : > { %1851 = vmatmul.mubr.bf16.gmra.mrb[28].mxu0 %v8998_v34  ;;  %v7622_v34 = vld [vmem:[%s10726_s3 + $0x84] ss:$8 sps:$4 sm:$0xff]  }
 0x14a   : > { %1860 = vmatprep.mubr.bf16.mxu0 %v8236_v43  ;;  %2700 = vmatprep.subr.bf16.mxu1 %v7622_v34 }
 0x14b   : > { %2701 = vmatpush1.bf16.msra.mxu1 %v7620_v4 }
 0x14c   : > { %v6844_v63 = vpop.f32.mrb[36].mxu1  ;;  %2702 = vmatprep.subr.bf16.mxu1 %v7625_v8 }
 0x14d   : > { %v6845_v0 = vpop.f32.mrb[37].mxu1 }
 0x14e   : > { %v9122_v1 = vadd.f32 %v6845_v0, %v6844_v63  ;;  %v6847_v2 = vpop.f32.mrb[38].mxu1  ;;  %v7643_v0 = vld [vmem:[%s10726_s3 + $0xf4] ss:$8 sps:$4 sm:$0xff]  }
 0x14f   : > { %v6848_v5 = vpop.f32.mrb[39].mxu1  ;;  %2703 = vmatpush1.bf16.msra.mxu1 %v7623_v9 }
 0x150   : > { %v9128_v7 = vadd.f32 %v6848_v5, %v6847_v2 }
 0x151   : > { %1861 = vmatmul.mubr.bf16.gmra.mrb[32].mxu0 %v9000_v36  ;;  %v7628_v36 = vld [vmem:[%s10726_s3 + $0xa4] ss:$8 sps:$4 sm:$0xff]  }
 0x152   : > { %1870 = vmatprep.mubr.bf16.mxu0 %v8236_v43  ;;  %2704 = vmatprep.subr.bf16.mxu1 %v7628_v36 }
 0x153   : > { %2705 = vmatpush1.bf16.msra.mxu1 %v7626_v17 }
 0x154   : > { %v6850_v12 = vpop.f32.mrb[40].mxu1  ;;  %2706 = vmatprep.subr.bf16.mxu1 %v7631_v24 }
 0x155   : > { %v6851_v13 = vpop.f32.mrb[41].mxu1 }
 0x156   : > { %v9140_v15 = vadd.f32 %v6851_v13, %v6850_v12  ;;  %v6853_v16 = vpop.f32.mrb[42].mxu1 }
 0x157   : > { %v6854_v18 = vpop.f32.mrb[43].mxu1  ;;  %2707 = vmatpush1.bf16.msra.mxu1 %v7629_v25 }
 0x158   : > { %v9148_v21 = vadd.f32 %v6854_v18, %v6853_v16  ;;  %2708 = vmatprep.subr.bf16.mxu1 %v7634_v22 }
 0x159   : > { %1871 = vmatmul.mubr.bf16.gmra.mrb[36].mxu0 %v9013_v47  ;;  %v9161_v47 = vld [vmem:[%s10725_s2] sm:$0x7] }
 0x15a   : > { %1880 = vmatprep.mubr.bf16.mxu0 %v8236_v43  ;;  %v9174_v41 = vrot.slane %v9161_v47, %v797_v26 }
 0x15b   : > { %2709 = vmatpush1.bf16.msra.mxu1 %v7632_v38 }
 0x15c   : > { %v6856_v29 = vpop.f32.mrb[44].mxu1  ;;  %2710 = vmatprep.subr.bf16.mxu1 %v7637_v45  ;;  %v1936_v48 = vadd.f32 %v9002_v37, %v9174_v41  ;;  %v1939_v53 = vadd.f32 %v9006_v42, %v9174_v41  ;;  %v7641_v42 = vld [vmem:[%s10726_s3 + $0xf0] ss:$8 sps:$4 sm:$0xff]   ;;  %v1944_v2 = vadd.f32 %v9017_v50, %v9174_v41  ;;  %v1947_v5 = vadd.f32 %v9021_v55, %v9174_v41  ;;  %v7646_v50 = vld [vmem:[%s10726_s3 + $0x104] ss:$8 sps:$4 sm:$0xff]  }
 0x15d   : > { %v6857_v31 = vpop.f32.mrb[45].mxu1  ;;  %v1952_v16 = vadd.f32 %v9028_v59, %v9174_v41  ;;  %v1955_v55 = vadd.f32 %v9031_v62, %v9174_v41  ;;  %v1960_v59 = vadd.f32 %v9041_v3, %v9174_v41  ;;  %v1963_v45 = vadd.f32 %v9044_v6, %v9174_v41 }
 0x15e   : > { %v9166_v33 = vadd.f32 %v6857_v31, %v6856_v29  ;;  %v6859_v35 = vpop.f32.mrb[46].mxu1  ;;  %v1971_v3 = vadd.f32 %v9056_v14, %v9174_v41 }
 0x15f   : > { %v6860_v39 = vpop.f32.mrb[47].mxu1  ;;  %2711 = vmatpush1.bf16.msra.mxu1 %v7635_v46 }
 0x160   : > { %v9177_v27 = vadd.f32 %v6860_v39, %v6859_v35  ;;  %2712 = vmatprep.subr.bf16.mxu1 %v7640_v28 }
 0x161   : > { %1881 = vmatmul.mubr.bf16.gmra.mrb[40].mxu0 %v9015_v49 }
 0x162   : > { %1890 = vmatprep.mubr.bf16.mxu0 %v8236_v43 }
 0x163   : > { %2713 = vmatpush1.bf16.msra.mxu1 %v7638_v60 }
 0x164   : > { %v6878_v51 = vpop.f32.mrb[48].mxu1  ;;  %2714 = vmatprep.subr.bf16.mxu1 %v7643_v0 }
 0x165   : > { %v6879_v49 = vpop.f32.mrb[49].mxu1 }
 0x166   : > { %v6880_v54 = vadd.f32 %v6879_v49, %v6878_v51  ;;  %v6881_v56 = vpop.f32.mrb[50].mxu1 }
 0x167   : > { %v6882_v61 = vpop.f32.mrb[51].mxu1  ;;  %2715 = vmatpush1.bf16.msra.mxu1 %v7641_v42 }
 0x168   : > { %v6883_v37 = vadd.f32 %v6882_v61, %v6881_v56  ;;  %v9197_v63 = vadd.f32 %v6880_v54, %v1936_v48  ;;  %2837 = vmatprep.subr.bf16.mxu1 %v7646_v50 }
 0x169   : > { %1891 = vmatmul.mubr.bf16.gmra.mrb[44].mxu0 %v9026_v57 }
 0x16a   : > { %v9202_v34 = vadd.f32 %v6883_v37, %v1939_v53  ;;  %v1968_v53 = vadd.f32 %v9053_v11, %v9174_v41  ;;  %v1979_v11 = vadd.f32 %v9068_v23, %v9174_v41 }
 0x16c   : > { %v6884_v4 = vpop.f32.mrb[52].mxu1 }
 0x16d   : > { %v6885_v57 = vpop.f32.mrb[53].mxu1 }
 0x16e   : > { %v6886_v8 = vadd.f32 %v6885_v57, %v6884_v4  ;;  %v6887_v9 = vpop.f32.mrb[54].mxu1 }
 0x16f   : > { %v6888_v10 = vpop.f32.mrb[55].mxu1 }
 0x170   : > { %v6889_v12 = vadd.f32 %v6888_v10, %v6887_v9  ;;  %v9211_v13 = vadd.f32 %v6886_v8, %v1944_v2  ;;  %v1976_v2 = vadd.f32 %v9065_v19, %v9174_v41  ;;  %v1987_v19 = vadd.f32 %v9080_v32, %v9174_v41 }
 0x172   : > { %v9213_v36 = vadd.f32 %v6889_v12, %v1947_v5 }
 0x174   : > { %v6890_v17 = vpop.f32.mrb[56].mxu1 }
 0x175   : > { %v6891_v18 = vpop.f32.mrb[57].mxu1 }
 0x176   : > { %v6892_v24 = vadd.f32 %v6891_v18, %v6890_v17  ;;  %v6893_v25 = vpop.f32.mrb[58].mxu1 }
 0x177   : > { %v6894_v29 = vpop.f32.mrb[59].mxu1 }
 0x178   : > { %v6895_v31 = vadd.f32 %v6894_v29, %v6893_v25  ;;  %v9222_v22 = vadd.f32 %v6892_v24, %v1952_v16  ;;  %v1984_v16 = vadd.f32 %v9077_v30, %v9174_v41  ;;  %v1995_v30 = vadd.f32 %v9092_v44, %v9174_v41 }
 0x17a   : > { %v9224_v35 = vadd.f32 %v6895_v31, %v1955_v55  ;;  %v1992_v31 = vadd.f32 %v9089_v40, %v9174_v41  ;;  %v2003_v40 = vadd.f32 %v9110_v58, %v9174_v41 }
 0x17c   : > { %v6896_v38 = vpop.f32.mrb[60].mxu1 }
 0x17d   : > { %v6897_v39 = vpop.f32.mrb[61].mxu1 }
 0x17e   : > { %v6898_v46 = vadd.f32 %v6897_v39, %v6896_v38  ;;  %v6899_v48 = vpop.f32.mrb[62].mxu1 }
 0x17f   : > { %v6900_v62 = vpop.f32.mrb[63].mxu1 }
 0x180   : > { %v6901_v51 = vadd.f32 %v6900_v62, %v6899_v48  ;;  %v9230_v49 = vadd.f32 %v6898_v46, %v1960_v59 }
 0x182   : > { %v9232_v28 = vadd.f32 %v6901_v51, %v1963_v45  ;;  %v2000_v51 = vadd.f32 %v9104_v52, %v9174_v41  ;;  %v2011_v52 = vadd.f32 %v9128_v7, %v9174_v41 }
 0x184   : > { %v6902_v54 = vpop.f32.mrb[64].mxu1 }
 0x185   : > { %v6903_v56 = vpop.f32.mrb[65].mxu1 }
 0x186   : > { %v6904_v60 = vadd.f32 %v6903_v56, %v6902_v54  ;;  %v6905_v61 = vpop.f32.mrb[66].mxu1 }
 0x187   : > { %v6906_v37 = vpop.f32.mrb[67].mxu1 }
 0x188   : > { %v6907_v6 = vadd.f32 %v6906_v37, %v6905_v61  ;;  %v9238_v0 = vadd.f32 %v6904_v60, %v1968_v53 }
 0x18a   : > { %v9240_v42 = vadd.f32 %v6907_v6, %v1971_v3  ;;  %v2008_v6 = vadd.f32 %v9122_v1, %v9174_v41  ;;  %v2019_v1 = vadd.f32 %v9148_v21, %v9174_v41 }
 0x18c   : > { %v6908_v4 = vpop.f32.mrb[68].mxu1 }
 0x18d   : > { %v6909_v57 = vpop.f32.mrb[69].mxu1 }
 0x18e   : > { %v6910_v5 = vadd.f32 %v6909_v57, %v6908_v4  ;;  %v6911_v8 = vpop.f32.mrb[70].mxu1 }
 0x18f   : > { %v6912_v9 = vpop.f32.mrb[71].mxu1 }
 0x190   : > { %v6913_v14 = vadd.f32 %v6912_v9, %v6911_v8  ;;  %v9246_v10 = vadd.f32 %v6910_v5, %v1976_v2 }
 0x192   : > { %v9248_v12 = vadd.f32 %v6913_v14, %v1979_v11  ;;  %v2016_v14 = vadd.f32 %v9140_v15, %v9174_v41  ;;  %v2027_v15 = vadd.f32 %v9177_v27, %v9174_v41 }
 0x194   : > { %v6914_v17 = vpop.f32.mrb[72].mxu1 }
 0x195   : > { %v6915_v50 = vpop.f32.mrb[73].mxu1 }
 0x196   : > { %v6916_v18 = vadd.f32 %v6915_v50, %v6914_v17  ;;  %v6917_v55 = vpop.f32.mrb[74].mxu1 }
 0x197   : > { %v6918_v24 = vpop.f32.mrb[75].mxu1 }
 0x198   : > { %v6919_v23 = vadd.f32 %v6918_v24, %v6917_v55  ;;  %v9254_v25 = vadd.f32 %v6916_v18, %v1984_v16 }
 0x19a   : > { %v9256_v29 = vadd.f32 %v6919_v23, %v1987_v19  ;;  %v2024_v23 = vadd.f32 %v9166_v33, %v9174_v41 }
 0x19c   : > { %v6920_v59 = vpop.f32.mrb[76].mxu1 }
 0x19d   : > { %v6921_v38 = vpop.f32.mrb[77].mxu1 }
 0x19e   : > { %v6922_v39 = vadd.f32 %v6921_v38, %v6920_v59  ;;  %v6923_v45 = vpop.f32.mrb[78].mxu1 }
 0x19f   : > { %v6924_v46 = vpop.f32.mrb[79].mxu1 }
 0x1a0   : > { %v6925_v32 = vadd.f32 %v6924_v46, %v6923_v45  ;;  %v9262_v48 = vadd.f32 %v6922_v39, %v1992_v31 }
 0x1a2   : > { %v9264_v62 = vadd.f32 %v6925_v32, %v1995_v30 }
 0x1a4   : > { %v6926_v53 = vpop.f32.mrb[80].mxu1 }
 0x1a5   : > { %v6927_v54 = vpop.f32.mrb[81].mxu1 }
 0x1a6   : > { %v6928_v56 = vadd.f32 %v6927_v54, %v6926_v53  ;;  %v6929_v3 = vpop.f32.mrb[82].mxu1 }
 0x1a7   : > { %v6930_v60 = vpop.f32.mrb[83].mxu1 }
 0x1a8   : > { %v6931_v44 = vadd.f32 %v6930_v60, %v6929_v3  ;;  %v9270_v61 = vadd.f32 %v6928_v56, %v2000_v51 }
 0x1aa   : > { %v9272_v37 = vadd.f32 %v6931_v44, %v2003_v40 }
 0x1ac   : > { %v6932_v2 = vpop.f32.mrb[84].mxu1 }
 0x1ad   : > { %v6933_v4 = vpop.f32.mrb[85].mxu1 }
 0x1ae   : > { %v6934_v57 = vadd.f32 %v6933_v4, %v6932_v2  ;;  %v6935_v11 = vpop.f32.mrb[86].mxu1 }
 0x1af   : > { %v6936_v5 = vpop.f32.mrb[87].mxu1 }
 0x1b0   : > { %v6937_v58 = vadd.f32 %v6936_v5, %v6935_v11  ;;  %v9278_v8 = vadd.f32 %v6934_v57, %v2008_v6 }
 0x1b2   : > { %v9280_v9 = vadd.f32 %v6937_v58, %v2011_v52 }
 0x1b4   : > { %v6938_v16 = vpop.f32.mrb[88].mxu1 }
 0x1b5   : > { %v6939_v17 = vpop.f32.mrb[89].mxu1 }
 0x1b6   : > { %v6940_v50 = vadd.f32 %v6939_v17, %v6938_v16  ;;  %v6941_v19 = vpop.f32.mrb[90].mxu1 }
 0x1b7   : > { %v6942_v18 = vpop.f32.mrb[91].mxu1 }
 0x1b8   : > { %v6943_v7 = vadd.f32 %v6942_v18, %v6941_v19  ;;  %v9286_v55 = vadd.f32 %v6940_v50, %v2016_v14 }
 0x1ba   : > { %v9288_v24 = vadd.f32 %v6943_v7, %v2019_v1 }
 0x1bc   : > { %v6944_v31 = vpop.f32.mrb[92].mxu1 }
 0x1bd   : > { %v6945_v59 = vpop.f32.mrb[93].mxu1 }
 0x1be   : > { %v6946_v38 = vadd.f32 %v6945_v59, %v6944_v31  ;;  %v6947_v30 = vpop.f32.mrb[94].mxu1 }
 0x1bf   : > { %v6948_v39 = vpop.f32.mrb[95].mxu1 }
 0x1c0   : > { %v6949_v21 = vadd.f32 %v6948_v39, %v6947_v30  ;;  %v9294_v45 = vadd.f32 %v6946_v38, %v2024_v23 }
 0x1c2   : > { %v9296_v46 = vadd.f32 %v6949_v21, %v2027_v15 }
 0x1c4   : > { %v7078_v32 = vpop.f32.mrb[96].mxu1 }
 0x1c5   : > { %v2202_v51 = vadd.f32 %v7078_v32, %v9211_v13  ;;  %v2193_v53 = vpop.f32.mrb[97].mxu1 }
 0x1c6   : > { %v2194_v54 = vadd.f32 %v2193_v53, %v9197_v63  ;;  %v7079_v33 = vpop.f32.mrb[98].mxu1 }
 0x1c7   : > { %v2205_v40 = vadd.f32 %v7079_v33, %v9213_v36  ;;  %v2196_v56 = vpop.f32.mrb[99].mxu1  ;;  %v2296_v27 = vmax.f32 %v2202_v51, 0.0 }
 0x1c8   : > { %v2197_v41 = vadd.f32 %v2196_v56, %v9202_v34  ;;  %v2290_v60 = vmax.f32 %v2194_v54, 0.0 }
 0x1c9   : > { %v2299_v3 = vmax.f32 %v2205_v40, 0.0 }
 0x1ca   : > { %v2293_v44 = vmax.f32 %v2197_v41, 0.0 }
 0x1cb   : > { %v9302_v6 = vpack.c.bf16 %v2299_v3, %v2296_v27 }
 0x1cc   : > { %v9304_v2 = vpack.c.bf16 %v2293_v44, %v2290_v60  ;;  %v7082_v4 = vpop.f32.mrb[100].mxu1 }
 0x1cd   : > { %v2218_v13 = vadd.f32 %v7082_v4, %v9230_v49  ;;  %v2209_v52 = vpop.f32.mrb[101].mxu1 }
 0x1ce   : > { %v2210_v63 = vadd.f32 %v2209_v52, %v9222_v22  ;;  %v7083_v57 = vpop.f32.mrb[102].mxu1 }
 0x1cf   : > { %v2221_v36 = vadd.f32 %v7083_v57, %v9232_v28  ;;  %v2212_v11 = vpop.f32.mrb[103].mxu1  ;;  %v2308_v5 = vmax.f32 %v2218_v13, 0.0 }
 0x1d0   : > { %v2213_v34 = vadd.f32 %v2212_v11, %v9224_v35  ;;  %v2302_v14 = vmax.f32 %v2210_v63, 0.0 }
 0x1d1   : > { %v2311_v58 = vmax.f32 %v2221_v36, 0.0 }
 0x1d2   : > { %v2305_v16 = vmax.f32 %v2213_v34, 0.0 }
 0x1d3   : > { %v9310_v17 = vpack.c.bf16 %v2311_v58, %v2308_v5 }
 0x1d4   : > { %v9312_v1 = vpack.c.bf16 %v2305_v16, %v2302_v14  ;;  %v7086_v50 = vpop.f32.mrb[104].mxu1 }
 0x1d5   : > { %v2234_v49 = vadd.f32 %v7086_v50, %v9246_v10  ;;  %v2225_v19 = vpop.f32.mrb[105].mxu1  ;;  %v9323_v10 = vsub.s32 0, %v9145_v20 }
 0x1d6   : > { %v2226_v22 = vadd.f32 %v2225_v19, %v9238_v0  ;;  %v7087_v18 = vpop.f32.mrb[106].mxu1 }
 0x1d7   : > { %v2237_v28 = vadd.f32 %v7087_v18, %v9248_v12  ;;  %v2228_v7 = vpop.f32.mrb[107].mxu1  ;;  %v2320_v23 = vmax.f32 %v2234_v49, 0.0  ;;  %v9327_v12 = vsub.s32 1, %v9145_v20  ;;  %v9334_v33 = vrot.slane %v9161_v47, %v9323_v10 }
 0x1d8   : > { %v2229_v35 = vadd.f32 %v2228_v7, %v9240_v42  ;;  %v2314_v59 = vmax.f32 %v2226_v22, 0.0 }
 0x1d9   : > { %v2323_v31 = vmax.f32 %v2237_v28, 0.0 }
 0x1da   : > { %v2317_v15 = vmax.f32 %v2229_v35, 0.0 }
 0x1db   : > { %v9318_v38 = vpack.c.bf16 %v2323_v31, %v2320_v23 }
 0x1dc   : > { %v9320_v30 = vpack.c.bf16 %v2317_v15, %v2314_v59  ;;  %v7090_v39 = vpop.f32.mrb[108].mxu1 }
 0x1dd   : > { %v2250_v0 = vadd.f32 %v7090_v39, %v9262_v48  ;;  %v2241_v21 = vpop.f32.mrb[109].mxu1  ;;  %v9338_v48 = vrot.slane %v9161_v47, %v9327_v12  ;;  %v7649_v39 = vld [vmem:[%s10726_s3 + $0x114] ss:$8 sps:$4 sm:$0xff]  }
 0x1de   : > { %v2242_v42 = vadd.f32 %v2241_v21, %v9254_v25  ;;  %v7091_v32 = vpop.f32.mrb[110].mxu1 }
 0x1df   : > { %v2253_v51 = vadd.f32 %v7091_v32, %v9264_v62  ;;  %v2244_v53 = vpop.f32.mrb[111].mxu1  ;;  %v2332_v40 = vmax.f32 %v2250_v0, 0.0 }
 0x1e0   : > { %v2245_v54 = vadd.f32 %v2244_v53, %v9256_v29  ;;  %v2326_v41 = vmax.f32 %v2242_v42, 0.0 }
 0x1e1   : > { %v2335_v56 = vmax.f32 %v2253_v51, 0.0 }
 0x1e2   : > { %v2329_v27 = vmax.f32 %v2245_v54, 0.0 }
 0x1e3   : > { %v9340_v3 = vpack.c.bf16 %v2335_v56, %v2332_v40 }
 0x1e4   : > { %v1782_v25 = vpop.f32.mrb[0].mxu0  ;;  %v9342_v60 = vpack.c.bf16 %v2329_v27, %v2326_v41  ;;  %v7094_v29 = vpop.f32.mrb[112].mxu1 }
 0x1e5   : > { %v7112_v62 = vadd.f32 %v1782_v25, %v9334_v33  ;;  %v1784_v44 = vpop.f32.mrb[1].mxu0  ;;  %v2266_v4 = vadd.f32 %v7094_v29, %v9278_v8  ;;  %v2257_v52 = vpop.f32.mrb[113].mxu1 }
 0x1e6   : > { %v7113_v13 = vadd.f32 %v1784_v44, %v9338_v48  ;;  %v1786_v63 = vpop.f32.mrb[2].mxu0  ;;  %v2258_v47 = vadd.f32 %v2257_v52, %v9270_v61  ;;  %v7095_v36 = vpop.f32.mrb[114].mxu1 }
 0x1e7   : > { %v7114_v57 = vadd.f32 %v1786_v63, %v9334_v33  ;;  %v1788_v11 = vpop.f32.mrb[3].mxu0  ;;  %v2269_v34 = vadd.f32 %v7095_v36, %v9280_v9  ;;  %v2260_v58 = vpop.f32.mrb[115].mxu1  ;;  %v2288_v14 = vmax.f32 %v7112_v62, 0.0  ;;  %v2344_v8 = vmax.f32 %v2266_v4, 0.0  ;;  %v7644_v9 = vld [vmem:[%s10726_s3 + $0x100] ss:$8 sps:$4 sm:$0xff]  }
 0x1e8   : > { %v7115_v5 = vadd.f32 %v1788_v11, %v9338_v48  ;;  %v2261_v50 = vadd.f32 %v2260_v58, %v9272_v37  ;;  %v2289_v49 = vmax.f32 %v7113_v13, 0.0  ;;  %v2338_v18 = vmax.f32 %v2258_v47, 0.0 }
 0x1e9   : > { %v2291_v16 = vmax.f32 %v7114_v57, 0.0  ;;  %v2347_v19 = vmax.f32 %v2269_v34, 0.0 }
 0x1ea   : > { %v2292_v22 = vmax.f32 %v7115_v5, 0.0  ;;  %v2341_v61 = vmax.f32 %v2261_v50, 0.0 }
 0x1eb   : > { %v2360_v28 = vpack.c.bf16 %v2291_v16, %v2288_v14  ;;  %v9352_v7 = vpack.c.bf16 %v2347_v19, %v2344_v8  ;;  %v7655_v14 = vld [vmem:[%s10726_s3 + $0x134] ss:$8 sps:$4 sm:$0xff]  }
 0x1ec   : > { %v2361_v35 = vpack.c.bf16 %v2292_v22, %v2289_v49  ;;  %v1792_v23 = vpop.f32.mrb[4].mxu0  ;;  %v9357_v31 = vpack.c.bf16 %v2341_v61, %v2338_v18  ;;  %v7098_v37 = vpop.f32.mrb[116].mxu1  ;;  %v7653_v22 = vld [vmem:[%s10726_s3 + $0x130] ss:$8 sps:$4 sm:$0xff]   ;;  %v7658_v61 = vld [vmem:[%s10726_s3 + $0x144] ss:$8 sps:$4 sm:$0xff]  }
 0x1ed   : > { %v7116_v59 = vadd.f32 %v1792_v23, %v9334_v33  ;;  %v1794_v15 = vpop.f32.mrb[5].mxu0  ;;  %v2282_v0 = vadd.f32 %v7098_v37, %v9294_v45  ;;  %v2273_v42 = vpop.f32.mrb[117].mxu1  ;;  %v7647_v45 = vld [vmem:[%s10726_s3 + $0x110] ss:$8 sps:$4 sm:$0xff]  }
 0x1ee   : > { %v7117_v21 = vadd.f32 %v1794_v15, %v9338_v48  ;;  %v1796_v32 = vpop.f32.mrb[6].mxu0  ;;  %2716 = vmatprep.mubr.bf16.mxu1 %v2361_v35  ;;  %v2274_v51 = vadd.f32 %v2273_v42, %v9286_v55  ;;  %v7099_v54 = vpop.f32.mrb[118].mxu1  ;;  %v7652_v55 = vld [vmem:[%s10726_s3 + $0x124] ss:$8 sps:$4 sm:$0xff]   ;;  %v7656_v15 = vld [vmem:[%s10726_s3 + $0x140] ss:$8 sps:$4 sm:$0xff]  }
 0x1ef   : > { %v7118_v53 = vadd.f32 %v1796_v32, %v9334_v33  ;;  %v1798_v40 = vpop.f32.mrb[7].mxu0  ;;  %2717 = vmatmul.mubr.bf16.vlgmr.msra.gmra.mrb[120].mxu1 %v2360_v28  ;;  %v2285_v56 = vadd.f32 %v7099_v54, %v9296_v46  ;;  %v2276_v27 = vpop.f32.mrb[119].mxu1  ;;  %v2294_v25 = vmax.f32 %v7116_v59, 0.0  ;;  %v2356_v44 = vmax.f32 %v2282_v0, 0.0 }
 0x1f0   : > { %v7119_v41 = vadd.f32 %v1798_v40, %v9338_v48  ;;  %2838 = vmatpush1.bf16.msra.mxu1 %v7644_v9  ;;  %v2277_v29 = vadd.f32 %v2276_v27, %v9288_v24  ;;  %v2295_v4 = vmax.f32 %v7117_v21, 0.0  ;;  %v2350_v52 = vmax.f32 %v2274_v51, 0.0  ;;  %v7650_v24 = vld [vmem:[%s10726_s3 + $0x120] ss:$8 sps:$4 sm:$0xff]   ;;  %v7661_v21 = vld [vmem:[%s10726_s3 + $0x154] ss:$8 sps:$4 sm:$0xff]  }
 0x1f1   : > { %v2297_v62 = vmax.f32 %v7118_v53, 0.0  ;;  %2839 = vmatprep.subr.bf16.mxu1 %v7649_v39  ;;  %v2359_v46 = vmax.f32 %v2285_v56, 0.0  ;;  %v7659_v40 = vld [vmem:[%s10726_s3 + $0x150] ss:$8 sps:$4 sm:$0xff]   ;;  %v7664_v27 = vld [vmem:[%s10726_s3 + $0x164] ss:$8 sps:$4 sm:$0xff]  }
 0x1f2   : > { %v2298_v13 = vmax.f32 %v7119_v41, 0.0  ;;  %v2353_v47 = vmax.f32 %v2277_v29, 0.0 }
 0x1f3   : > { %v2363_v63 = vpack.c.bf16 %v2297_v62, %v2294_v25  ;;  %v9376_v57 = vpack.c.bf16 %v2359_v46, %v2356_v44  ;;  %v7662_v44 = vld [vmem:[%s10726_s3 + $0x160] ss:$8 sps:$4 sm:$0xff]  }
 0x1f4   : > { %v2364_v36 = vpack.c.bf16 %v2298_v13, %v2295_v4  ;;  %v1802_v11 = vpop.f32.mrb[8].mxu0  ;;  %2840 = vmatpush1.bf16.msra.mxu1 %v7647_v45  ;;  %v9381_v34 = vpack.c.bf16 %v2353_v47, %v2350_v52  ;;  %v7667_v13 = vld [vmem:[%s10726_s3 + $0x174] ss:$8 sps:$4 sm:$0xff]  }
 0x1f5   : > { %v7120_v5 = vadd.f32 %v1802_v11, %v9334_v33  ;;  %v1804_v58 = vpop.f32.mrb[9].mxu0  ;;  %2841 = vmatprep.subr.bf16.mxu1 %v7652_v55 }
 0x1f6   : > { %v7121_v16 = vadd.f32 %v1804_v58, %v9338_v48  ;;  %v1806_v50 = vpop.f32.mrb[10].mxu0  ;;  %2726 = vmatprep.mubr.bf16.mxu1 %v2364_v36 }
 0x1f7   : > { %v7122_v8 = vadd.f32 %v1806_v50, %v9334_v33  ;;  %v1808_v49 = vpop.f32.mrb[11].mxu0  ;;  %2727 = vmatmul.mubr.bf16.gmra.mrb[124].mxu1 %v2363_v63  ;;  %v2300_v18 = vmax.f32 %v7120_v5, 0.0 }
 0x1f8   : > { %v7123_v19 = vadd.f32 %v1808_v49, %v9338_v48  ;;  %2842 = vmatpush1.bf16.msra.mxu1 %v7650_v24  ;;  %v2301_v35 = vmax.f32 %v7121_v16, 0.0  ;;  %v7665_v24 = vld [vmem:[%s10726_s3 + $0x170] ss:$8 sps:$4 sm:$0xff]  }
 0x1f9   : > { %v2303_v28 = vmax.f32 %v7122_v8, 0.0  ;;  %2843 = vmatprep.subr.bf16.mxu1 %v7655_v14 }
 0x1fa   : > { %v2304_v23 = vmax.f32 %v7123_v19, 0.0 }
 0x1fb   : > { %v2366_v9 = vpack.c.bf16 %v2303_v28, %v2300_v18 }
 0x1fc   : > { %v2367_v59 = vpack.c.bf16 %v2304_v23, %v2301_v35  ;;  %v1812_v37 = vpop.f32.mrb[12].mxu0  ;;  %2844 = vmatpush1.bf16.msra.mxu1 %v7653_v22 }
 0x1fd   : > { %v7124_v39 = vadd.f32 %v1812_v37, %v9334_v33  ;;  %v1814_v0 = vpop.f32.mrb[13].mxu0  ;;  %2845 = vmatprep.subr.bf16.mxu1 %v7658_v61 }
 0x1fe   : > { %v7125_v42 = vadd.f32 %v1814_v0, %v9338_v48  ;;  %v1816_v32 = vpop.f32.mrb[14].mxu0  ;;  %2736 = vmatprep.mubr.bf16.mxu1 %v2367_v59 }
 0x1ff   : > { %v7126_v51 = vadd.f32 %v1816_v32, %v9334_v33  ;;  %v1818_v53 = vpop.f32.mrb[15].mxu0  ;;  %2737 = vmatmul.mubr.bf16.gmra.mrb[128].mxu1 %v2366_v9  ;;  %v2306_v56 = vmax.f32 %v7124_v39, 0.0 }
 0x200   : > { %v7127_v54 = vadd.f32 %v1818_v53, %v9338_v48  ;;  %2846 = vmatpush1.bf16.msra.mxu1 %v7656_v15  ;;  %v2307_v45 = vmax.f32 %v7125_v42, 0.0 }
 0x201   : > { %v2309_v41 = vmax.f32 %v7126_v51, 0.0  ;;  %2847 = vmatprep.subr.bf16.mxu1 %v7661_v21 }
 0x202   : > { %v2310_v25 = vmax.f32 %v7127_v54, 0.0 }
 0x203   : > { %v2369_v62 = vpack.c.bf16 %v2309_v41, %v2306_v56 }
 0x204   : > { %v2370_v29 = vpack.c.bf16 %v2310_v25, %v2307_v45  ;;  %v1822_v55 = vpop.f32.mrb[16].mxu0  ;;  %2848 = vmatpush1.bf16.msra.mxu1 %v7659_v40 }
 0x205   : > { %v7128_v4 = vadd.f32 %v1822_v55, %v9334_v33  ;;  %v1824_v46 = vpop.f32.mrb[17].mxu0  ;;  %2849 = vmatprep.subr.bf16.mxu1 %v7664_v27 }
 0x206   : > { %v7129_v52 = vadd.f32 %v1824_v46, %v9338_v48  ;;  %v1826_v63 = vpop.f32.mrb[18].mxu0  ;;  %2746 = vmatprep.mubr.bf16.mxu1 %v2370_v29 }
 0x207   : > { %v7130_v47 = vadd.f32 %v1826_v63, %v9334_v33  ;;  %v1828_v36 = vpop.f32.mrb[19].mxu0  ;;  %2747 = vmatmul.mubr.bf16.gmra.mrb[132].mxu1 %v2369_v62  ;;  %v2312_v5 = vmax.f32 %v7128_v4, 0.0 }
 0x208   : > { %v7131_v11 = vadd.f32 %v1828_v36, %v9338_v48  ;;  %2850 = vmatpush1.bf16.msra.mxu1 %v7662_v44  ;;  %v2313_v14 = vmax.f32 %v7129_v52, 0.0 }
 0x209   : > { %v2315_v58 = vmax.f32 %v7130_v47, 0.0  ;;  %2851 = vmatprep.subr.bf16.mxu1 %v7667_v13 }
 0x20a   : > { %v2316_v16 = vmax.f32 %v7131_v11, 0.0 }
 0x20b   : > { %v2372_v50 = vpack.c.bf16 %v2315_v58, %v2312_v5 }
 0x20c   : > { %v2373_v8 = vpack.c.bf16 %v2316_v16, %v2313_v14  ;;  %v1832_v49 = vpop.f32.mrb[20].mxu0  ;;  %2852 = vmatpush1.bf16.msra.mxu1 %v7665_v24 }
 0x20d   : > { %v7132_v19 = vadd.f32 %v1832_v49, %v9334_v33  ;;  %v1834_v22 = vpop.f32.mrb[21].mxu0 }
 0x20e   : > { %v7133_v18 = vadd.f32 %v1834_v22, %v9338_v48  ;;  %v1836_v28 = vpop.f32.mrb[22].mxu0  ;;  %2756 = vmatprep.mubr.bf16.mxu1 %v2373_v8 }
 0x20f   : > { %v7134_v61 = vadd.f32 %v1836_v28, %v9334_v33  ;;  %v1838_v35 = vpop.f32.mrb[23].mxu0  ;;  %2757 = vmatmul.mubr.bf16.gmra.mrb[136].mxu1 %v2372_v50  ;;  %v2318_v9 = vmax.f32 %v7132_v19, 0.0 }
 0x210   : > { %v7135_v23 = vadd.f32 %v1838_v35, %v9338_v48  ;;  %v2319_v37 = vmax.f32 %v7133_v18, 0.0 }
 0x211   : > { %v2321_v59 = vmax.f32 %v7134_v61, 0.0 }
 0x212   : > { %v2322_v15 = vmax.f32 %v7135_v23, 0.0 }
 0x213   : > { %v2375_v39 = vpack.c.bf16 %v2321_v59, %v2318_v9 }
 0x214   : > { %v2376_v0 = vpack.c.bf16 %v2322_v15, %v2319_v37  ;;  %v1842_v21 = vpop.f32.mrb[24].mxu0 }
 0x215   : > { %v7136_v42 = vadd.f32 %v1842_v21, %v9334_v33  ;;  %v1844_v32 = vpop.f32.mrb[25].mxu0 }
 0x216   : > { %v7137_v51 = vadd.f32 %v1844_v32, %v9338_v48  ;;  %v1846_v53 = vpop.f32.mrb[26].mxu0  ;;  %2766 = vmatprep.mubr.bf16.mxu1 %v2376_v0 }
 0x217   : > { %v7138_v54 = vadd.f32 %v1846_v53, %v9334_v33  ;;  %v1848_v40 = vpop.f32.mrb[27].mxu0  ;;  %2767 = vmatmul.mubr.bf16.gmra.mrb[140].mxu1 %v2375_v39  ;;  %v2324_v41 = vmax.f32 %v7136_v42, 0.0 }
 0x218   : > { %v7139_v56 = vadd.f32 %v1848_v40, %v9338_v48  ;;  %v2325_v45 = vmax.f32 %v7137_v51, 0.0 }
 0x219   : > { %v2327_v27 = vmax.f32 %v7138_v54, 0.0 }
 0x21a   : > { %v2328_v25 = vmax.f32 %v7139_v56, 0.0 }
 0x21b   : > { %v2378_v62 = vpack.c.bf16 %v2327_v27, %v2324_v41 }
 0x21c   : > { %v2379_v29 = vpack.c.bf16 %v2328_v25, %v2325_v45  ;;  %v1852_v55 = vpop.f32.mrb[28].mxu0 }
 0x21d   : > { %v7140_v44 = vadd.f32 %v1852_v55, %v9334_v33  ;;  %v1854_v4 = vpop.f32.mrb[29].mxu0 }
 0x21e   : > { %v7141_v46 = vadd.f32 %v1854_v4, %v9338_v48  ;;  %v1856_v13 = vpop.f32.mrb[30].mxu0  ;;  %2776 = vmatprep.mubr.bf16.mxu1 %v2379_v29 }
 0x21f   : > { %v7142_v52 = vadd.f32 %v1856_v13, %v9334_v33  ;;  %v1858_v63 = vpop.f32.mrb[31].mxu0  ;;  %2777 = vmatmul.mubr.bf16.gmra.mrb[144].mxu1 %v2378_v62  ;;  %v2330_v36 = vmax.f32 %v7140_v44, 0.0 }
 0x220   : > { %v7143_v47 = vadd.f32 %v1858_v63, %v9338_v48  ;;  %v2331_v24 = vmax.f32 %v7141_v46, 0.0 }
 0x221   : > { %v2333_v11 = vmax.f32 %v7142_v52, 0.0 }
 0x222   : > { %v2334_v5 = vmax.f32 %v7143_v47, 0.0 }
 0x223   : > { %v2381_v58 = vpack.c.bf16 %v2333_v11, %v2330_v36 }
 0x224   : > { %v2382_v14 = vpack.c.bf16 %v2334_v5, %v2331_v24  ;;  %v1862_v16 = vpop.f32.mrb[32].mxu0 }
 0x225   : > { %v7144_v50 = vadd.f32 %v1862_v16, %v9334_v33  ;;  %v1864_v8 = vpop.f32.mrb[33].mxu0 }
 0x226   : > { %v7145_v49 = vadd.f32 %v1864_v8, %v9338_v48  ;;  %v1866_v19 = vpop.f32.mrb[34].mxu0  ;;  %2786 = vmatprep.mubr.bf16.mxu1 %v2382_v14 }
 0x227   : > { %v7146_v22 = vadd.f32 %v1866_v19, %v9334_v33  ;;  %v1868_v18 = vpop.f32.mrb[35].mxu0  ;;  %2787 = vmatmul.mubr.bf16.gmra.mrb[148].mxu1 %v2381_v58  ;;  %v2336_v61 = vmax.f32 %v7144_v50, 0.0 }
 0x228   : > { %v7147_v28 = vadd.f32 %v1868_v18, %v9338_v48  ;;  %v2337_v23 = vmax.f32 %v7145_v49, 0.0 }
 0x229   : > { %v2339_v35 = vmax.f32 %v7146_v22, 0.0 }
 0x22a   : > { %v2340_v9 = vmax.f32 %v7147_v28, 0.0 }
 0x22b   : > { %v2384_v59 = vpack.c.bf16 %v2339_v35, %v2336_v61 }
 0x22c   : > { %v2385_v37 = vpack.c.bf16 %v2340_v9, %v2337_v23  ;;  %v1872_v15 = vpop.f32.mrb[36].mxu0 }
 0x22d   : > { %v7148_v39 = vadd.f32 %v1872_v15, %v9334_v33  ;;  %v1874_v0 = vpop.f32.mrb[37].mxu0 }
 0x22e   : > { %v7149_v21 = vadd.f32 %v1874_v0, %v9338_v48  ;;  %v1876_v42 = vpop.f32.mrb[38].mxu0  ;;  %2796 = vmatprep.mubr.bf16.mxu1 %v2385_v37 }
 0x22f   : > { %v7150_v32 = vadd.f32 %v1876_v42, %v9334_v33  ;;  %v1878_v51 = vpop.f32.mrb[39].mxu0  ;;  %2797 = vmatmul.mubr.bf16.gmra.mrb[152].mxu1 %v2384_v59  ;;  %v2342_v54 = vmax.f32 %v7148_v39, 0.0 }
 0x230   : > { %v7151_v53 = vadd.f32 %v1878_v51, %v9338_v48  ;;  %v2343_v56 = vmax.f32 %v7149_v21, 0.0 }
 0x231   : > { %v2345_v40 = vmax.f32 %v7150_v32, 0.0 }
 0x232   : > { %v2346_v41 = vmax.f32 %v7151_v53, 0.0 }
 0x233   : > { %v2387_v27 = vpack.c.bf16 %v2345_v40, %v2342_v54 }
 0x234   : > { %v2388_v45 = vpack.c.bf16 %v2346_v41, %v2343_v56  ;;  %v1882_v25 = vpop.f32.mrb[40].mxu0 }
 0x235   : > { %v7152_v62 = vadd.f32 %v1882_v25, %v9334_v33  ;;  %v1884_v29 = vpop.f32.mrb[41].mxu0 }
 0x236   : > { %v7153_v55 = vadd.f32 %v1884_v29, %v9338_v48  ;;  %v1886_v44 = vpop.f32.mrb[42].mxu0  ;;  %2806 = vmatprep.mubr.bf16.mxu1 %v2388_v45 }
 0x237   : > { %v7154_v4 = vadd.f32 %v1886_v44, %v9334_v33  ;;  %v1888_v46 = vpop.f32.mrb[43].mxu0  ;;  %2807 = vmatmul.mubr.bf16.gmra.mrb[156].mxu1 %v2387_v27  ;;  %v2348_v52 = vmax.f32 %v7152_v62, 0.0 }
 0x238   : > { %v7155_v13 = vadd.f32 %v1888_v46, %v9338_v48  ;;  %v2349_v47 = vmax.f32 %v7153_v55, 0.0 }
 0x239   : > { %v2351_v63 = vmax.f32 %v7154_v4, 0.0 }
 0x23a   : > { %v2352_v36 = vmax.f32 %v7155_v13, 0.0 }
 0x23b   : > { %v2390_v11 = vpack.c.bf16 %v2351_v63, %v2348_v52 }
 0x23c   : > { %v2391_v24 = vpack.c.bf16 %v2352_v36, %v2349_v47  ;;  %v1892_v5 = vpop.f32.mrb[44].mxu0 }
 0x23d   : > { %v7156_v58 = vadd.f32 %v1892_v5, %v9334_v33  ;;  %v1894_v14 = vpop.f32.mrb[45].mxu0 }
 0x23e   : > { %v7157_v16 = vadd.f32 %v1894_v14, %v9338_v48  ;;  %v1896_v50 = vpop.f32.mrb[46].mxu0  ;;  %2816 = vmatprep.mubr.bf16.mxu1 %v2391_v24 }
 0x23f   : > { %v7158_v8 = vadd.f32 %v1896_v50, %v9334_v33  ;;  %v1898_v49 = vpop.f32.mrb[47].mxu0  ;;  %2817 = vmatmul.mubr.bf16.gmra.mrb[160].mxu1 %v2390_v11  ;;  %v2354_v22 = vmax.f32 %v7156_v58, 0.0 }
 0x240   : > { %v7159_v19 = vadd.f32 %v1898_v49, %v9338_v48  ;;  %v2355_v28 = vmax.f32 %v7157_v16, 0.0 }
 0x241   : > { %v2357_v18 = vmax.f32 %v7158_v8, 0.0 }
 0x242   : > { %v2358_v61 = vmax.f32 %v7159_v19, 0.0 }
 0x243   : > { %v2393_v35 = vpack.c.bf16 %v2357_v18, %v2354_v22 }
 0x244   : > { %v2394_v23 = vpack.c.bf16 %v2358_v61, %v2355_v28 }
 0x246   : > { %2826 = vmatprep.mubr.bf16.mxu1 %v2394_v23 }
 0x247   : > { %2827 = vmatmul.mubr.bf16.gmra.mrb[164].mxu1 %v2393_v35 }
 0x248   : > { %2869 = vmatprep.mubr.bf16.mxu1 %v8236_v43 }
 0x24f   : > { %2870 = vmatmul.mubr.bf16.vlgmr.msra.gmra.mrb[120].mxu1 %v9304_v2 }
 0x250   : > { %2879 = vmatprep.mubr.bf16.mxu1 %v8236_v43 }
 0x257   : > { %2880 = vmatmul.mubr.bf16.gmra.mrb[124].mxu1 %v9302_v6  ;;  %v7670_v6 = vld [vmem:[%s10727_s4 + $0x4] ss:$8 sps:$4 sm:$0xff]  }
 0x258   : > { %2889 = vmatprep.mubr.bf16.mxu1 %v8236_v43  ;;  %6422 = vmatprep.mubr.msk.bf16.mxu0 %vm3080_vm0, %v7670_v6 }
 0x25f   : > { %2890 = vmatmul.mubr.bf16.gmra.mrb[128].mxu1 %v9312_v1 }
 0x260   : > { %2899 = vmatprep.mubr.bf16.mxu1 %v8236_v43 }
 0x267   : > { %2900 = vmatmul.mubr.bf16.gmra.mrb[132].mxu1 %v9310_v17 }
 0x268   : > { %2909 = vmatprep.mubr.bf16.mxu1 %v8236_v43 }
 0x26f   : > { %2910 = vmatmul.mubr.bf16.gmra.mrb[136].mxu1 %v9320_v30 }
 0x270   : > { %2919 = vmatprep.mubr.bf16.mxu1 %v8236_v43 }
 0x277   : > { %2920 = vmatmul.mubr.bf16.gmra.mrb[140].mxu1 %v9318_v38 }
 0x278   : > { %2929 = vmatprep.mubr.bf16.mxu1 %v8236_v43 }
 0x27f   : > { %2930 = vmatmul.mubr.bf16.gmra.mrb[144].mxu1 %v9342_v60 }
 0x280   : > { %2939 = vmatprep.mubr.bf16.mxu1 %v8236_v43 }
 0x287   : > { %2940 = vmatmul.mubr.bf16.gmra.mrb[148].mxu1 %v9340_v3 }
 0x288   : > { %2949 = vmatprep.mubr.bf16.mxu1 %v8236_v43 }
 0x28f   : > { %2950 = vmatmul.mubr.bf16.gmra.mrb[152].mxu1 %v9357_v31 }
 0x290   : > { %2959 = vmatprep.mubr.bf16.mxu1 %v8236_v43 }
 0x297   : > { %2960 = vmatmul.mubr.bf16.gmra.mrb[156].mxu1 %v9352_v7 }
 0x298   : > { %2969 = vmatprep.mubr.bf16.mxu1 %v8236_v43 }
 0x29f   : > { %2970 = vmatmul.mubr.bf16.gmra.mrb[160].mxu1 %v9381_v34 }
 0x2a0   : > { %2979 = vmatprep.mubr.bf16.mxu1 %v8236_v43 }
 0x2a7   : > { %2980 = vmatmul.mubr.bf16.gmra.mrb[164].mxu1 %v9376_v57 }
 0x322   : > { %v2871_v2 = vpop.f32.mrb[120].mxu1 }
 0x323   : > { %v2873_v17 = vpop.f32.mrb[121].mxu1 }
 0x324   : > { %v2875_v1 = vpop.f32.mrb[122].mxu1 }
 0x325   : > { %v3002_v38 = vpack.c.bf16 %v2875_v1, %v2871_v2  ;;  %v2877_v30 = vpop.f32.mrb[123].mxu1 }
 0x326   : > { %v3003_v33 = vpack.c.bf16 %v2877_v30, %v2873_v17 }
 0x328   : > { %3099 = vmatprep.subr.bf16.mxu0 %v3003_v33 }
 0x329   : > { %3100 = vmatpush1.bf16.msra.mxu0 %v3002_v38 }
 0x32a   : > { %v2881_v48 = vpop.f32.mrb[124].mxu1 }
 0x32b   : > { %v2883_v3 = vpop.f32.mrb[125].mxu1 }
 0x32c   : > { %v2885_v43 = vpop.f32.mrb[126].mxu1 }
 0x32d   : > { %v3004_v60 = vpack.c.bf16 %v2885_v43, %v2881_v48  ;;  %v2887_v7 = vpop.f32.mrb[127].mxu1 }
 0x32e   : > { %v3005_v31 = vpack.c.bf16 %v2887_v7, %v2883_v3 }
 0x330   : > { %3101 = vmatprep.subr.bf16.mxu0 %v3005_v31 }
 0x331   : > { %3102 = vmatpush1.bf16.msra.mxu0 %v3004_v60 }
 0x332   : > { %v2891_v57 = vpop.f32.mrb[128].mxu1 }
 0x333   : > { %v2893_v34 = vpop.f32.mrb[129].mxu1 }
 0x334   : > { %v2895_v9 = vpop.f32.mrb[130].mxu1 }
 0x335   : > { %v3006_v59 = vpack.c.bf16 %v2895_v9, %v2891_v57  ;;  %v2897_v37 = vpop.f32.mrb[131].mxu1  ;;  %v7688_v57 = vld [vmem:[%s10728_s5 + $0x4] ss:$8 sps:$4 sm:$0xff]   ;;  %v7671_v9 = vld [vmem:[%s10727_s4 + $0x14] ss:$8 sps:$4 sm:$0xff]  }
 0x336   : > { %v3007_v15 = vpack.c.bf16 %v2897_v37, %v2893_v34  ;;  %v7668_v34 = vld [vmem:[%s10727_s4] ss:$8 sps:$4 sm:$0xff]   ;;  %v7691_v37 = vld [vmem:[%s10728_s5 + $0x14] ss:$8 sps:$4 sm:$0xff]  }
 0x338   : > { %3103 = vmatprep.subr.bf16.mxu0 %v3007_v15  ;;  %v7689_v15 = vld [vmem:[%s10728_s5 + $0x10] ss:$8 sps:$4 sm:$0xff]  }
 0x339   : > { %3104 = vmatpush1.bf16.msra.mxu0 %v3006_v59  ;;  %v7686_v59 = vld [vmem:[%s10728_s5] ss:$8 sps:$4 sm:$0xff]  }
 0x33a   : > { %v2901_v39 = vpop.f32.mrb[132].mxu1 }
 0x33b   : > { %v2903_v0 = vpop.f32.mrb[133].mxu1 }
 0x33c   : > { %v2905_v21 = vpop.f32.mrb[134].mxu1 }
 0x33d   : > { %v3008_v42 = vpack.c.bf16 %v2905_v21, %v2901_v39  ;;  %v2907_v32 = vpop.f32.mrb[135].mxu1  ;;  %v7694_v39 = vld [vmem:[%s10728_s5 + $0x24] ss:$8 sps:$4 sm:$0xff]  }
 0x33e   : > { %v3009_v51 = vpack.c.bf16 %v2907_v32, %v2903_v0  ;;  %v7673_v0 = vld [vmem:[%s10727_s4 + $0x10] ss:$8 sps:$4 sm:$0xff]   ;;  %v7674_v21 = vld [vmem:[%s10727_s4 + $0x24] ss:$8 sps:$4 sm:$0xff]   ;;  %v7697_v32 = vld [vmem:[%s10728_s5 + $0x34] ss:$8 sps:$4 sm:$0xff]  }
 0x340   : > { %3105 = vmatprep.subr.bf16.mxu0 %v3009_v51  ;;  %v7695_v51 = vld [vmem:[%s10728_s5 + $0x30] ss:$8 sps:$4 sm:$0xff]  }
 0x341   : > { %3106 = vmatpush1.bf16.msra.mxu0 %v3008_v42  ;;  %v7692_v42 = vld [vmem:[%s10728_s5 + $0x20] ss:$8 sps:$4 sm:$0xff]  }
 0x342   : > { %v2911_v53 = vpop.f32.mrb[136].mxu1 }
 0x343   : > { %v2913_v54 = vpop.f32.mrb[137].mxu1 }
 0x344   : > { %v2915_v40 = vpop.f32.mrb[138].mxu1 }
 0x345   : > { %v3010_v56 = vpack.c.bf16 %v2915_v40, %v2911_v53  ;;  %v2917_v41 = vpop.f32.mrb[139].mxu1  ;;  %v7700_v53 = vld [vmem:[%s10728_s5 + $0x44] ss:$8 sps:$4 sm:$0xff]   ;;  %v7677_v40 = vld [vmem:[%s10727_s4 + $0x34] ss:$8 sps:$4 sm:$0xff]  }
 0x346   : > { %v3011_v27 = vpack.c.bf16 %v2917_v41, %v2913_v54  ;;  %v7676_v54 = vld [vmem:[%s10727_s4 + $0x20] ss:$8 sps:$4 sm:$0xff]   ;;  %v7703_v41 = vld [vmem:[%s10728_s5 + $0x54] ss:$8 sps:$4 sm:$0xff]  }
 0x348   : > { %3107 = vmatprep.subr.bf16.mxu0 %v3011_v27  ;;  %v7701_v27 = vld [vmem:[%s10728_s5 + $0x50] ss:$8 sps:$4 sm:$0xff]  }
 0x349   : > { %3108 = vmatpush1.bf16.msra.mxu0 %v3010_v56  ;;  %v7698_v56 = vld [vmem:[%s10728_s5 + $0x40] ss:$8 sps:$4 sm:$0xff]  }
 0x34a   : > { %v2921_v45 = vpop.f32.mrb[140].mxu1 }
 0x34b   : > { %v2923_v25 = vpop.f32.mrb[141].mxu1 }
 0x34c   : > { %v2925_v62 = vpop.f32.mrb[142].mxu1 }
 0x34d   : > { %v3012_v29 = vpack.c.bf16 %v2925_v62, %v2921_v45  ;;  %v2927_v55 = vpop.f32.mrb[143].mxu1  ;;  %v7706_v45 = vld [vmem:[%s10728_s5 + $0x64] ss:$8 sps:$4 sm:$0xff]  }
 0x34e   : > { %v3013_v44 = vpack.c.bf16 %v2927_v55, %v2923_v25  ;;  %v7679_v25 = vld [vmem:[%s10727_s4 + $0x30] ss:$8 sps:$4 sm:$0xff]   ;;  %v7680_v62 = vld [vmem:[%s10727_s4 + $0x44] ss:$8 sps:$4 sm:$0xff]   ;;  %v7709_v55 = vld [vmem:[%s10728_s5 + $0x74] ss:$8 sps:$4 sm:$0xff]  }
 0x350   : > { %3109 = vmatprep.subr.bf16.mxu0 %v3013_v44  ;;  %v7707_v44 = vld [vmem:[%s10728_s5 + $0x70] ss:$8 sps:$4 sm:$0xff]  }
 0x351   : > { %3110 = vmatpush1.bf16.msra.mxu0 %v3012_v29  ;;  %v7704_v29 = vld [vmem:[%s10728_s5 + $0x60] ss:$8 sps:$4 sm:$0xff]  }
 0x352   : > { %v2931_v4 = vpop.f32.mrb[144].mxu1 }
 0x353   : > { %v2933_v46 = vpop.f32.mrb[145].mxu1 }
 0x354   : > { %v2935_v13 = vpop.f32.mrb[146].mxu1 }
 0x355   : > { %v3014_v52 = vpack.c.bf16 %v2935_v13, %v2931_v4  ;;  %v2937_v63 = vpop.f32.mrb[147].mxu1  ;;  %v7712_v4 = vld [vmem:[%s10728_s5 + $0x84] ss:$8 sps:$4 sm:$0xff]   ;;  %v7683_v13 = vld [vmem:[%s10727_s4 + $0x54] ss:$8 sps:$4 sm:$0xff]  }
 0x356   : > { %v3015_v47 = vpack.c.bf16 %v2937_v63, %v2933_v46  ;;  %v7682_v46 = vld [vmem:[%s10727_s4 + $0x40] ss:$8 sps:$4 sm:$0xff]   ;;  %v7715_v63 = vld [vmem:[%s10728_s5 + $0x94] ss:$8 sps:$4 sm:$0xff]  }
 0x358   : > { %3111 = vmatprep.subr.bf16.mxu0 %v3015_v47  ;;  %v7713_v47 = vld [vmem:[%s10728_s5 + $0x90] ss:$8 sps:$4 sm:$0xff]  }
 0x359   : > { %3112 = vmatpush1.bf16.msra.mxu0 %v3014_v52  ;;  %v7710_v52 = vld [vmem:[%s10728_s5 + $0x80] ss:$8 sps:$4 sm:$0xff]  }
 0x35a   : > { %v2941_v36 = vpop.f32.mrb[148].mxu1 }
 0x35b   : > { %v2943_v11 = vpop.f32.mrb[149].mxu1 }
 0x35c   : > { %v2945_v24 = vpop.f32.mrb[150].mxu1 }
 0x35d   : > { %v3016_v5 = vpack.c.bf16 %v2945_v24, %v2941_v36  ;;  %v2947_v58 = vpop.f32.mrb[151].mxu1  ;;  %v7718_v36 = vld [vmem:[%s10728_s5 + $0xa4] ss:$8 sps:$4 sm:$0xff]   ;;  %v7716_v24 = vld [vmem:[%s10728_s5 + $0xa0] ss:$8 sps:$4 sm:$0xff]  }
 0x35e   : > { %v3017_v14 = vpack.c.bf16 %v2947_v58, %v2943_v11  ;;  %v7685_v11 = vld [vmem:[%s10727_s4 + $0x50] ss:$8 sps:$4 sm:$0xff]  }
 0x35f   : > { %v7719_v58 = vld [vmem:[%s10728_s5 + $0xb0] ss:$8 sps:$4 sm:$0xff]  }
 0x360   : > { %3113 = vmatprep.subr.bf16.mxu0 %v3017_v14  ;;  %v7724_v14 = vld [vmem:[%s10728_s5 + $0xc4] ss:$8 sps:$4 sm:$0xff]  }
 0x361   : > { %3114 = vmatpush1.bf16.msra.mxu0 %v3016_v5  ;;  %v7721_v5 = vld [vmem:[%s10728_s5 + $0xb4] ss:$8 sps:$4 sm:$0xff]  }
 0x362   : > { %v2951_v16 = vpop.f32.mrb[152].mxu1 }
 0x363   : > { %v2953_v50 = vpop.f32.mrb[153].mxu1 }
 0x364   : > { %v2955_v8 = vpop.f32.mrb[154].mxu1 }
 0x365   : > { %v3018_v49 = vpack.c.bf16 %v2955_v8, %v2951_v16  ;;  %v2957_v19 = vpop.f32.mrb[155].mxu1  ;;  %v7722_v16 = vld [vmem:[%s10728_s5 + $0xc0] ss:$8 sps:$4 sm:$0xff]   ;;  %v7725_v8 = vld [vmem:[%s10728_s5 + $0xd0] ss:$8 sps:$4 sm:$0xff]  }
 0x366   : > { %v3019_v22 = vpack.c.bf16 %v2957_v19, %v2953_v50  ;;  %v7727_v50 = vld [vmem:[%s10728_s5 + $0xd4] ss:$8 sps:$4 sm:$0xff]   ;;  %v7728_v19 = vld [vmem:[%s10728_s5 + $0xe0] ss:$8 sps:$4 sm:$0xff]  }
 0x368   : > { %3115 = vmatprep.subr.bf16.mxu0 %v3019_v22  ;;  %v7733_v22 = vld [vmem:[%s10728_s5 + $0xf4] ss:$8 sps:$4 sm:$0xff]  }
 0x369   : > { %3116 = vmatpush1.bf16.msra.mxu0 %v3018_v49  ;;  %v7730_v49 = vld [vmem:[%s10728_s5 + $0xe4] ss:$8 sps:$4 sm:$0xff]  }
 0x36a   : > { %v2961_v18 = vpop.f32.mrb[156].mxu1 }
 0x36b   : > { %v2963_v28 = vpop.f32.mrb[157].mxu1 }
 0x36c   : > { %v2965_v61 = vpop.f32.mrb[158].mxu1 }
 0x36d   : > { %v3020_v35 = vpack.c.bf16 %v2965_v61, %v2961_v18  ;;  %v2967_v23 = vpop.f32.mrb[159].mxu1  ;;  %v7731_v18 = vld [vmem:[%s10728_s5 + $0xf0] ss:$8 sps:$4 sm:$0xff]  }
 0x36e   : > { %v3021_v6 = vpack.c.bf16 %v2967_v23, %v2963_v28  ;;  %v7736_v28 = vld [vmem:[%s10728_s5 + $0x104] ss:$8 sps:$4 sm:$0xff]  }
 0x370   : > { %3117 = vmatprep.subr.bf16.mxu0 %v3021_v6 }
 0x371   : > { %3118 = vmatpush1.bf16.msra.mxu0 %v3020_v35 }
 0x372   : > { %v2971_v2 = vpop.f32.mrb[160].mxu1 }
 0x373   : > { %v2973_v17 = vpop.f32.mrb[161].mxu1 }
 0x374   : > { %v2975_v1 = vpop.f32.mrb[162].mxu1 }
 0x375   : > { %v3022_v38 = vpack.c.bf16 %v2975_v1, %v2971_v2  ;;  %v2977_v30 = vpop.f32.mrb[163].mxu1  ;;  %v7734_v1 = vld [vmem:[%s10728_s5 + $0x100] ss:$8 sps:$4 sm:$0xff]  }
 0x376   : > { %v3023_v33 = vpack.c.bf16 %v2977_v30, %v2973_v17 }
 0x378   : > { %3119 = vmatprep.subr.bf16.mxu0 %v3023_v33  ;;  %v7737_v33 = vld [vmem:[%s10728_s5 + $0x110] ss:$8 sps:$4 sm:$0xff]  }
 0x379   : > { %3120 = vmatpush1.bf16.msra.mxu0 %v3022_v38  ;;  %v7739_v38 = vld [vmem:[%s10728_s5 + $0x114] ss:$8 sps:$4 sm:$0xff]  }
 0x37a   : > { %v2981_v48 = vpop.f32.mrb[164].mxu1 }
 0x37b   : > { %v2983_v3 = vpop.f32.mrb[165].mxu1 }
 0x37c   : > { %v2985_v43 = vpop.f32.mrb[166].mxu1 }
 0x37d   : > { %v3024_v60 = vpack.c.bf16 %v2985_v43, %v2981_v48  ;;  %v2987_v7 = vpop.f32.mrb[167].mxu1  ;;  %v7742_v43 = vld [vmem:[%s10728_s5 + $0x124] ss:$8 sps:$4 sm:$0xff]  }
 0x37e   : > { %v3025_v31 = vpack.c.bf16 %v2987_v7, %v2983_v3 }
 0x380   : > { %3121 = vmatprep.subr.bf16.mxu0 %v3025_v31 }
 0x381   : > { %3122 = vmatpush1.bf16.msra.mxu0 %v3024_v60 }
 0x382   : > { %4186 = vmatprep.subr.bf16.mxu0 %v7688_v57 }
 0x384   : > { %3132 = vmatmul.mubr.bf16.vlgmr.msra.gmra.mrb[48].mxu0 %v7668_v34 }
 0x385   : > { %6423 = vmatprep.mubr.msk.bf16.mxu0 %vm3080_vm0, %v7671_v9  ;;  %4187 = vmatpush1.bf16.msra.mxu0 %v7686_v59  ;;  %v7740_v9 = vld [vmem:[%s10728_s5 + $0x120] ss:$8 sps:$4 sm:$0xff]   ;;  %v7745_v59 = vld [vmem:[%s10728_s5 + $0x134] ss:$8 sps:$4 sm:$0xff]  }
 0x386   : > { %4188 = vmatprep.subr.bf16.mxu0 %v7691_v37 }
 0x389   : > { %4189 = vmatpush1.bf16.msra.mxu0 %v7689_v15  ;;  %v7743_v15 = vld [vmem:[%s10728_s5 + $0x130] ss:$8 sps:$4 sm:$0xff]  }
 0x38a   : > { %4190 = vmatprep.subr.bf16.mxu0 %v7694_v39 }
 0x38c   : > { %3142 = vmatmul.mubr.bf16.gmra.mrb[52].mxu0 %v7673_v0 }
 0x38d   : > { %6424 = vmatprep.mubr.msk.bf16.mxu0 %vm3080_vm0, %v7674_v21  ;;  %4191 = vmatpush1.bf16.msra.mxu0 %v7692_v42  ;;  %v7748_v21 = vld [vmem:[%s10728_s5 + $0x144] ss:$8 sps:$4 sm:$0xff]  }
 0x38e   : > { %4192 = vmatprep.subr.bf16.mxu0 %v7697_v32 }
 0x391   : > { %4193 = vmatpush1.bf16.msra.mxu0 %v7695_v51 }
 0x392   : > { %4194 = vmatprep.subr.bf16.mxu0 %v7700_v53 }
 0x394   : > { %3152 = vmatmul.mubr.bf16.gmra.mrb[56].mxu0 %v7676_v54 }
 0x395   : > { %6425 = vmatprep.mubr.msk.bf16.mxu0 %vm3080_vm0, %v7677_v40  ;;  %4195 = vmatpush1.bf16.msra.mxu0 %v7698_v56  ;;  %v7746_v40 = vld [vmem:[%s10728_s5 + $0x140] ss:$8 sps:$4 sm:$0xff]   ;;  %v7751_v56 = vld [vmem:[%s10728_s5 + $0x154] ss:$8 sps:$4 sm:$0xff]  }
 0x396   : > { %4196 = vmatprep.subr.bf16.mxu0 %v7703_v41 }
 0x399   : > { %4197 = vmatpush1.bf16.msra.mxu0 %v7701_v27  ;;  %v7749_v27 = vld [vmem:[%s10728_s5 + $0x150] ss:$8 sps:$4 sm:$0xff]  }
 0x39a   : > { %4198 = vmatprep.subr.bf16.mxu0 %v7706_v45 }
 0x39c   : > { %3162 = vmatmul.mubr.bf16.gmra.mrb[60].mxu0 %v7679_v25 }
 0x39d   : > { %6426 = vmatprep.mubr.msk.bf16.mxu0 %vm3080_vm0, %v7680_v62  ;;  %4199 = vmatpush1.bf16.msra.mxu0 %v7704_v29  ;;  %v7754_v62 = vld [vmem:[%s10728_s5 + $0x164] ss:$8 sps:$4 sm:$0xff]  }
 0x39e   : > { %4200 = vmatprep.subr.bf16.mxu0 %v7709_v55 }
 0x3a1   : > { %4201 = vmatpush1.bf16.msra.mxu0 %v7707_v44 }
 0x3a2   : > { %4202 = vmatprep.subr.bf16.mxu0 %v7712_v4 }
 0x3a4   : > { %3172 = vmatmul.mubr.bf16.gmra.mrb[64].mxu0 %v7682_v46 }
 0x3a5   : > { %6427 = vmatprep.mubr.msk.bf16.mxu0 %vm3080_vm0, %v7683_v13  ;;  %4203 = vmatpush1.bf16.msra.mxu0 %v7710_v52  ;;  %v7752_v13 = vld [vmem:[%s10728_s5 + $0x160] ss:$8 sps:$4 sm:$0xff]   ;;  %v7757_v52 = vld [vmem:[%s10728_s5 + $0x174] ss:$8 sps:$4 sm:$0xff]  }
 0x3a6   : > { %4204 = vmatprep.subr.bf16.mxu0 %v7715_v63  ;;  %v7755_v63 = vld [vmem:[%s10728_s5 + $0x170] ss:$8 sps:$4 sm:$0xff]  }
 0x3a9   : > { %4205 = vmatpush1.bf16.msra.mxu0 %v7713_v47 }
 0x3aa   : > { %4206 = vmatprep.subr.bf16.mxu0 %v7718_v36  ;;  %v7760_v36 = vld [vmem:[%s10728_s5 + $0x184] ss:$8 sps:$4 sm:$0xff]  }
 0x3ac   : > { %3182 = vmatmul.mubr.bf16.gmra.mrb[68].mxu0 %v7685_v11 }
 0x3ad   : > { %4207 = vmatpush1.bf16.msra.mxu0 %v7716_v24 }
 0x3ae   : > { %4208 = vmatprep.subr.bf16.mxu0 %v7721_v5 }
 0x3b1   : > { %4209 = vmatpush1.bf16.msra.mxu0 %v7719_v58 }
 0x3b2   : > { %4210 = vmatprep.subr.bf16.mxu0 %v7724_v14 }
 0x3b5   : > { %4211 = vmatpush1.bf16.msra.mxu0 %v7722_v16 }
 0x3b6   : > { %4212 = vmatprep.subr.bf16.mxu0 %v7727_v50  ;;  %v7758_v50 = vld [vmem:[%s10728_s5 + $0x180] ss:$8 sps:$4 sm:$0xff]  }
 0x3b9   : > { %4213 = vmatpush1.bf16.msra.mxu0 %v7725_v8 }
 0x3ba   : > { %4214 = vmatprep.subr.bf16.mxu0 %v7730_v49  ;;  %v7763_v49 = vld [vmem:[%s10728_s5 + $0x194] ss:$8 sps:$4 sm:$0xff]  }
 0x3bd   : > { %4215 = vmatpush1.bf16.msra.mxu0 %v7728_v19  ;;  %v7761_v19 = vld [vmem:[%s10728_s5 + $0x190] ss:$8 sps:$4 sm:$0xff]  }
 0x3be   : > { %4216 = vmatprep.subr.bf16.mxu0 %v7733_v22 }
 0x3c1   : > { %4217 = vmatpush1.bf16.msra.mxu0 %v7731_v18  ;;  %v7766_v18 = vld [vmem:[%s10728_s5 + $0x1a4] ss:$8 sps:$4 sm:$0xff]  }
 0x3c2   : > { %4259 = vmatprep.subr.bf16.mxu0 %v7736_v28 }
 0x457   : > { %v3133_v61 = vpop.f32.mrb[48].mxu0 }
 0x458   : > { %v3135_v35 = vpop.f32.mrb[49].mxu0 }
 0x459   : > { %v9618_v23 = vpop.f32.mrb[50].mxu0 }
 0x45a   : > { %v3192_v6 = vpack.c.bf16 %v9618_v23, %v3133_v61  ;;  %v3139_v2 = vpop.f32.mrb[51].mxu0 }
 0x45b   : > { %v3193_v17 = vpack.c.bf16 %v3139_v2, %v3135_v35 }
 0x45d   : > { %4218 = vmatprep.mubr.bf16.mxu0 %v3193_v17  ;;  %v7767_v17 = vld [vmem:[%s10728_s5 + $0x1b0] ss:$8 sps:$4 sm:$0xff]  }
 0x45e   : > { %4219 = vmatmul.mubr.bf16.vlgmr.msra.gmra.mrb[72].mxu0 %v3192_v6  ;;  %v7764_v6 = vld [vmem:[%s10728_s5 + $0x1a0] ss:$8 sps:$4 sm:$0xff]  }
 0x45f   : > { %4260 = vmatpush1.bf16.msra.mxu0 %v7734_v1  ;;  %v9627_v30 = vpop.f32.mrb[52].mxu0  ;;  %v7772_v1 = vld [vmem:[%s10728_s5 + $0x1c4] ss:$8 sps:$4 sm:$0xff]  }
 0x460   : > { %v3194_v48 = vpack.c.bf16 %v9627_v30, %v9618_v23  ;;  %v3145_v3 = vpop.f32.mrb[53].mxu0  ;;  %4261 = vmatprep.subr.bf16.mxu0 %v7739_v38  ;;  %v7770_v38 = vld [vmem:[%s10728_s5 + $0x1c0] ss:$8 sps:$4 sm:$0xff]   ;;  %v7793_v23 = vld [vmem:[%s10728_s5 + $0x234] ss:$8 sps:$4 sm:$0xff]  }
 0x461   : > { %v3195_v60 = vpack.c.bf16 %v3145_v3, %v3139_v2  ;;  %v3147_v7 = vpop.f32.mrb[54].mxu0  ;;  %v7769_v2 = vld [vmem:[%s10728_s5 + $0x1b4] ss:$8 sps:$4 sm:$0xff]  }
 0x462   : > { %v9638_v31 = vpack.c.bf16 %v3147_v7, %v9627_v30  ;;  %v3149_v57 = vpop.f32.mrb[55].mxu0  ;;  %v7791_v30 = vld [vmem:[%s10728_s5 + $0x230] ss:$8 sps:$4 sm:$0xff]  }
 0x463   : > { %v9640_v34 = vpack.c.bf16 %v3149_v57, %v3145_v3  ;;  %4262 = vmatpush1.bf16.msra.mxu0 %v7737_v33  ;;  %v7775_v33 = vld [vmem:[%s10728_s5 + $0x1d4] ss:$8 sps:$4 sm:$0xff]   ;;  %v7773_v3 = vld [vmem:[%s10728_s5 + $0x1d0] ss:$8 sps:$4 sm:$0xff]  }
 0x464   : > { %4263 = vmatprep.subr.bf16.mxu0 %v7742_v43  ;;  %v7778_v43 = vld [vmem:[%s10728_s5 + $0x1e4] ss:$8 sps:$4 sm:$0xff]  }
 0x465   : > { %4228 = vmatprep.mubr.bf16.mxu0 %v9640_v34 }
 0x466   : > { %4229 = vmatmul.mubr.bf16.gmra.mrb[76].mxu0 %v9638_v31 }
 0x467   : > { %4264 = vmatpush1.bf16.msra.mxu0 %v7740_v9  ;;  %v3153_v37 = vpop.f32.mrb[56].mxu0  ;;  %v7784_v9 = vld [vmem:[%s10728_s5 + $0x204] ss:$8 sps:$4 sm:$0xff]  }
 0x468   : > { %v9653_v39 = vpack.c.bf16 %v3153_v37, %v3147_v7  ;;  %v3155_v0 = vpop.f32.mrb[57].mxu0  ;;  %4265 = vmatprep.subr.bf16.mxu0 %v7745_v59  ;;  %v7781_v7 = vld [vmem:[%s10728_s5 + $0x1f4] ss:$8 sps:$4 sm:$0xff]   ;;  %v7782_v59 = vld [vmem:[%s10728_s5 + $0x200] ss:$8 sps:$4 sm:$0xff]  }
 0x469   : > { %v9658_v42 = vpack.c.bf16 %v3155_v0, %v3149_v57  ;;  %v3157_v32 = vpop.f32.mrb[58].mxu0  ;;  %v7779_v57 = vld [vmem:[%s10728_s5 + $0x1f0] ss:$8 sps:$4 sm:$0xff]  }
 0x46a   : > { %v9660_v51 = vpack.c.bf16 %v3157_v32, %v3153_v37  ;;  %v3159_v53 = vpop.f32.mrb[59].mxu0  ;;  %v7787_v37 = vld [vmem:[%s10728_s5 + $0x214] ss:$8 sps:$4 sm:$0xff]  }
 0x46b   : > { %v9662_v54 = vpack.c.bf16 %v3159_v53, %v3155_v0  ;;  %4266 = vmatpush1.bf16.msra.mxu0 %v7743_v15  ;;  %v7785_v15 = vld [vmem:[%s10728_s5 + $0x210] ss:$8 sps:$4 sm:$0xff]   ;;  %v7790_v0 = vld [vmem:[%s10728_s5 + $0x224] ss:$8 sps:$4 sm:$0xff]  }
 0x46c   : > { %4267 = vmatprep.subr.bf16.mxu0 %v7748_v21  ;;  %v7788_v21 = vld [vmem:[%s10728_s5 + $0x220] ss:$8 sps:$4 sm:$0xff]  }
 0x46d   : > { %4238 = vmatprep.mubr.bf16.mxu0 %v9662_v54 }
 0x46e   : > { %4239 = vmatmul.mubr.bf16.gmra.mrb[80].mxu0 %v9660_v51 }
 0x46f   : > { %4268 = vmatpush1.bf16.msra.mxu0 %v7746_v40  ;;  %v3163_v41 = vpop.f32.mrb[60].mxu0 }
 0x470   : > { %v9675_v45 = vpack.c.bf16 %v3163_v41, %v3157_v32  ;;  %v3165_v25 = vpop.f32.mrb[61].mxu0  ;;  %4269 = vmatprep.subr.bf16.mxu0 %v7751_v56  ;;  %v7796_v32 = vld [vmem:[%s10728_s5 + $0x244] ss:$8 sps:$4 sm:$0xff]  }
 0x471   : > { %v9680_v29 = vpack.c.bf16 %v3165_v25, %v3159_v53  ;;  %v3167_v55 = vpop.f32.mrb[62].mxu0 }
 0x472   : > { %v9682_v44 = vpack.c.bf16 %v3167_v55, %v3163_v41  ;;  %v3169_v4 = vpop.f32.mrb[63].mxu0  ;;  %v7794_v41 = vld [vmem:[%s10728_s5 + $0x240] ss:$8 sps:$4 sm:$0xff]  }
 0x473   : > { %v9684_v46 = vpack.c.bf16 %v3169_v4, %v3165_v25  ;;  %4270 = vmatpush1.bf16.msra.mxu0 %v7749_v27  ;;  %v7799_v27 = vld [vmem:[%s10728_s5 + $0x254] ss:$8 sps:$4 sm:$0xff]   ;;  %v7797_v25 = vld [vmem:[%s10728_s5 + $0x250] ss:$8 sps:$4 sm:$0xff]  }
 0x474   : > { %4271 = vmatprep.subr.bf16.mxu0 %v7754_v62  ;;  %v7802_v62 = vld [vmem:[%s10728_s5 + $0x264] ss:$8 sps:$4 sm:$0xff]  }
 0x475   : > { %4248 = vmatprep.mubr.bf16.mxu0 %v9684_v46 }
 0x476   : > { %4249 = vmatmul.mubr.bf16.gmra.mrb[84].mxu0 %v9682_v44 }
 0x477   : > { %4272 = vmatpush1.bf16.msra.mxu0 %v7752_v13  ;;  %4291 = vmatprep.mubr.bf16.mxu0 %v3195_v60  ;;  %v3173_v47 = vpop.f32.mrb[64].mxu0  ;;  %v7776_v60 = vld [vmem:[%s10728_s5 + $0x1e0] ss:$8 sps:$4 sm:$0xff]   ;;  %v7803_v13 = vld [vmem:[%s10728_s5 + $0x270] ss:$8 sps:$4 sm:$0xff]  }
 0x478   : > { %4273 = vmatprep.subr.bf16.mxu0 %v7757_v52  ;;  %v9700_v11 = vpack.c.bf16 %v3173_v47, %v3167_v55  ;;  %v3175_v24 = vpop.f32.mrb[65].mxu0  ;;  %v7800_v55 = vld [vmem:[%s10728_s5 + $0x260] ss:$8 sps:$4 sm:$0xff]   ;;  %v7808_v52 = vld [vmem:[%s10728_s5 + $0x284] ss:$8 sps:$4 sm:$0xff]  }
 0x479   : > { %v9702_v5 = vpack.c.bf16 %v3175_v24, %v3169_v4  ;;  %v9704_v58 = vpop.f32.mrb[66].mxu0  ;;  %v7805_v4 = vld [vmem:[%s10728_s5 + $0x274] ss:$8 sps:$4 sm:$0xff]  }
 0x47a   : > { %v9707_v14 = vpack.c.bf16 %v9704_v58, %v3173_v47  ;;  %v9709_v16 = vpop.f32.mrb[67].mxu0  ;;  %v7811_v47 = vld [vmem:[%s10728_s5 + $0x294] ss:$8 sps:$4 sm:$0xff]  }
 0x47b   : > { %4274 = vmatpush1.bf16.msra.mxu0 %v7755_v63  ;;  %v9715_v8 = vpack.c.bf16 %v9709_v16, %v3175_v24  ;;  %v7806_v63 = vld [vmem:[%s10728_s5 + $0x280] ss:$8 sps:$4 sm:$0xff]  }
 0x47c   : > { %4275 = vmatprep.subr.bf16.mxu0 %v7760_v36  ;;  %v7814_v36 = vld [vmem:[%s10728_s5 + $0x2a4] ss:$8 sps:$4 sm:$0xff]   ;;  %v7812_v24 = vld [vmem:[%s10728_s5 + $0x2a0] ss:$8 sps:$4 sm:$0xff]  }
 0x47f   : > { %4276 = vmatpush1.bf16.msra.mxu0 %v7758_v50  ;;  %v9723_v22 = vpop.f32.mrb[68].mxu0  ;;  %v7817_v50 = vld [vmem:[%s10728_s5 + $0x2b4] ss:$8 sps:$4 sm:$0xff]  }
 0x480   : > { %4277 = vmatprep.subr.bf16.mxu0 %v7763_v49  ;;  %v3210_v28 = vpack.c.bf16 %v9723_v22, %v9704_v58  ;;  %v9730_v61 = vpop.f32.mrb[69].mxu0  ;;  %v7815_v49 = vld [vmem:[%s10728_s5 + $0x2b0] ss:$8 sps:$4 sm:$0xff]   ;;  %v7907_v58 = vld [vmem:[%s10728_s5 + $0x494] ss:$8 sps:$4 sm:$0xff]  }
 0x481   : > { %v3211_v35 = vpack.c.bf16 %v9730_v61, %v9709_v16  ;;  %v7899_v16 = vld [vmem:[%s10728_s5 + $0x470] ss:$8 sps:$4 sm:$0xff]  }
 0x483   : > { %4278 = vmatpush1.bf16.msra.mxu0 %v7761_v19  ;;  %v7820_v19 = vld [vmem:[%s10728_s5 + $0x2c4] ss:$8 sps:$4 sm:$0xff]  }
 0x484   : > { %4279 = vmatprep.subr.bf16.mxu0 %v7766_v18  ;;  %v7818_v18 = vld [vmem:[%s10728_s5 + $0x2c0] ss:$8 sps:$4 sm:$0xff]  }
 0x487   : > { %4280 = vmatpush1.bf16.msra.mxu0 %v7764_v6  ;;  %v7823_v6 = vld [vmem:[%s10728_s5 + $0x2d4] ss:$8 sps:$4 sm:$0xff]  }
 0x488   : > { %4281 = vmatprep.subr.bf16.mxu0 %v7769_v2  ;;  %v7821_v2 = vld [vmem:[%s10728_s5 + $0x2d0] ss:$8 sps:$4 sm:$0xff]  }
 0x48b   : > { %4282 = vmatpush1.bf16.msra.mxu0 %v7767_v17  ;;  %v7826_v17 = vld [vmem:[%s10728_s5 + $0x2e4] ss:$8 sps:$4 sm:$0xff]  }
 0x48c   : > { %4283 = vmatprep.subr.bf16.mxu0 %v7772_v1  ;;  %v7824_v1 = vld [vmem:[%s10728_s5 + $0x2e0] ss:$8 sps:$4 sm:$0xff]  }
 0x48f   : > { %4284 = vmatpush1.bf16.msra.mxu0 %v7770_v38  ;;  %v7829_v38 = vld [vmem:[%s10728_s5 + $0x2f4] ss:$8 sps:$4 sm:$0xff]  }
 0x490   : > { %4285 = vmatprep.subr.bf16.mxu0 %v7775_v33  ;;  %v7827_v33 = vld [vmem:[%s10728_s5 + $0x2f0] ss:$8 sps:$4 sm:$0xff]  }
 0x493   : > { %4286 = vmatpush1.bf16.msra.mxu0 %v7773_v3  ;;  %v7832_v3 = vld [vmem:[%s10728_s5 + $0x304] ss:$8 sps:$4 sm:$0xff]  }
 0x494   : > { %4287 = vmatprep.subr.bf16.mxu0 %v7778_v43  ;;  %v7830_v43 = vld [vmem:[%s10728_s5 + $0x300] ss:$8 sps:$4 sm:$0xff]  }
 0x497   : > { %4288 = vmatpush1.bf16.msra.mxu0 %v7776_v60  ;;  %v7835_v60 = vld [vmem:[%s10728_s5 + $0x314] ss:$8 sps:$4 sm:$0xff]  }
 0x498   : > { %4289 = vmatprep.subr.bf16.mxu0 %v7781_v7  ;;  %v7833_v7 = vld [vmem:[%s10728_s5 + $0x310] ss:$8 sps:$4 sm:$0xff]  }
 0x49b   : > { %4290 = vmatpush1.bf16.msra.mxu0 %v7779_v57  ;;  %v7838_v57 = vld [vmem:[%s10728_s5 + $0x324] ss:$8 sps:$4 sm:$0xff]  }
 0x49c   : > { %4332 = vmatprep.subr.bf16.mxu0 %v7784_v9  ;;  %v7836_v9 = vld [vmem:[%s10728_s5 + $0x320] ss:$8 sps:$4 sm:$0xff]  }
 0x49e   : > { %4292 = vmatmul.mubr.bf16.vlgmr.msra.gmra.mrb[72].mxu0 %v3194_v48  ;;  %v9797_v48 = vpop.f32.mrb[70].mxu0 }
 0x49f   : > { %4301 = vmatprep.mubr.bf16.mxu0 %v9658_v42  ;;  %4333 = vmatpush1.bf16.msra.mxu0 %v7782_v59  ;;  %v3212_v53 = vpack.c.bf16 %v9797_v48, %v9723_v22  ;;  %v9804_v40 = vpop.f32.mrb[71].mxu0  ;;  %v7839_v59 = vld [vmem:[%s10728_s5 + $0x330] ss:$8 sps:$4 sm:$0xff]  }
 0x4a0   : > { %4334 = vmatprep.subr.bf16.mxu0 %v7787_v37  ;;  %v3213_v56 = vpack.c.bf16 %v9804_v40, %v9730_v61  ;;  %v7844_v37 = vld [vmem:[%s10728_s5 + $0x344] ss:$8 sps:$4 sm:$0xff]  }
 0x4a3   : > { %4335 = vmatpush1.bf16.msra.mxu0 %v7785_v15  ;;  %v7842_v15 = vld [vmem:[%s10728_s5 + $0x340] ss:$8 sps:$4 sm:$0xff]  }
 0x4a4   : > { %4336 = vmatprep.subr.bf16.mxu0 %v7790_v0  ;;  %v7847_v0 = vld [vmem:[%s10728_s5 + $0x354] ss:$8 sps:$4 sm:$0xff]  }
 0x4a6   : > { %4302 = vmatmul.mubr.bf16.gmra.mrb[76].mxu0 %v9653_v39 }
 0x4a7   : > { %4311 = vmatprep.mubr.bf16.mxu0 %v9680_v29  ;;  %4337 = vmatpush1.bf16.msra.mxu0 %v7788_v21  ;;  %v7845_v21 = vld [vmem:[%s10728_s5 + $0x350] ss:$8 sps:$4 sm:$0xff]  }
 0x4a8   : > { %4338 = vmatprep.subr.bf16.mxu0 %v7793_v23  ;;  %v7850_v23 = vld [vmem:[%s10728_s5 + $0x364] ss:$8 sps:$4 sm:$0xff]  }
 0x4ab   : > { %4339 = vmatpush1.bf16.msra.mxu0 %v7791_v30  ;;  %v7848_v30 = vld [vmem:[%s10728_s5 + $0x360] ss:$8 sps:$4 sm:$0xff]  }
 0x4ac   : > { %4340 = vmatprep.subr.bf16.mxu0 %v7796_v32  ;;  %v7853_v32 = vld [vmem:[%s10728_s5 + $0x374] ss:$8 sps:$4 sm:$0xff]  }
 0x4ae   : > { %4312 = vmatmul.mubr.bf16.gmra.mrb[80].mxu0 %v9675_v45 }
 0x4af   : > { %4321 = vmatprep.mubr.bf16.mxu0 %v9702_v5  ;;  %4341 = vmatpush1.bf16.msra.mxu0 %v7794_v41  ;;  %v7926_v41 = vld [vmem:[%s10730_s7 + $0x40] sm:$0xff]  }
 0x4b0   : > { %4342 = vmatprep.subr.bf16.mxu0 %v7799_v27  ;;  %v7927_v27 = vld [vmem:[%s10730_s7] sm:$0xff]   ;;  %6970 = vmatprep.subr.bf16.mxu1 %v7926_v41 }
 0x4b1   : > { %6971 = vmatpush3.bf16.msra.mxu1 %v7927_v27  ;;  %v7898_v41 = vld [vmem:[%s10728_s5 + $0x464] ss:$8 sps:$4 sm:$0xff]   ;;  %v7896_v27 = vld [vmem:[%s10728_s5 + $0x460] ss:$8 sps:$4 sm:$0xff]  }
 0x4b3   : > { %4343 = vmatpush1.bf16.msra.mxu0 %v7797_v25  ;;  %v7928_v25 = vld [vmem:[%s10730_s7 + $0x48] sm:$0xff]  }
 0x4b4   : > { %4344 = vmatprep.subr.bf16.mxu0 %v7802_v62  ;;  %v7851_v62 = vld [vmem:[%s10728_s5 + $0x370] ss:$8 sps:$4 sm:$0xff]   ;;  %6972 = vmatprep.subr.bf16.mxu1 %v7928_v25  ;;  %v7902_v25 = vld [vmem:[%s10728_s5 + $0x480] ss:$8 sps:$4 sm:$0xff]  }
 0x4b6   : > { %4322 = vmatmul.mubr.bf16.gmra.mrb[84].mxu0 %v9700_v11 }
 0x4b7   : > { %4345 = vmatpush1.bf16.msra.mxu0 %v7800_v55  ;;  %4364 = vmatprep.mubr.bf16.mxu0 %v9640_v34  ;;  %v7809_v34 = vld [vmem:[%s10728_s5 + $0x290] ss:$8 sps:$4 sm:$0xff]   ;;  %v7856_v55 = vld [vmem:[%s10728_s5 + $0x384] ss:$8 sps:$4 sm:$0xff]  }
 0x4b8   : > { %4346 = vmatprep.subr.bf16.mxu0 %v7805_v4  ;;  %v7929_v4 = vld [vmem:[%s10730_s7 + $0x8] sm:$0xff]  }
 0x4b9   : > { %6973 = vmatpush3.bf16.msra.mxu1 %v7929_v4  ;;  %v7911_v4 = vld [vmem:[%s10728_s5 + $0x4b0] ss:$8 sps:$4 sm:$0xff]  }
 0x4bb   : > { %4347 = vmatpush1.bf16.msra.mxu0 %v7803_v13  ;;  %v7854_v13 = vld [vmem:[%s10728_s5 + $0x380] ss:$8 sps:$4 sm:$0xff]  }
 0x4bc   : > { %4348 = vmatprep.subr.bf16.mxu0 %v7808_v52  ;;  %v7859_v52 = vld [vmem:[%s10728_s5 + $0x394] ss:$8 sps:$4 sm:$0xff]  }
 0x4bf   : > { %4349 = vmatpush1.bf16.msra.mxu0 %v7806_v63  ;;  %v7931_v63 = vld [vmem:[%s10730_s7 + $0x10] sm:$0xff]  }
 0x4c0   : > { %4350 = vmatprep.subr.bf16.mxu0 %v7811_v47  ;;  %v7932_v47 = vld [vmem:[%s10730_s7 + $0x58] sm:$0xff]  }
 0x4c3   : > { %4351 = vmatpush1.bf16.msra.mxu0 %v7809_v34  ;;  %v7857_v34 = vld [vmem:[%s10728_s5 + $0x390] ss:$8 sps:$4 sm:$0xff]  }
 0x4c4   : > { %4352 = vmatprep.subr.bf16.mxu0 %v7814_v36  ;;  %v7862_v36 = vld [vmem:[%s10728_s5 + $0x3a4] ss:$8 sps:$4 sm:$0xff]  }
 0x4c7   : > { %4353 = vmatpush1.bf16.msra.mxu0 %v7812_v24  ;;  %v7933_v24 = vld [vmem:[%s10730_s7 + $0x18] sm:$0xff]  }
 0x4c8   : > { %4354 = vmatprep.subr.bf16.mxu0 %v7817_v50  ;;  %v7934_v50 = vld [vmem:[%s10730_s7 + $0x60] sm:$0xff]  }
 0x4cb   : > { %4355 = vmatpush1.bf16.msra.mxu0 %v7815_v49  ;;  %v7860_v49 = vld [vmem:[%s10728_s5 + $0x3a0] ss:$8 sps:$4 sm:$0xff]  }
 0x4cc   : > { %4356 = vmatprep.subr.bf16.mxu0 %v7820_v19  ;;  %v7865_v19 = vld [vmem:[%s10728_s5 + $0x3b4] ss:$8 sps:$4 sm:$0xff]  }
 0x4cf   : > { %4357 = vmatpush1.bf16.msra.mxu0 %v7818_v18  ;;  %v7935_v18 = vld [vmem:[%s10730_s7 + $0x20] sm:$0xff]  }
 0x4d0   : > { %4358 = vmatprep.subr.bf16.mxu0 %v7823_v6  ;;  %v7936_v6 = vld [vmem:[%s10730_s7 + $0x68] sm:$0xff]  }
 0x4d3   : > { %4359 = vmatpush1.bf16.msra.mxu0 %v7821_v2  ;;  %v7863_v2 = vld [vmem:[%s10728_s5 + $0x3b0] ss:$8 sps:$4 sm:$0xff]  }
 0x4d4   : > { %4360 = vmatprep.subr.bf16.mxu0 %v7826_v17  ;;  %v7868_v17 = vld [vmem:[%s10728_s5 + $0x3c4] ss:$8 sps:$4 sm:$0xff]  }
 0x4d7   : > { %4361 = vmatpush1.bf16.msra.mxu0 %v7824_v1  ;;  %v7937_v1 = vld [vmem:[%s10730_s7 + $0x28] sm:$0xff]  }
 0x4d8   : > { %4362 = vmatprep.subr.bf16.mxu0 %v7829_v38  ;;  %v7938_v38 = vld [vmem:[%s10730_s7 + $0x70] sm:$0xff]  }
 0x4db   : > { %4363 = vmatpush1.bf16.msra.mxu0 %v7827_v33  ;;  %v7866_v33 = vld [vmem:[%s10728_s5 + $0x3c0] ss:$8 sps:$4 sm:$0xff]  }
 0x4dc   : > { %4405 = vmatprep.subr.bf16.mxu0 %v7832_v3  ;;  %v7871_v3 = vld [vmem:[%s10728_s5 + $0x3d4] ss:$8 sps:$4 sm:$0xff]  }
 0x4de   : > { %4365 = vmatmul.mubr.bf16.vlgmr.msra.gmra.mrb[72].mxu0 %v9638_v31  ;;  %v7841_v31 = vld [vmem:[%s10728_s5 + $0x334] ss:$8 sps:$4 sm:$0xff]  }
 0x4df   : > { %4374 = vmatprep.mubr.bf16.mxu0 %v9662_v54  ;;  %4406 = vmatpush1.bf16.msra.mxu0 %v7830_v43  ;;  %v7939_v43 = vld [vmem:[%s10730_s7 + $0x30] sm:$0xff]  }
 0x4e0   : > { %4407 = vmatprep.subr.bf16.mxu0 %v7835_v60  ;;  %v7869_v60 = vld [vmem:[%s10728_s5 + $0x3d0] ss:$8 sps:$4 sm:$0xff]  }
 0x4e3   : > { %4408 = vmatpush1.bf16.msra.mxu0 %v7833_v7  ;;  %v7874_v7 = vld [vmem:[%s10728_s5 + $0x3e4] ss:$8 sps:$4 sm:$0xff]  }
 0x4e4   : > { %4409 = vmatprep.subr.bf16.mxu0 %v7838_v57  ;;  %v7872_v57 = vld [vmem:[%s10728_s5 + $0x3e0] ss:$8 sps:$4 sm:$0xff]  }
 0x4e6   : > { %4375 = vmatmul.mubr.bf16.gmra.mrb[76].mxu0 %v9660_v51 }
 0x4e7   : > { %4384 = vmatprep.mubr.bf16.mxu0 %v9684_v46  ;;  %4410 = vmatpush1.bf16.msra.mxu0 %v7836_v9  ;;  %v7877_v9 = vld [vmem:[%s10728_s5 + $0x3f4] ss:$8 sps:$4 sm:$0xff]  }
 0x4e8   : > { %4411 = vmatprep.subr.bf16.mxu0 %v7841_v31  ;;  %v7875_v31 = vld [vmem:[%s10728_s5 + $0x3f0] ss:$8 sps:$4 sm:$0xff]  }
 0x4eb   : > { %4412 = vmatpush1.bf16.msra.mxu0 %v7839_v59  ;;  %v7880_v59 = vld [vmem:[%s10728_s5 + $0x404] ss:$8 sps:$4 sm:$0xff]  }
 0x4ec   : > { %4413 = vmatprep.subr.bf16.mxu0 %v7844_v37  ;;  %v7878_v37 = vld [vmem:[%s10728_s5 + $0x400] ss:$8 sps:$4 sm:$0xff]  }
 0x4ee   : > { %4385 = vmatmul.mubr.bf16.gmra.mrb[80].mxu0 %v9682_v44 }
 0x4ef   : > { %4394 = vmatprep.mubr.bf16.mxu0 %v9715_v8  ;;  %4414 = vmatpush1.bf16.msra.mxu0 %v7842_v15  ;;  %v7883_v15 = vld [vmem:[%s10728_s5 + $0x414] ss:$8 sps:$4 sm:$0xff]  }
 0x4f0   : > { %4415 = vmatprep.subr.bf16.mxu0 %v7847_v0  ;;  %v7881_v0 = vld [vmem:[%s10728_s5 + $0x410] ss:$8 sps:$4 sm:$0xff]  }
 0x4f3   : > { %4416 = vmatpush1.bf16.msra.mxu0 %v7845_v21  ;;  %v7886_v21 = vld [vmem:[%s10728_s5 + $0x424] ss:$8 sps:$4 sm:$0xff]  }
 0x4f4   : > { %4417 = vmatprep.subr.bf16.mxu0 %v7850_v23  ;;  %v7884_v23 = vld [vmem:[%s10728_s5 + $0x420] ss:$8 sps:$4 sm:$0xff]  }
 0x4f6   : > { %4395 = vmatmul.mubr.bf16.gmra.mrb[84].mxu0 %v9707_v14 }
 0x4f7   : > { %4418 = vmatpush1.bf16.msra.mxu0 %v7848_v30  ;;  %4437 = vmatprep.mubr.bf16.mxu0 %v9658_v42  ;;  %v7930_v42 = vld [vmem:[%s10730_s7 + $0x50] sm:$0xff]   ;;  %v7892_v30 = vld [vmem:[%s10728_s5 + $0x444] ss:$8 sps:$4 sm:$0xff]  }
 0x4f8   : > { %4419 = vmatprep.subr.bf16.mxu0 %v7853_v32  ;;  %6974 = vmatprep.subr.bf16.mxu1 %v7930_v42  ;;  %v7890_v32 = vld [vmem:[%s10728_s5 + $0x440] ss:$8 sps:$4 sm:$0xff]   ;;  %v7916_v42 = vld [vmem:[%s10728_s5 + $0x4c4] ss:$8 sps:$4 sm:$0xff]  }
 0x4f9   : > { %6975 = vmatpush3.bf16.msra.mxu1 %v7931_v63  ;;  %v7917_v63 = vld [vmem:[%s10728_s5 + $0x4d0] ss:$8 sps:$4 sm:$0xff]  }
 0x4fa   : > { %6976 = vmatprep.subr.bf16.mxu1 %v7932_v47  ;;  %v7922_v47 = vld [vmem:[%s10728_s5 + $0x4e4] ss:$8 sps:$4 sm:$0xff]  }
 0x4fb   : > { %4420 = vmatpush1.bf16.msra.mxu0 %v7851_v62  ;;  %v7908_v62 = vld [vmem:[%s10728_s5 + $0x4a0] ss:$8 sps:$4 sm:$0xff]  }
 0x4fc   : > { %4421 = vmatprep.subr.bf16.mxu0 %v7856_v55  ;;  %v7913_v55 = vld [vmem:[%s10728_s5 + $0x4b4] ss:$8 sps:$4 sm:$0xff]  }
 0x4fd   : > { %6977 = vmatpush3.bf16.msra.mxu1 %v7933_v24  ;;  %v7923_v24 = vld [vmem:[%s10728_s5 + $0x4f0] ss:$8 sps:$4 sm:$0xff]  }
 0x4fe   : > { %6978 = vmatprep.subr.bf16.mxu1 %v7934_v50 }
 0x4ff   : > { %4422 = vmatpush1.bf16.msra.mxu0 %v7854_v13  ;;  %v7914_v13 = vld [vmem:[%s10728_s5 + $0x4c0] ss:$8 sps:$4 sm:$0xff]  }
 0x500   : > { %4423 = vmatprep.subr.bf16.mxu0 %v7859_v52  ;;  %v7919_v52 = vld [vmem:[%s10728_s5 + $0x4d4] ss:$8 sps:$4 sm:$0xff]  }
 0x501   : > { %6979 = vmatpush3.bf16.msra.mxu1 %v7935_v18 }
 0x502   : > { %6980 = vmatprep.subr.bf16.mxu1 %v7936_v6 }
 0x503   : > { %4424 = vmatpush1.bf16.msra.mxu0 %v7857_v34  ;;  %v7920_v34 = vld [vmem:[%s10728_s5 + $0x4e0] ss:$8 sps:$4 sm:$0xff]  }
 0x504   : > { %4425 = vmatprep.subr.bf16.mxu0 %v7862_v36  ;;  %v7925_v36 = vld [vmem:[%s10728_s5 + $0x4f4] ss:$8 sps:$4 sm:$0xff]  }
 0x505   : > { %6981 = vmatpush3.bf16.msra.mxu1 %v7937_v1 }
 0x506   : > { %6982 = vmatprep.subr.bf16.mxu1 %v7938_v38 }
 0x507   : > { %4426 = vmatpush1.bf16.msra.mxu0 %v7860_v49 }
 0x508   : > { %4427 = vmatprep.subr.bf16.mxu0 %v7865_v19 }
 0x509   : > { %6983 = vmatpush3.bf16.msra.mxu1 %v7939_v43 }
 0x50b   : > { %4428 = vmatpush1.bf16.msra.mxu0 %v7863_v2 }
 0x50c   : > { %4429 = vmatprep.subr.bf16.mxu0 %v7868_v17 }
 0x50f   : > { %4430 = vmatpush1.bf16.msra.mxu0 %v7866_v33 }
 0x510   : > { %4431 = vmatprep.subr.bf16.mxu0 %v7871_v3 }
 0x513   : > { %4432 = vmatpush1.bf16.msra.mxu0 %v7869_v60 }
 0x514   : > { %4433 = vmatprep.subr.bf16.mxu0 %v7874_v7 }
 0x517   : > { %4434 = vmatpush1.bf16.msra.mxu0 %v7872_v57 }
 0x518   : > { %4435 = vmatprep.subr.bf16.mxu0 %v7877_v9 }
 0x51b   : > { %4436 = vmatpush1.bf16.msra.mxu0 %v7875_v31 }
 0x51c   : > { %4478 = vmatprep.subr.bf16.mxu0 %v7880_v59 }
 0x51e   : > { %4438 = vmatmul.mubr.bf16.vlgmr.msra.gmra.mrb[72].mxu0 %v9653_v39  ;;  %v7889_v39 = vld [vmem:[%s10728_s5 + $0x434] ss:$8 sps:$4 sm:$0xff]  }
 0x51f   : > { %4447 = vmatprep.mubr.bf16.mxu0 %v9680_v29  ;;  %4479 = vmatpush1.bf16.msra.mxu0 %v7878_v37  ;;  %v7887_v29 = vld [vmem:[%s10728_s5 + $0x430] ss:$8 sps:$4 sm:$0xff]  }
 0x520   : > { %4480 = vmatprep.subr.bf16.mxu0 %v7883_v15 }
 0x523   : > { %4481 = vmatpush1.bf16.msra.mxu0 %v7881_v0 }
 0x524   : > { %4482 = vmatprep.subr.bf16.mxu0 %v7886_v21 }
 0x526   : > { %4448 = vmatmul.mubr.bf16.gmra.mrb[76].mxu0 %v9675_v45  ;;  %v7895_v45 = vld [vmem:[%s10728_s5 + $0x454] ss:$8 sps:$4 sm:$0xff]  }
 0x527   : > { %4457 = vmatprep.mubr.bf16.mxu0 %v9702_v5  ;;  %4483 = vmatpush1.bf16.msra.mxu0 %v7884_v23  ;;  %v7893_v5 = vld [vmem:[%s10728_s5 + $0x450] ss:$8 sps:$4 sm:$0xff]  }
 0x528   : > { %4484 = vmatprep.subr.bf16.mxu0 %v7889_v39 }
 0x52b   : > { %4485 = vmatpush1.bf16.msra.mxu0 %v7887_v29 }
 0x52c   : > { %4486 = vmatprep.subr.bf16.mxu0 %v7892_v30 }
 0x52e   : > { %4458 = vmatmul.mubr.bf16.gmra.mrb[80].mxu0 %v9700_v11  ;;  %v7901_v11 = vld [vmem:[%s10728_s5 + $0x474] ss:$8 sps:$4 sm:$0xff]  }
 0x52f   : > { %4467 = vmatprep.mubr.bf16.mxu0 %v3211_v35  ;;  %4487 = vmatpush1.bf16.msra.mxu0 %v7890_v32  ;;  %v7904_v35 = vld [vmem:[%s10728_s5 + $0x484] ss:$8 sps:$4 sm:$0xff]  }
 0x530   : > { %4488 = vmatprep.subr.bf16.mxu0 %v7895_v45 }
 0x533   : > { %4489 = vmatpush1.bf16.msra.mxu0 %v7893_v5 }
 0x534   : > { %4490 = vmatprep.subr.bf16.mxu0 %v7898_v41 }
 0x536   : > { %4468 = vmatmul.mubr.bf16.gmra.mrb[84].mxu0 %v3210_v28  ;;  %v7910_v28 = vld [vmem:[%s10728_s5 + $0x4a4] ss:$8 sps:$4 sm:$0xff]  }
 0x537   : > { %4491 = vmatpush1.bf16.msra.mxu0 %v7896_v27  ;;  %4510 = vmatprep.mubr.bf16.mxu0 %v9662_v54  ;;  %v7905_v54 = vld [vmem:[%s10728_s5 + $0x490] ss:$8 sps:$4 sm:$0xff]  }
 0x538   : > { %4492 = vmatprep.subr.bf16.mxu0 %v7901_v11 }
 0x53b   : > { %4493 = vmatpush1.bf16.msra.mxu0 %v7899_v16 }
 0x53c   : > { %4494 = vmatprep.subr.bf16.mxu0 %v7904_v35 }
 0x53f   : > { %4495 = vmatpush1.bf16.msra.mxu0 %v7902_v25 }
 0x540   : > { %4496 = vmatprep.subr.bf16.mxu0 %v7907_v58 }
 0x543   : > { %4497 = vmatpush1.bf16.msra.mxu0 %v7905_v54 }
 0x544   : > { %4498 = vmatprep.subr.bf16.mxu0 %v7910_v28 }
 0x547   : > { %4499 = vmatpush1.bf16.msra.mxu0 %v7908_v62 }
 0x548   : > { %4500 = vmatprep.subr.bf16.mxu0 %v7913_v55 }
 0x54b   : > { %4501 = vmatpush1.bf16.msra.mxu0 %v7911_v4 }
 0x54c   : > { %4502 = vmatprep.subr.bf16.mxu0 %v7916_v42 }
 0x54f   : > { %4503 = vmatpush1.bf16.msra.mxu0 %v7914_v13 }
 0x550   : > { %4504 = vmatprep.subr.bf16.mxu0 %v7919_v52 }
 0x553   : > { %4505 = vmatpush1.bf16.msra.mxu0 %v7917_v63 }
 0x554   : > { %4506 = vmatprep.subr.bf16.mxu0 %v7922_v47 }
 0x557   : > { %4507 = vmatpush1.bf16.msra.mxu0 %v7920_v34 }
 0x558   : > { %4508 = vmatprep.subr.bf16.mxu0 %v7925_v36 }
 0x55b   : > { %4509 = vmatpush1.bf16.msra.mxu0 %v7923_v24 }
 0x55e   : > { %4511 = vmatmul.mubr.bf16.vlgmr.msra.gmra.mrb[72].mxu0 %v9660_v51  ;;  %v7940_v51 = vld [vmem:[%s10730_s7 + $0x78] sm:$0xff]  }
 0x55f   : > { %4520 = vmatprep.mubr.bf16.mxu0 %v9684_v46  ;;  %6984 = vmatprep.subr.bf16.mxu1 %v7940_v51  ;;  %v3374_v46 = vld [vmem:[%s10729_s6] sm:$0x3] }
 0x566   : > { %4521 = vmatmul.mubr.bf16.gmra.mrb[76].mxu0 %v9682_v44  ;;  %v7941_v44 = vld [vmem:[%s10730_s7 + $0x38] sm:$0xff]  }
 0x567   : > { %4530 = vmatprep.mubr.bf16.mxu0 %v9715_v8  ;;  %6985 = vmatpush3.bf16.msra.mxu1 %v7941_v44  ;;  %v3383_v8 = vrot.slane %v3374_v46, %v9327_v12  ;;  %v7942_v44 = vld [vmem:[%s10731_s8] sm:$0xff]  }
 0x56e   : > { %4531 = vmatmul.mubr.bf16.gmra.mrb[80].mxu0 %v9707_v14  ;;  %v3379_v14 = vrot.slane %v3374_v46, %v9323_v10 }
 0x56f   : > { %4540 = vmatprep.mubr.bf16.mxu0 %v3213_v56 }
 0x576   : > { %4541 = vmatmul.mubr.bf16.gmra.mrb[84].mxu0 %v3212_v53 }
 0x631   : > { %v4512_v22 = vpop.f32.mrb[72].mxu0 }
 0x632   : > { %v7160_v61 = vadd.f32 %v4512_v22, %v3379_v14  ;;  %v4514_v48 = vpop.f32.mrb[73].mxu0 }
 0x633   : > { %v7161_v53 = vadd.f32 %v4514_v48, %v3383_v8  ;;  %v4516_v40 = vpop.f32.mrb[74].mxu0 }
 0x634   : > { %v7162_v56 = vadd.f32 %v4516_v40, %v3379_v14  ;;  %v4518_v50 = vpop.f32.mrb[75].mxu0  ;;  %v4551_v19 = vmax.f32 %v7160_v61, 0.0 }
 0x635   : > { %v7163_v49 = vadd.f32 %v4518_v50, %v3383_v8  ;;  %v4552_v6 = vmax.f32 %v7161_v53, 0.0 }
 0x636   : > { %v4553_v18 = vmax.f32 %v7162_v56, 0.0 }
 0x637   : > { %v4554_v2 = vmax.f32 %v7163_v49, 0.0 }
 0x638   : > { %v4567_v17 = vpack.c.bf16 %v4553_v18, %v4551_v19 }
 0x639   : > { %v4568_v1 = vpack.c.bf16 %v4554_v2, %v4552_v6  ;;  %v4522_v38 = vpop.f32.mrb[76].mxu0 }
 0x63a   : > { %v7164_v33 = vadd.f32 %v4522_v38, %v3379_v14  ;;  %v4524_v3 = vpop.f32.mrb[77].mxu0 }
 0x63b   : > { %v7165_v43 = vadd.f32 %v4524_v3, %v3383_v8  ;;  %v4526_v60 = vpop.f32.mrb[78].mxu0  ;;  %4735 = vmatprep.mubr.bf16.mxu1 %v4568_v1 }
 0x63c   : > { %v7166_v7 = vadd.f32 %v4526_v60, %v3379_v14  ;;  %v4528_v57 = vpop.f32.mrb[79].mxu0  ;;  %4736 = vmatmul.mubr.bf16.vlgmr.msra.gmra.mrb[168].mxu1 %v4567_v17  ;;  %v4555_v31 = vmax.f32 %v7164_v33, 0.0 }
 0x63d   : > { %v7167_v9 = vadd.f32 %v4528_v57, %v3383_v8  ;;  %v4556_v37 = vmax.f32 %v7165_v43, 0.0 }
 0x63e   : > { %v4557_v59 = vmax.f32 %v7166_v7, 0.0 }
 0x63f   : > { %v4558_v15 = vmax.f32 %v7167_v9, 0.0 }
 0x640   : > { %v4569_v0 = vpack.c.bf16 %v4557_v59, %v4555_v31 }
 0x641   : > { %v4570_v21 = vpack.c.bf16 %v4558_v15, %v4556_v37  ;;  %v4532_v23 = vpop.f32.mrb[80].mxu0  ;;  %v7946_v15 = vld [vmem:[%s10732_s9 + $0x4] ss:$16 sps:$4 sm:$0xff]  }
 0x642   : > { %v7168_v39 = vadd.f32 %v4532_v23, %v3379_v14  ;;  %v4534_v29 = vpop.f32.mrb[81].mxu0  ;;  %v7949_v23 = vld [vmem:[%s10732_s9 + $0x24] ss:$16 sps:$4 sm:$0xff]  }
 0x643   : > { %v7169_v30 = vadd.f32 %v4534_v29, %v3383_v8  ;;  %v4536_v32 = vpop.f32.mrb[82].mxu0  ;;  %4743 = vmatprep.mubr.bf16.mxu1 %v4570_v21  ;;  %v7944_v21 = vld [vmem:[%s10732_s9] ss:$16 sps:$4 sm:$0xff]   ;;  %v7952_v29 = vld [vmem:[%s10732_s9 + $0x44] ss:$16 sps:$4 sm:$0xff]  }
 0x644   : > { %v7170_v45 = vadd.f32 %v4536_v32, %v3379_v14  ;;  %v4538_v5 = vpop.f32.mrb[83].mxu0  ;;  %4744 = vmatmul.mubr.bf16.gmra.mrb[172].mxu1 %v4569_v0  ;;  %v4559_v27 = vmax.f32 %v7168_v39, 0.0  ;;  %v7943_v0 = vld [vmem:[%s10731_s8 + $0x8] sm:$0xff]   ;;  %v7947_v39 = vld [vmem:[%s10732_s9 + $0x20] ss:$16 sps:$4 sm:$0xff]  }
 0x645   : > { %v7171_v41 = vadd.f32 %v4538_v5, %v3383_v8  ;;  %v4560_v16 = vmax.f32 %v7169_v30, 0.0  ;;  %v7950_v30 = vld [vmem:[%s10732_s9 + $0x40] ss:$16 sps:$4 sm:$0xff]   ;;  %v7955_v32 = vld [vmem:[%s10732_s9 + $0x64] ss:$16 sps:$4 sm:$0xff]  }
 0x646   : > { %v4561_v11 = vmax.f32 %v7170_v45, 0.0  ;;  %v7953_v45 = vld [vmem:[%s10732_s9 + $0x60] ss:$16 sps:$4 sm:$0xff]   ;;  %v7958_v5 = vld [vmem:[%s10732_s9 + $0x84] ss:$16 sps:$4 sm:$0xff]  }
 0x647   : > { %v4562_v35 = vmax.f32 %v7171_v41, 0.0  ;;  %v7956_v41 = vld [vmem:[%s10732_s9 + $0x80] ss:$16 sps:$4 sm:$0xff]  }
 0x648   : > { %v4571_v25 = vpack.c.bf16 %v4561_v11, %v4559_v27  ;;  %v7961_v27 = vld [vmem:[%s10732_s9 + $0xa4] ss:$16 sps:$4 sm:$0xff]   ;;  %v7959_v11 = vld [vmem:[%s10732_s9 + $0xa0] ss:$16 sps:$4 sm:$0xff]  }
 0x649   : > { %v4572_v58 = vpack.c.bf16 %v4562_v35, %v4560_v16  ;;  %v4542_v54 = vpop.f32.mrb[84].mxu0  ;;  %v7964_v16 = vld [vmem:[%s10732_s9 + $0xc4] ss:$16 sps:$4 sm:$0xff]   ;;  %v7962_v35 = vld [vmem:[%s10732_s9 + $0xc0] ss:$16 sps:$4 sm:$0xff]  }
 0x64a   : > { %v7172_v28 = vadd.f32 %v4542_v54, %v3379_v14  ;;  %v4544_v62 = vpop.f32.mrb[85].mxu0  ;;  %v7970_v54 = vld [vmem:[%s10732_s9 + $0x104] ss:$16 sps:$4 sm:$0xff]  }
 0x64b   : > { %v7173_v55 = vadd.f32 %v4544_v62, %v3383_v8  ;;  %v4546_v4 = vpop.f32.mrb[86].mxu0  ;;  %4751 = vmatprep.mubr.bf16.mxu1 %v4572_v58  ;;  %v7965_v58 = vld [vmem:[%s10732_s9 + $0xe0] ss:$16 sps:$4 sm:$0xff]   ;;  %v7973_v62 = vld [vmem:[%s10732_s9 + $0x124] ss:$16 sps:$4 sm:$0xff]  }
 0x64c   : > { %v7174_v42 = vadd.f32 %v4546_v4, %v3379_v14  ;;  %v4548_v13 = vpop.f32.mrb[87].mxu0  ;;  %4752 = vmatmul.mubr.bf16.gmra.mrb[176].mxu1 %v4571_v25  ;;  %v4563_v63 = vmax.f32 %v7172_v28, 0.0  ;;  %v7967_v25 = vld [vmem:[%s10732_s9 + $0xe4] ss:$16 sps:$4 sm:$0xff]   ;;  %v7968_v28 = vld [vmem:[%s10732_s9 + $0x100] ss:$16 sps:$4 sm:$0xff]  }
 0x64d   : > { %v7175_v52 = vadd.f32 %v4548_v13, %v3383_v8  ;;  %v4564_v34 = vmax.f32 %v7173_v55, 0.0  ;;  %v7971_v55 = vld [vmem:[%s10732_s9 + $0x120] ss:$16 sps:$4 sm:$0xff]   ;;  %v7976_v4 = vld [vmem:[%s10732_s9 + $0x144] ss:$16 sps:$4 sm:$0xff]  }
 0x64e   : > { %v4565_v47 = vmax.f32 %v7174_v42, 0.0  ;;  %v7974_v42 = vld [vmem:[%s10732_s9 + $0x140] ss:$16 sps:$4 sm:$0xff]   ;;  %v7979_v13 = vld [vmem:[%s10732_s9 + $0x164] ss:$16 sps:$4 sm:$0xff]  }
 0x64f   : > { %v4566_v36 = vmax.f32 %v7175_v52, 0.0  ;;  %v7977_v52 = vld [vmem:[%s10732_s9 + $0x160] ss:$16 sps:$4 sm:$0xff]  }
 0x650   : > { %v4573_v24 = vpack.c.bf16 %v4565_v47, %v4563_v63  ;;  %v7982_v63 = vld [vmem:[%s10732_s9 + $0x184] ss:$16 sps:$4 sm:$0xff]   ;;  %v7980_v47 = vld [vmem:[%s10732_s9 + $0x180] ss:$16 sps:$4 sm:$0xff]  }
 0x651   : > { %v4574_v51 = vpack.c.bf16 %v4566_v36, %v4564_v34  ;;  %v7985_v34 = vld [vmem:[%s10732_s9 + $0x1a4] ss:$16 sps:$4 sm:$0xff]   ;;  %v7983_v36 = vld [vmem:[%s10732_s9 + $0x1a0] ss:$16 sps:$4 sm:$0xff]  }
 0x653   : > { %4759 = vmatprep.mubr.bf16.mxu1 %v4574_v51  ;;  %v7986_v51 = vld [vmem:[%s10732_s9 + $0x1c0] ss:$16 sps:$4 sm:$0xff]  }
 0x654   : > { %4760 = vmatmul.mubr.bf16.gmra.mrb[180].mxu1 %v4573_v24  ;;  %v7988_v24 = vld [vmem:[%s10732_s9 + $0x1c4] ss:$16 sps:$4 sm:$0xff]  }
 0x655   : > { %7108 = vmatprep.mubr.msk.bf16.mxu1 %vm3080_vm0, %v7942_v44  ;;  %v7991_v44 = vld [vmem:[%s10732_s9 + $0x1e4] ss:$16 sps:$4 sm:$0xff]  }
 0x70f   : > { %v6986_v46 = vpop.f32.mrb[168].mxu1 }
 0x710   : > { %v6987_v22 = vpop.f32.mrb[169].mxu1 }
 0x711   : > { %v6988_v14 = vadd.f32 %v6987_v22, %v6986_v46  ;;  %v6989_v61 = vpop.f32.mrb[170].mxu1  ;;  %v7989_v46 = vld [vmem:[%s10732_s9 + $0x1e0] ss:$16 sps:$4 sm:$0xff]   ;;  %v7994_v22 = vld [vmem:[%s10732_s9 + $0x204] ss:$16 sps:$4 sm:$0xff]  }
 0x712   : > { %v6990_v48 = vpop.f32.mrb[171].mxu1 }
 0x713   : > { %v6991_v8 = vadd.f32 %v6990_v48, %v6989_v61 }
 0x715   : > { %v4772_v53 = vpack.c.bf16 %v6991_v8, %v6988_v14 }
 0x717   : > { %v6992_v40 = vpop.f32.mrb[172].mxu1  ;;  %7100 = vmatprep.subr.bf16.mxu1 %v4772_v53 }
 0x718   : > { %v6993_v56 = vpop.f32.mrb[173].mxu1  ;;  %7101 = vmatpush3.bf16.msra.mxu1 %v4772_v53 }
 0x719   : > { %v6994_v50 = vadd.f32 %v6993_v56, %v6992_v40  ;;  %v6995_v49 = vpop.f32.mrb[174].mxu1  ;;  %v7992_v40 = vld [vmem:[%s10732_s9 + $0x200] ss:$16 sps:$4 sm:$0xff]  }
 0x71a   : > { %v6996_v19 = vpop.f32.mrb[175].mxu1 }
 0x71b   : > { %v6997_v18 = vadd.f32 %v6996_v19, %v6995_v49  ;;  %v7995_v19 = vld [vmem:[%s10732_s9 + $0x220] ss:$16 sps:$4 sm:$0xff]  }
 0x71d   : > { %v4773_v6 = vpack.c.bf16 %v6997_v18, %v6994_v50  ;;  %v7997_v50 = vld [vmem:[%s10732_s9 + $0x224] ss:$16 sps:$4 sm:$0xff]  }
 0x71e   : > { %v8000_v18 = vld [vmem:[%s10732_s9 + $0x244] ss:$16 sps:$4 sm:$0xff]  }
 0x71f   : > { %v6998_v2 = vpop.f32.mrb[176].mxu1  ;;  %7102 = vmatprep.subr.bf16.mxu1 %v4773_v6 }
 0x720   : > { %v6999_v17 = vpop.f32.mrb[177].mxu1  ;;  %7103 = vmatpush3.bf16.msra.mxu1 %v4773_v6  ;;  %v7998_v6 = vld [vmem:[%s10732_s9 + $0x240] ss:$16 sps:$4 sm:$0xff]  }
 0x721   : > { %v7000_v1 = vadd.f32 %v6999_v17, %v6998_v2  ;;  %v7001_v38 = vpop.f32.mrb[178].mxu1  ;;  %v8003_v2 = vld [vmem:[%s10732_s9 + $0x264] ss:$16 sps:$4 sm:$0xff]   ;;  %v8001_v17 = vld [vmem:[%s10732_s9 + $0x260] ss:$16 sps:$4 sm:$0xff]  }
 0x722   : > { %v7002_v33 = vpop.f32.mrb[179].mxu1 }
 0x723   : > { %v7003_v3 = vadd.f32 %v7002_v33, %v7001_v38  ;;  %v8004_v38 = vld [vmem:[%s10732_s9 + $0x280] ss:$16 sps:$4 sm:$0xff]   ;;  %v8009_v33 = vld [vmem:[%s10732_s9 + $0x2a4] ss:$16 sps:$4 sm:$0xff]  }
 0x725   : > { %v4774_v43 = vpack.c.bf16 %v7003_v3, %v7000_v1  ;;  %v8006_v1 = vld [vmem:[%s10732_s9 + $0x284] ss:$16 sps:$4 sm:$0xff]   ;;  %v8007_v3 = vld [vmem:[%s10732_s9 + $0x2a0] ss:$16 sps:$4 sm:$0xff]  }
 0x727   : > { %v7004_v60 = vpop.f32.mrb[180].mxu1  ;;  %7104 = vmatprep.subr.bf16.mxu1 %v4774_v43 }
 0x728   : > { %v7005_v7 = vpop.f32.mrb[181].mxu1  ;;  %7105 = vmatpush3.bf16.msra.mxu1 %v4774_v43  ;;  %v8012_v43 = vld [vmem:[%s10732_s9 + $0x2c4] ss:$16 sps:$4 sm:$0xff]  }
 0x729   : > { %v7006_v57 = vadd.f32 %v7005_v7, %v7004_v60  ;;  %v7007_v9 = vpop.f32.mrb[182].mxu1  ;;  %v8010_v60 = vld [vmem:[%s10732_s9 + $0x2c0] ss:$16 sps:$4 sm:$0xff]   ;;  %v8015_v7 = vld [vmem:[%s10732_s9 + $0x2e4] ss:$16 sps:$4 sm:$0xff]  }
 0x72a   : > { %v7008_v31 = vpop.f32.mrb[183].mxu1 }
 0x72b   : > { %v7009_v59 = vadd.f32 %v7008_v31, %v7007_v9  ;;  %v8018_v9 = vld [vmem:[%s10732_s9 + $0x304] ss:$16 sps:$4 sm:$0xff]   ;;  %v8016_v31 = vld [vmem:[%s10732_s9 + $0x300] ss:$16 sps:$4 sm:$0xff]  }
 0x72d   : > { %v4775_v37 = vpack.c.bf16 %v7009_v59, %v7006_v57  ;;  %v8013_v57 = vld [vmem:[%s10732_s9 + $0x2e0] ss:$16 sps:$4 sm:$0xff]   ;;  %v8021_v59 = vld [vmem:[%s10732_s9 + $0x324] ss:$16 sps:$4 sm:$0xff]  }
 0x72f   : > { %7106 = vmatprep.subr.bf16.mxu1 %v4775_v37 }
 0x730   : > { %7107 = vmatpush3.bf16.msra.mxu1 %v4775_v37  ;;  %v8019_v37 = vld [vmem:[%s10732_s9 + $0x320] ss:$16 sps:$4 sm:$0xff]  }
 0x731   : > { %5635 = vmatprep.subr.bf16.mxu1 %v7946_v15  ;;  %v8024_v15 = vld [vmem:[%s10732_s9 + $0x344] ss:$16 sps:$4 sm:$0xff]  }
 0x733   : > { %7109 = vmatmul.mubr.msk.bf16.vlgmr.msra.gmra.mrb[184].mxu1 %vm3080_vm0, %v7943_v0  ;;  %v8022_v0 = vld [vmem:[%s10732_s9 + $0x340] ss:$16 sps:$4 sm:$0xff]  }
 0x734   : > { %5636 = vmatpush1.bf16.msra.mxu1 %v7944_v21  ;;  %v8027_v21 = vld [vmem:[%s10732_s9 + $0x364] ss:$16 sps:$4 sm:$0xff]  }
 0x735   : > { %5637 = vmatprep.subr.bf16.mxu1 %v7949_v23  ;;  %v8025_v23 = vld [vmem:[%s10732_s9 + $0x360] ss:$16 sps:$4 sm:$0xff]  }
 0x738   : > { %5638 = vmatpush1.bf16.msra.mxu1 %v7947_v39  ;;  %v8030_v39 = vld [vmem:[%s10732_s9 + $0x384] ss:$16 sps:$4 sm:$0xff]  }
 0x739   : > { %5639 = vmatprep.subr.bf16.mxu1 %v7952_v29  ;;  %v8028_v29 = vld [vmem:[%s10732_s9 + $0x380] ss:$16 sps:$4 sm:$0xff]  }
 0x73c   : > { %5640 = vmatpush1.bf16.msra.mxu1 %v7950_v30  ;;  %v8033_v30 = vld [vmem:[%s10732_s9 + $0x3a4] ss:$16 sps:$4 sm:$0xff]  }
 0x73d   : > { %5641 = vmatprep.subr.bf16.mxu1 %v7955_v32  ;;  %v8031_v32 = vld [vmem:[%s10732_s9 + $0x3a0] ss:$16 sps:$4 sm:$0xff]  }
 0x740   : > { %5642 = vmatpush1.bf16.msra.mxu1 %v7953_v45  ;;  %v8036_v45 = vld [vmem:[%s10732_s9 + $0x3c4] ss:$16 sps:$4 sm:$0xff]  }
 0x741   : > { %5643 = vmatprep.subr.bf16.mxu1 %v7958_v5  ;;  %v8034_v5 = vld [vmem:[%s10732_s9 + $0x3c0] ss:$16 sps:$4 sm:$0xff]  }
 0x744   : > { %5644 = vmatpush1.bf16.msra.mxu1 %v7956_v41  ;;  %v8039_v41 = vld [vmem:[%s10732_s9 + $0x3e4] ss:$16 sps:$4 sm:$0xff]  }
 0x745   : > { %5645 = vmatprep.subr.bf16.mxu1 %v7961_v27  ;;  %v8037_v27 = vld [vmem:[%s10732_s9 + $0x3e0] ss:$16 sps:$4 sm:$0xff]  }
 0x748   : > { %5646 = vmatpush1.bf16.msra.mxu1 %v7959_v11  ;;  %v8042_v11 = vld [vmem:[%s10732_s9 + $0xc] ss:$16 sps:$4 sm:$0xff]  }
 0x749   : > { %5647 = vmatprep.subr.bf16.mxu1 %v7964_v16  ;;  %v8040_v16 = vld [vmem:[%s10732_s9 + $0x8] ss:$16 sps:$4 sm:$0xff]  }
 0x74c   : > { %5648 = vmatpush1.bf16.msra.mxu1 %v7962_v35 }
 0x74d   : > { %5649 = vmatprep.subr.bf16.mxu1 %v7967_v25  ;;  %v8045_v25 = vld [vmem:[%s10732_s9 + $0x2c] ss:$16 sps:$4 sm:$0xff]  }
 0x750   : > { %5650 = vmatpush1.bf16.msra.mxu1 %v7965_v58  ;;  %v8136_v58 = vld [vmem:[%s10734_s11 + $0x40] sm:$0xff]  }
 0x751   : > { %5651 = vmatprep.subr.bf16.mxu1 %v7970_v54  ;;  %v8137_v54 = vld [vmem:[%s10734_s11] sm:$0xff]   ;;  %7016 = vmatprep.subr.bf16.mxu0 %v8136_v58  ;;  %v8151_v58 = vld [vmem:[%s10734_s11 + $0x38] sm:$0xff]  }
 0x752   : > { %7017 = vmatpush3.bf16.msra.mxu0 %v8137_v54  ;;  %v8109_v54 = vld [vmem:[%s10732_s9 + $0x2e8] ss:$16 sps:$4 sm:$0xff]  }
 0x754   : > { %5652 = vmatpush1.bf16.msra.mxu1 %v7968_v28  ;;  %v8138_v28 = vld [vmem:[%s10734_s11 + $0x48] sm:$0xff]  }
 0x755   : > { %5653 = vmatprep.subr.bf16.mxu1 %v7973_v62  ;;  %v8043_v62 = vld [vmem:[%s10732_s9 + $0x28] ss:$16 sps:$4 sm:$0xff]   ;;  %7018 = vmatprep.subr.bf16.mxu0 %v8138_v28  ;;  %v8114_v28 = vld [vmem:[%s10732_s9 + $0x30c] ss:$16 sps:$4 sm:$0xff]  }
 0x758   : > { %5654 = vmatpush1.bf16.msra.mxu1 %v7971_v55  ;;  %v8048_v55 = vld [vmem:[%s10732_s9 + $0x4c] ss:$16 sps:$4 sm:$0xff]  }
 0x759   : > { %5655 = vmatprep.subr.bf16.mxu1 %v7976_v4  ;;  %v8139_v4 = vld [vmem:[%s10734_s11 + $0x8] sm:$0xff]  }
 0x75a   : > { %7019 = vmatpush3.bf16.msra.mxu0 %v8139_v4  ;;  %v8117_v4 = vld [vmem:[%s10732_s9 + $0x32c] ss:$16 sps:$4 sm:$0xff]  }
 0x75c   : > { %5656 = vmatpush1.bf16.msra.mxu1 %v7974_v42  ;;  %v8140_v42 = vld [vmem:[%s10734_s11 + $0x50] sm:$0xff]  }
 0x75d   : > { %5657 = vmatprep.subr.bf16.mxu1 %v7979_v13  ;;  %v8046_v13 = vld [vmem:[%s10732_s9 + $0x48] ss:$16 sps:$4 sm:$0xff]   ;;  %7020 = vmatprep.subr.bf16.mxu0 %v8140_v42 }
 0x75e   : > { %v8115_v42 = vld [vmem:[%s10732_s9 + $0x328] ss:$16 sps:$4 sm:$0xff]  }
 0x760   : > { %5658 = vmatpush1.bf16.msra.mxu1 %v7977_v52  ;;  %v8051_v52 = vld [vmem:[%s10732_s9 + $0x6c] ss:$16 sps:$4 sm:$0xff]  }
 0x761   : > { %5659 = vmatprep.subr.bf16.mxu1 %v7982_v63  ;;  %v8141_v63 = vld [vmem:[%s10734_s11 + $0x10] sm:$0xff]  }
 0x762   : > { %7021 = vmatpush3.bf16.msra.mxu0 %v8141_v63  ;;  %v8123_v63 = vld [vmem:[%s10732_s9 + $0x36c] ss:$16 sps:$4 sm:$0xff]  }
 0x764   : > { %5660 = vmatpush1.bf16.msra.mxu1 %v7980_v47  ;;  %v8142_v47 = vld [vmem:[%s10734_s11 + $0x58] sm:$0xff]  }
 0x765   : > { %5661 = vmatprep.subr.bf16.mxu1 %v7985_v34  ;;  %v8049_v34 = vld [vmem:[%s10732_s9 + $0x68] ss:$16 sps:$4 sm:$0xff]   ;;  %7022 = vmatprep.subr.bf16.mxu0 %v8142_v47 }
 0x766   : > { %v8121_v47 = vld [vmem:[%s10732_s9 + $0x368] ss:$16 sps:$4 sm:$0xff]  }
 0x768   : > { %5662 = vmatpush1.bf16.msra.mxu1 %v7983_v36  ;;  %v8054_v36 = vld [vmem:[%s10732_s9 + $0x8c] ss:$16 sps:$4 sm:$0xff]  }
 0x769   : > { %5663 = vmatprep.subr.bf16.mxu1 %v7988_v24  ;;  %v8143_v24 = vld [vmem:[%s10734_s11 + $0x18] sm:$0xff]  }
 0x76a   : > { %7023 = vmatpush3.bf16.msra.mxu0 %v8143_v24  ;;  %v8129_v24 = vld [vmem:[%s10732_s9 + $0x3ac] ss:$16 sps:$4 sm:$0xff]  }
 0x76c   : > { %5664 = vmatpush1.bf16.msra.mxu1 %v7986_v51  ;;  %v8144_v51 = vld [vmem:[%s10734_s11 + $0x60] sm:$0xff]  }
 0x76d   : > { %5665 = vmatprep.subr.bf16.mxu1 %v7991_v44  ;;  %v8052_v44 = vld [vmem:[%s10732_s9 + $0x88] ss:$16 sps:$4 sm:$0xff]   ;;  %7024 = vmatprep.subr.bf16.mxu0 %v8144_v51 }
 0x76e   : > { %v8127_v51 = vld [vmem:[%s10732_s9 + $0x3a8] ss:$16 sps:$4 sm:$0xff]  }
 0x770   : > { %5666 = vmatpush1.bf16.msra.mxu1 %v7989_v46  ;;  %v8057_v46 = vld [vmem:[%s10732_s9 + $0xac] ss:$16 sps:$4 sm:$0xff]  }
 0x771   : > { %5676 = vmatprep.subr.bf16.mxu1 %v7994_v22  ;;  %v8145_v22 = vld [vmem:[%s10734_s11 + $0x20] sm:$0xff]  }
 0x772   : > { %7025 = vmatpush3.bf16.msra.mxu0 %v8145_v22  ;;  %v8135_v22 = vld [vmem:[%s10732_s9 + $0x3ec] ss:$16 sps:$4 sm:$0xff]  }
 0x806   : > { %v10264_v14 = vpop.f32.mrb[184].mxu1 }
 0x807   : > { %v4826_v61 = vpop.f32.mrb[185].mxu1  ;;  %v10376_v35 = vpack.c.bf16 %v10264_v14, %v10264_v14  ;;  %v8146_v14 = vld [vmem:[%s10734_s11 + $0x68] sm:$0xff]  }
 0x808   : > { %v7111_v48 = vpop.f32.mrb[186].mxu1  ;;  %v10271_v56 = vpack.c.bf16 %v4826_v61, %v4826_v61  ;;  %v8055_v61 = vld [vmem:[%s10732_s9 + $0xa8] ss:$16 sps:$4 sm:$0xff]   ;;  %7026 = vmatprep.subr.bf16.mxu0 %v8146_v14 }
 0x809   : > { %v4829_v8 = vpop.f32.mrb[187].mxu1  ;;  %v10276_v49 = vpack.c.bf16 %v7111_v48, %v7111_v48  ;;  %v8060_v48 = vld [vmem:[%s10732_s9 + $0xcc] ss:$16 sps:$4 sm:$0xff]   ;;  %v8133_v14 = vld [vmem:[%s10732_s9 + $0x3e8] ss:$16 sps:$4 sm:$0xff]  }
 0x80a   : > { %v10266_v53 = vpack.c.bf16 %v4829_v8, %v4829_v8  ;;  %v8147_v8 = vld [vmem:[%s10734_s11 + $0x28] sm:$0xff]  }
 0x80b   : > { %7027 = vmatpush3.bf16.msra.mxu0 %v8147_v8 }
 0x80c   : > { %5667 = vmatprep.mubr.bf16.mxu1 %v10266_v53 }
 0x80d   : > { %5668 = vmatmul.mubr.bf16.vlgmr.msra.gmra.mrb[188].mxu1 %v10271_v56 }
 0x80e   : > { %5677 = vmatpush1.bf16.msra.mxu1 %v7992_v40  ;;  %5708 = vmatprep.mubr.bf16.mxu1 %v10276_v49  ;;  %v8063_v40 = vld [vmem:[%s10732_s9 + $0xec] ss:$16 sps:$4 sm:$0xff]  }
 0x80f   : > { %5678 = vmatprep.subr.bf16.mxu1 %v7997_v50  ;;  %v8061_v50 = vld [vmem:[%s10732_s9 + $0xe8] ss:$16 sps:$4 sm:$0xff]  }
 0x812   : > { %5679 = vmatpush1.bf16.msra.mxu1 %v7995_v19  ;;  %v8066_v19 = vld [vmem:[%s10732_s9 + $0x10c] ss:$16 sps:$4 sm:$0xff]  }
 0x813   : > { %5680 = vmatprep.subr.bf16.mxu1 %v8000_v18  ;;  %v8064_v18 = vld [vmem:[%s10732_s9 + $0x108] ss:$16 sps:$4 sm:$0xff]  }
 0x816   : > { %5681 = vmatpush1.bf16.msra.mxu1 %v7998_v6  ;;  %v8069_v6 = vld [vmem:[%s10732_s9 + $0x12c] ss:$16 sps:$4 sm:$0xff]  }
 0x817   : > { %5682 = vmatprep.subr.bf16.mxu1 %v8003_v2  ;;  %v8067_v2 = vld [vmem:[%s10732_s9 + $0x128] ss:$16 sps:$4 sm:$0xff]  }
 0x81a   : > { %5683 = vmatpush1.bf16.msra.mxu1 %v8001_v17  ;;  %v8072_v17 = vld [vmem:[%s10732_s9 + $0x14c] ss:$16 sps:$4 sm:$0xff]  }
 0x81b   : > { %5684 = vmatprep.subr.bf16.mxu1 %v8006_v1  ;;  %v8070_v1 = vld [vmem:[%s10732_s9 + $0x148] ss:$16 sps:$4 sm:$0xff]  }
 0x81e   : > { %5685 = vmatpush1.bf16.msra.mxu1 %v8004_v38  ;;  %v8075_v38 = vld [vmem:[%s10732_s9 + $0x16c] ss:$16 sps:$4 sm:$0xff]  }
 0x81f   : > { %5686 = vmatprep.subr.bf16.mxu1 %v8009_v33  ;;  %v8073_v33 = vld [vmem:[%s10732_s9 + $0x168] ss:$16 sps:$4 sm:$0xff]  }
 0x822   : > { %5687 = vmatpush1.bf16.msra.mxu1 %v8007_v3  ;;  %v8078_v3 = vld [vmem:[%s10732_s9 + $0x18c] ss:$16 sps:$4 sm:$0xff]  }
 0x823   : > { %5688 = vmatprep.subr.bf16.mxu1 %v8012_v43  ;;  %v8076_v43 = vld [vmem:[%s10732_s9 + $0x188] ss:$16 sps:$4 sm:$0xff]  }
 0x826   : > { %5689 = vmatpush1.bf16.msra.mxu1 %v8010_v60  ;;  %v8081_v60 = vld [vmem:[%s10732_s9 + $0x1ac] ss:$16 sps:$4 sm:$0xff]  }
 0x827   : > { %5690 = vmatprep.subr.bf16.mxu1 %v8015_v7  ;;  %v8079_v7 = vld [vmem:[%s10732_s9 + $0x1a8] ss:$16 sps:$4 sm:$0xff]  }
 0x82a   : > { %5691 = vmatpush1.bf16.msra.mxu1 %v8013_v57  ;;  %v8084_v57 = vld [vmem:[%s10732_s9 + $0x1cc] ss:$16 sps:$4 sm:$0xff]  }
 0x82b   : > { %5692 = vmatprep.subr.bf16.mxu1 %v8018_v9  ;;  %v8082_v9 = vld [vmem:[%s10732_s9 + $0x1c8] ss:$16 sps:$4 sm:$0xff]  }
 0x82e   : > { %5693 = vmatpush1.bf16.msra.mxu1 %v8016_v31  ;;  %v8087_v31 = vld [vmem:[%s10732_s9 + $0x1ec] ss:$16 sps:$4 sm:$0xff]  }
 0x82f   : > { %5694 = vmatprep.subr.bf16.mxu1 %v8021_v59  ;;  %v8085_v59 = vld [vmem:[%s10732_s9 + $0x1e8] ss:$16 sps:$4 sm:$0xff]  }
 0x832   : > { %5695 = vmatpush1.bf16.msra.mxu1 %v8019_v37  ;;  %v8090_v37 = vld [vmem:[%s10732_s9 + $0x20c] ss:$16 sps:$4 sm:$0xff]  }
 0x833   : > { %5696 = vmatprep.subr.bf16.mxu1 %v8024_v15  ;;  %v8088_v15 = vld [vmem:[%s10732_s9 + $0x208] ss:$16 sps:$4 sm:$0xff]  }
 0x836   : > { %5697 = vmatpush1.bf16.msra.mxu1 %v8022_v0  ;;  %v8093_v0 = vld [vmem:[%s10732_s9 + $0x22c] ss:$16 sps:$4 sm:$0xff]  }
 0x837   : > { %5698 = vmatprep.subr.bf16.mxu1 %v8027_v21  ;;  %v8091_v21 = vld [vmem:[%s10732_s9 + $0x228] ss:$16 sps:$4 sm:$0xff]  }
 0x83a   : > { %5699 = vmatpush1.bf16.msra.mxu1 %v8025_v23  ;;  %v8096_v23 = vld [vmem:[%s10732_s9 + $0x24c] ss:$16 sps:$4 sm:$0xff]  }
 0x83b   : > { %5700 = vmatprep.subr.bf16.mxu1 %v8030_v39  ;;  %v8094_v39 = vld [vmem:[%s10732_s9 + $0x248] ss:$16 sps:$4 sm:$0xff]  }
 0x83e   : > { %5701 = vmatpush1.bf16.msra.mxu1 %v8028_v29  ;;  %v8102_v29 = vld [vmem:[%s10732_s9 + $0x28c] ss:$16 sps:$4 sm:$0xff]  }
 0x83f   : > { %5702 = vmatprep.subr.bf16.mxu1 %v8033_v30  ;;  %v8100_v30 = vld [vmem:[%s10732_s9 + $0x288] ss:$16 sps:$4 sm:$0xff]  }
 0x842   : > { %5703 = vmatpush1.bf16.msra.mxu1 %v8031_v32  ;;  %v8105_v32 = vld [vmem:[%s10732_s9 + $0x2ac] ss:$16 sps:$4 sm:$0xff]  }
 0x843   : > { %5704 = vmatprep.subr.bf16.mxu1 %v8036_v45  ;;  %v8103_v45 = vld [vmem:[%s10732_s9 + $0x2a8] ss:$16 sps:$4 sm:$0xff]  }
 0x846   : > { %5705 = vmatpush1.bf16.msra.mxu1 %v8034_v5  ;;  %v8108_v5 = vld [vmem:[%s10732_s9 + $0x2cc] ss:$16 sps:$4 sm:$0xff]  }
 0x847   : > { %5706 = vmatprep.subr.bf16.mxu1 %v8039_v41  ;;  %v8148_v41 = vld [vmem:[%s10734_s11 + $0x70] sm:$0xff]  }
 0x848   : > { %7028 = vmatprep.subr.bf16.mxu0 %v8148_v41 }
 0x84a   : > { %5707 = vmatpush1.bf16.msra.mxu1 %v8037_v27  ;;  %v8149_v27 = vld [vmem:[%s10734_s11 + $0x30] sm:$0xff]  }
 0x84b   : > { %5717 = vmatprep.subr.bf16.mxu1 %v8042_v11  ;;  %v8106_v11 = vld [vmem:[%s10732_s9 + $0x2c8] ss:$16 sps:$4 sm:$0xff]   ;;  %7029 = vmatpush3.bf16.msra.mxu0 %v8149_v27 }
 0x84d   : > { %5709 = vmatmul.mubr.bf16.vlgmr.msra.gmra.mrb[188].mxu1 %v10376_v35 }
 0x84e   : > { %5718 = vmatpush1.bf16.msra.mxu1 %v8040_v16  ;;  %5749 = vmatprep.mubr.bf16.mxu1 %v10266_v53  ;;  %v8058_v53 = vld [vmem:[%s10732_s9 + $0xc8] ss:$16 sps:$4 sm:$0xff]   ;;  %v8111_v16 = vld [vmem:[%s10732_s9 + $0x2ec] ss:$16 sps:$4 sm:$0xff]  }
 0x84f   : > { %5719 = vmatprep.subr.bf16.mxu1 %v8045_v25  ;;  %v8150_v25 = vld [vmem:[%s10734_s11 + $0x78] sm:$0xff]  }
 0x850   : > { %7030 = vmatprep.subr.bf16.mxu0 %v8150_v25 }
 0x851   : > { %7031 = vmatpush3.bf16.msra.mxu0 %v8151_v58 }
 0x852   : > { %5720 = vmatpush1.bf16.msra.mxu1 %v8043_v62  ;;  %v8152_v62 = vld [vmem:[%s10734_s11 + $0xc0] sm:$0xff]  }
 0x853   : > { %5721 = vmatprep.subr.bf16.mxu1 %v8048_v55  ;;  %v8112_v55 = vld [vmem:[%s10732_s9 + $0x308] ss:$16 sps:$4 sm:$0xff]   ;;  %7038 = vmatprep.subr.bf16.mxu0 %v8152_v62 }
 0x856   : > { %5722 = vmatpush1.bf16.msra.mxu1 %v8046_v13  ;;  %v8120_v13 = vld [vmem:[%s10732_s9 + $0x34c] ss:$16 sps:$4 sm:$0xff]  }
 0x857   : > { %5723 = vmatprep.subr.bf16.mxu1 %v8051_v52  ;;  %v8118_v52 = vld [vmem:[%s10732_s9 + $0x348] ss:$16 sps:$4 sm:$0xff]  }
 0x85a   : > { %5724 = vmatpush1.bf16.msra.mxu1 %v8049_v34  ;;  %v8126_v34 = vld [vmem:[%s10732_s9 + $0x38c] ss:$16 sps:$4 sm:$0xff]  }
 0x85b   : > { %5725 = vmatprep.subr.bf16.mxu1 %v8054_v36  ;;  %v8124_v36 = vld [vmem:[%s10732_s9 + $0x388] ss:$16 sps:$4 sm:$0xff]  }
 0x85e   : > { %5726 = vmatpush1.bf16.msra.mxu1 %v8052_v44  ;;  %v8132_v44 = vld [vmem:[%s10732_s9 + $0x3cc] ss:$16 sps:$4 sm:$0xff]  }
 0x85f   : > { %5727 = vmatprep.subr.bf16.mxu1 %v8057_v46  ;;  %v8130_v46 = vld [vmem:[%s10732_s9 + $0x3c8] ss:$16 sps:$4 sm:$0xff]  }
 0x862   : > { %5728 = vmatpush1.bf16.msra.mxu1 %v8055_v61  ;;  %v4973_v61 = vld [vmem:[%s10733_s10] sm:$0xf] }
 0x863   : > { %5729 = vmatprep.subr.bf16.mxu1 %v8060_v48  ;;  %v4978_v48 = vrot.slane %v4973_v61, %v9323_v10  ;;  %v4982_v8 = vrot.slane %v4973_v61, %v9327_v12  ;;  %v8154_v10 = vld [vmem:[%s10734_s11 + $0xc8] sm:$0xff]  }
 0x864   : > { %v8155_v12 = vld [vmem:[%s10734_s11 + $0x88] sm:$0xff]  }
 0x866   : > { %5730 = vmatpush1.bf16.msra.mxu1 %v8058_v53 }
 0x867   : > { %5731 = vmatprep.subr.bf16.mxu1 %v8063_v40 }
 0x86a   : > { %5732 = vmatpush1.bf16.msra.mxu1 %v8061_v50 }
 0x86b   : > { %5733 = vmatprep.subr.bf16.mxu1 %v8066_v19 }
 0x86e   : > { %5734 = vmatpush1.bf16.msra.mxu1 %v8064_v18 }
 0x86f   : > { %5735 = vmatprep.subr.bf16.mxu1 %v8069_v6 }
 0x872   : > { %5736 = vmatpush1.bf16.msra.mxu1 %v8067_v2 }
 0x873   : > { %5737 = vmatprep.subr.bf16.mxu1 %v8072_v17 }
 0x876   : > { %5738 = vmatpush1.bf16.msra.mxu1 %v8070_v1 }
 0x877   : > { %5739 = vmatprep.subr.bf16.mxu1 %v8075_v38 }
 0x87a   : > { %5740 = vmatpush1.bf16.msra.mxu1 %v8073_v33  ;;  %v8156_v33 = vld [vmem:[%s10734_s11 + $0xd0] sm:$0xff]  }
 0x87b   : > { %5741 = vmatprep.subr.bf16.mxu1 %v8078_v3  ;;  %v8157_v3 = vld [vmem:[%s10734_s11 + $0x90] sm:$0xff]  }
 0x87e   : > { %5742 = vmatpush1.bf16.msra.mxu1 %v8076_v43  ;;  %v8158_v43 = vld [vmem:[%s10734_s11 + $0xd8] sm:$0xff]  }
 0x87f   : > { %5743 = vmatprep.subr.bf16.mxu1 %v8081_v60  ;;  %v8159_v60 = vld [vmem:[%s10734_s11 + $0x98] sm:$0xff]  }
 0x882   : > { %5744 = vmatpush1.bf16.msra.mxu1 %v8079_v7  ;;  %v8160_v7 = vld [vmem:[%s10734_s11 + $0xe0] sm:$0xff]  }
 0x883   : > { %5745 = vmatprep.subr.bf16.mxu1 %v8084_v57  ;;  %v8161_v57 = vld [vmem:[%s10734_s11 + $0xa0] sm:$0xff]  }
 0x886   : > { %5746 = vmatpush1.bf16.msra.mxu1 %v8082_v9  ;;  %v8162_v9 = vld [vmem:[%s10734_s11 + $0xe8] sm:$0xff]  }
 0x887   : > { %5747 = vmatprep.subr.bf16.mxu1 %v8087_v31  ;;  %v8163_v31 = vld [vmem:[%s10734_s11 + $0xa8] sm:$0xff]  }
 0x88a   : > { %5748 = vmatpush1.bf16.msra.mxu1 %v8085_v59  ;;  %v8164_v59 = vld [vmem:[%s10734_s11 + $0xf0] sm:$0xff]  }
 0x88b   : > { %5758 = vmatprep.subr.bf16.mxu1 %v8090_v37  ;;  %v8165_v37 = vld [vmem:[%s10734_s11 + $0xb0] sm:$0xff]  }
 0x88d   : > { %5750 = vmatmul.mubr.bf16.vlgmr.msra.gmra.mrb[192].mxu1 %v10271_v56  ;;  %v8099_v56 = vld [vmem:[%s10732_s9 + $0x26c] ss:$16 sps:$4 sm:$0xff]  }
 0x88e   : > { %5759 = vmatpush1.bf16.msra.mxu1 %v8088_v15  ;;  %5790 = vmatprep.mubr.bf16.mxu1 %v10276_v49  ;;  %v8097_v49 = vld [vmem:[%s10732_s9 + $0x268] ss:$16 sps:$4 sm:$0xff]  }
 0x88f   : > { %5760 = vmatprep.subr.bf16.mxu1 %v8093_v0  ;;  %v8166_v15 = vld [vmem:[%s10734_s11 + $0xf8] sm:$0xff]  }
 0x890   : > { %v8167_v0 = vld [vmem:[%s10734_s11 + $0xb8] sm:$0xff]  }
 0x892   : > { %5761 = vmatpush1.bf16.msra.mxu1 %v8091_v21  ;;  %v4989_v21 = vsub.s32 3, %v9145_v20  ;;  %v6736_v20 = vld [vmem:[%s10735_s12] ss:$0 sm:$0xff] }
 0x893   : > { %5762 = vmatprep.subr.bf16.mxu1 %v8096_v23  ;;  %v4986_v23 = vrot.slane %v4973_v61, %v797_v26 }
 0x896   : > { %5763 = vmatpush1.bf16.msra.mxu1 %v8094_v39  ;;  %v4990_v39 = vrot.slane %v4973_v61, %v4989_v21 }
 0x897   : > { %5764 = vmatprep.subr.bf16.mxu1 %v8099_v56 }
 0x89a   : > { %5765 = vmatpush1.bf16.msra.mxu1 %v8097_v49 }
 0x89b   : > { %5766 = vmatprep.subr.bf16.mxu1 %v8102_v29 }
 0x89e   : > { %5767 = vmatpush1.bf16.msra.mxu1 %v8100_v30 }
 0x89f   : > { %5768 = vmatprep.subr.bf16.mxu1 %v8105_v32 }
 0x8a2   : > { %5769 = vmatpush1.bf16.msra.mxu1 %v8103_v45 }
 0x8a3   : > { %5770 = vmatprep.subr.bf16.mxu1 %v8108_v5 }
 0x8a6   : > { %5771 = vmatpush1.bf16.msra.mxu1 %v8106_v11 }
 0x8a7   : > { %5772 = vmatprep.subr.bf16.mxu1 %v8111_v16 }
 0x8aa   : > { %5773 = vmatpush1.bf16.msra.mxu1 %v8109_v54 }
 0x8ab   : > { %5774 = vmatprep.subr.bf16.mxu1 %v8114_v28 }
 0x8ae   : > { %5775 = vmatpush1.bf16.msra.mxu1 %v8112_v55 }
 0x8af   : > { %5776 = vmatprep.subr.bf16.mxu1 %v8117_v4 }
 0x8b2   : > { %5777 = vmatpush1.bf16.msra.mxu1 %v8115_v42 }
 0x8b3   : > { %5778 = vmatprep.subr.bf16.mxu1 %v8120_v13 }
 0x8b6   : > { %5779 = vmatpush1.bf16.msra.mxu1 %v8118_v52 }
 0x8b7   : > { %5780 = vmatprep.subr.bf16.mxu1 %v8123_v63 }
 0x8ba   : > { %5781 = vmatpush1.bf16.msra.mxu1 %v8121_v47 }
 0x8bb   : > { %5782 = vmatprep.subr.bf16.mxu1 %v8126_v34 }
 0x8be   : > { %5783 = vmatpush1.bf16.msra.mxu1 %v8124_v36 }
 0x8bf   : > { %5784 = vmatprep.subr.bf16.mxu1 %v8129_v24 }
 0x8c2   : > { %5785 = vmatpush1.bf16.msra.mxu1 %v8127_v51 }
 0x8c3   : > { %5786 = vmatprep.subr.bf16.mxu1 %v8132_v44 }
 0x8c6   : > { %5787 = vmatpush1.bf16.msra.mxu1 %v8130_v46 }
 0x8c7   : > { %5788 = vmatprep.subr.bf16.mxu1 %v8135_v22 }
 0x8ca   : > { %5789 = vmatpush1.bf16.msra.mxu1 %v8133_v14 }
 0x8cd   : > { %5791 = vmatmul.mubr.bf16.vlgmr.msra.gmra.mrb[192].mxu1 %v10376_v35  ;;  %v8153_v35 = vld [vmem:[%s10734_s11 + $0x80] sm:$0xff]  }
 0x920   : > { %v5710_v53 = vpop.f32.mrb[188].mxu1 }
 0x921   : > { %v7176_v40 = vadd.f32 %v5710_v53, %v4978_v48  ;;  %v5712_v50 = vpop.f32.mrb[189].mxu1 }
 0x922   : > { %v7177_v19 = vadd.f32 %v5712_v50, %v4982_v8  ;;  %v5714_v18 = vpop.f32.mrb[190].mxu1 }
 0x923   : > { %v5799_v6 = vmax.f32 %v7176_v40, 0.0  ;;  %v5715_v2 = vpop.f32.mrb[191].mxu1 }
 0x924   : > { %v5800_v17 = vmax.f32 %v7177_v19, 0.0 }
 0x925   : > { %v5803_v38 = vpack.c.bf16 %v5799_v6, %v5799_v6 }
 0x926   : > { %v5804_v1 = vpack.c.bf16 %v5800_v17, %v5800_v17 }
 0x928   : > { %6102 = vmatprep.mubr.bf16.mxu0 %v5804_v1 }
 0x929   : > { %6103 = vmatmul.mubr.bf16.vlgmr.msra.gmra.mrb[88].mxu0 %v5803_v38 }
 0x92a   : > { %7039 = vmatpush3.bf16.msra.mxu0 %v8153_v35 }
 0x92b   : > { %7040 = vmatprep.subr.bf16.mxu0 %v8154_v10 }
 0x92e   : > { %7041 = vmatpush3.bf16.msra.mxu0 %v8155_v12 }
 0x92f   : > { %7042 = vmatprep.subr.bf16.mxu0 %v8156_v33 }
 0x932   : > { %7043 = vmatpush3.bf16.msra.mxu0 %v8157_v3 }
 0x933   : > { %7044 = vmatprep.subr.bf16.mxu0 %v8158_v43 }
 0x936   : > { %7045 = vmatpush3.bf16.msra.mxu0 %v8159_v60 }
 0x937   : > { %7046 = vmatprep.subr.bf16.mxu0 %v8160_v7 }
 0x93a   : > { %7047 = vmatpush3.bf16.msra.mxu0 %v8161_v57 }
 0x93b   : > { %7048 = vmatprep.subr.bf16.mxu0 %v8162_v9 }
 0x93e   : > { %7049 = vmatpush3.bf16.msra.mxu0 %v8163_v31 }
 0x93f   : > { %7050 = vmatprep.subr.bf16.mxu0 %v8164_v59 }
 0x942   : > { %7051 = vmatpush3.bf16.msra.mxu0 %v8165_v37 }
 0x943   : > { %7052 = vmatprep.subr.bf16.mxu0 %v8166_v15 }
 0x946   : > { %7053 = vmatpush3.bf16.msra.mxu0 %v8167_v0 }
 0x9a0   : > { %v5792_v56 = vpop.f32.mrb[192].mxu1 }
 0x9a1   : > { %v7178_v49 = vadd.f32 %v5792_v56, %v4986_v23  ;;  %v5794_v29 = vpop.f32.mrb[193].mxu1 }
 0x9a2   : > { %v7179_v30 = vadd.f32 %v5794_v29, %v4990_v39  ;;  %v5796_v32 = vpop.f32.mrb[194].mxu1 }
 0x9a3   : > { %v5801_v45 = vmax.f32 %v7178_v49, 0.0  ;;  %v5797_v5 = vpop.f32.mrb[195].mxu1 }
 0x9a4   : > { %v5802_v41 = vmax.f32 %v7179_v30, 0.0 }
 0x9a5   : > { %v5805_v11 = vpack.c.bf16 %v5801_v45, %v5801_v45 }
 0x9a6   : > { %v5806_v27 = vpack.c.bf16 %v5802_v41, %v5802_v41 }
 0x9a8   : > { %6142 = vmatprep.mubr.bf16.mxu0 %v5806_v27 }
 0x9a9   : > { %6143 = vmatmul.mubr.bf16.vlgmr.msra.gmra.mrb[92].mxu0 %v5805_v11 }
 0x9fc   : > { %v7032_v16 = vpop.f32.mrb[88].mxu0 }
 0x9fd   : > { %v7033_v25 = vpop.f32.mrb[89].mxu0 }
 0x9fe   : > { %v7034_v58 = vadd.f32 %v7033_v25, %v7032_v16  ;;  %v7035_v54 = vpop.f32.mrb[90].mxu0 }
 0x9ff   : > { %v7036_v28 = vpop.f32.mrb[91].mxu0 }
 0xa00   : > { %v6105_v55 = vadd.f32 %v7034_v58, %v6736_v20 }
 0xa7c   : > { %v7054_v26 = vpop.f32.mrb[92].mxu0 }
 0xa7d   : > { %v7055_v62 = vpop.f32.mrb[93].mxu0 }
 0xa7e   : > { %v7056_v4 = vadd.f32 %v7055_v62, %v7054_v26  ;;  %v7057_v42 = vpop.f32.mrb[94].mxu0 }
 0xa7f   : > { %v7058_v13 = vpop.f32.mrb[95].mxu0 }
 0xa80   : > { %v6145_v52 = vadd.f32 %v7056_v4, %v6105_v55 }
 0xa82   : > { %6150 = vmax.xlane.f32.xlu0 %v6145_v52 }
 0xb0f   : > { %v6151_v63 = vpop.xlane.xlu0 %6150 }
 0xb10   : > { %v6152_v47 = vsub.f32 %v6145_v52, %v6151_v63 }
 0xb12   : > { %v6153_v34 = vmul.f32 1.442695, %v6152_v47 }
 0xb14   : > { %8168 = vpow2.f32 %v6153_v34 }
 0xb1e   : > { %v8169_v36 = vpop.eup %8168 }
 0xb1f   : > { %6155 = vadd.xlane.f32.xlu0 %v8169_v36 }
 0xbac   : > { %v6156_v24 = vpop.xlane.xlu0 %6155 }
 0xbad   : > { %8170 = vlog2.f32 %v6156_v24 }
 0xbb7   : > { %v8171_v51 = vpop.eup %8170 }
 0xbb8   : > { %v6158_v44 = vmul.f32 0.6931472, %v8171_v51 }
 0xbba   : > { %v6159_v46 = vsub.f32 %v6152_v47, %v6158_v44 }
 0xbbc   : > { %6160 = vst [vmem:[%s436_s16] sm:$0xff] %v6159_v46 }
 0xbbd   : > { %8185 = shalt.err (!%p8182_p3)
}
 0xbbe   : > { %s8186_s15 = scalar_lea.hbm %s10681_s22, 128  ;;  %s8190_s16 = scalar_lea.hbm %s10736_s13, 256 }
 0xbbf   : > { %p8187_p4 = scmp.ne.s32.totalorder %s10681_s22, %s8186_s15  ;;  %p8191_p9 = scmp.lt.u32.totalorder %s10681_s22, %s10736_s13 }
 0xbc0   : > { %p8192_p10 = scmp.lt.u32.totalorder %s8190_s16, %s8186_s15  ;;  %p8194_p12 = scmp.lt.u32.totalorder %s8186_s15, %s10681_s22 }
 0xbc1   : > { %p8188_p7 = pnand %p8187_p4, %p8346_p5 }
 0xbc2   : > { %p8193_p11 = por %p8192_p10, %p8191_p9 }
 0xbc3   : > { %p8189_p8 = pneg %p8188_p7 }
 0xbc4   : > { %p8195_p13 = por %p8194_p12, %p8193_p11 }
 0xbc6   : > { %p8196_p0 = pnand %p8195_p13, %p8189_p8 }
 0xbc8   : > { %8199 = shalt.err (!%p8196_p0)
}
 0xbc9   : > { %7396 = dma.vmem_to_hbm [thread:$0]  (%p8346_p5), %s10683_s17, 128, %s10681_s22, %s6162_s19  }
 0xbca PF: > { %p7402_p1 = scmp.ge.s32.totalorder %s8234_s28, 2  ;;  %s6187_s29 = sand.u32 1, %s8222_s25  }
 0xbcb   : > { %s6188_s23 = scalar_lea.sflag [#allocation3], %s6187_s29 }
 0xbcc   : > { %p7399_p2 = pnand %p7402_p1, %p8350_p6 }
 0xbce   : > { %8217 = dma.done.wait (!%p7399_p2), %s6188_s23, 128  }
 0xbcf   : > { %8219 = vsyncadd (!%p7399_p2), %s6188_s23, 4294967168  ;;  %s10748_s28 = sld [smem:[#allocation6_spill]]  ;;  %s10749_s24 = sld [smem:[#allocation5_spill]] }
 0xbd0   : > { %s10750_s27 = sld [smem:[#allocation7_spill]]  ;;  %s10751_s25 = smov %s8226_s26 }
 0xbd5   : > { %p23_p3 = scmp.ge.s32.totalorder %s10748_s28, 4   ;;  %s10752_s26 = smov %s10749_s24 }
 0xbd7   :  { %25 = sbr.rel (!%p23_p3) target bundleno = 3 (0x3), region = 107 }
 0xbde   :  { %6193 = vsyncpa [#allocation3], 1 }
 0xbdf   :  { %6195 = vsyncpa [#allocation3 + $0x1], 1 }

</bundles_post_ra>
